<compile_context>
chip_gen: v7x
topology: tpu7x:2x2x1
jax: 0.10.0
libtpu: 0.0.40
codegen_flags: <defaults>
</compile_context>

<pallas_src>
import functools

import jax
import jax.numpy as jnp
from jax.experimental import pallas as pl
from jax.experimental.pallas import tpu as pltpu


def _round_up(x, m):
    return ((x + m - 1) // m) * m


# Pack all 16 conv taps into the contraction dim when the packed K stays small.
PACK_K_MAX = 256


def _use_packed(cin_true):
    return 16 * cin_true <= PACK_K_MAX


@functools.lru_cache(maxsize=1)
def _wide_mxu():
    """True on chips with 256x256 MXUs (v6e / v7x); False on v5e and older."""
    try:
        kind = jax.devices()[0].device_kind.lower()
    except Exception:
        return False
    return not any(t in kind for t in ("v5 lite", "v5e", "v5lite", "v4", "v3", "v2"))


def _pick_ntile(cout_pad):
    if cout_pad % 256 == 0 and _wide_mxu():
        return 256
    return 128


def _vmem_limit(est_bytes):
    # Footprint-derived limit; never below the 32 MiB scoped default, never
    # above v7x's 64 MiB physical VMEM per TensorCore.
    return int(min(max(est_bytes, 32 << 20), 64 << 20))


# ----------------------------------------------------------------------------
# Kernels
# ----------------------------------------------------------------------------
def _make_packed_conv_kernel(m, mode):
    """Single-dot conv (taps packed into K) + bias + (InstanceNorm) + act."""

    def kernel(x_ref, w_ref, b_ref, o_ref):
        # x_ref: (1, m, Kpad) bf16 ; w_ref: (Kpad, ntile) bf16 ; b_ref: (1, ntile) f32
        x = jnp.dot(x_ref[0], w_ref[...],
                    preferred_element_type=jnp.float32) + b_ref[...]
        if mode == "in_lrelu":
            inv = 1.0 / float(m)                     # all m rows are valid here
            mean = jnp.sum(x, axis=0, keepdims=True) * inv
            ex2 = jnp.sum(x * x, axis=0, keepdims=True) * inv
            var = jnp.maximum(ex2 - mean * mean, 0.0)
            x = (x - mean) * jax.lax.rsqrt(var + 1e-5)
            x = jnp.where(x >= 0, x, 0.2 * x)
        elif mode == "lrelu":
            x = jnp.where(x >= 0, x, 0.2 * x)
        elif mode == "sigmoid":
            x = jax.nn.sigmoid(x)
        else:
            raise ValueError(mode)
        o_ref[0] = x.astype(o_ref.dtype)

    return kernel


def _make_shifted_conv_kernel(offsets, m, ho, wo, mode):
    """Tap-sum conv over a flattened padded sample + bias + (IN) + act.

    Per-tap dot results are accumulated as values (no VMEM RMW scratch).
    """

    def compute(x_ref, w_ref, b_ref, o_ref, mask_ref):
        acc = None
        for t, off in enumerate(offsets):
            part = jnp.dot(x_ref[0, off:off + m, :], w_ref[t],
                           preferred_element_type=jnp.float32)
            acc = part if acc is None else acc + part
        x = acc + b_ref[...]
        if mode == "in_lrelu":
            # Stats over the real spatial positions only (junk flat columns are
            # zeroed by the precomputed (m, 1) column mask).
            inv = 1.0 / float(ho * wo)
            xm = x * mask_ref[...]
            mean = jnp.sum(xm, axis=0, keepdims=True) * inv
            ex2 = jnp.sum(xm * xm, axis=0, keepdims=True) * inv
            var = jnp.maximum(ex2 - mean * mean, 0.0)
            x = (x - mean) * jax.lax.rsqrt(var + 1e-5)
            x = jnp.where(x >= 0, x, 0.2 * x)
        elif mode == "lrelu":
            x = jnp.where(x >= 0, x, 0.2 * x)
        elif mode == "sigmoid":
            x = jax.nn.sigmoid(x)
        else:
            raise ValueError(mode)
        o_ref[0] = x.astype(o_ref.dtype)

    if mode == "in_lrelu":
        def kernel(x_ref, w_ref, b_ref, mask_ref, o_ref):
            compute(x_ref, w_ref, b_ref, o_ref, mask_ref)
    else:
        def kernel(x_ref, w_ref, b_ref, o_ref):
            compute(x_ref, w_ref, b_ref, o_ref, None)
    return kernel


# ----------------------------------------------------------------------------
# pallas_call wrappers
# ----------------------------------------------------------------------------
def _packed_conv_pallas(xf, wt, bias, mode, out_dtype, ntile):
    n, m, kp = xf.shape
    kpw, cout = wt.shape
    assert kpw == kp and kp % 128 == 0 and cout % ntile == 0
    n_ct = cout // ntile
    osz = 4 if out_dtype == jnp.float32 else 2
    blk = 2 * m * kp + 2 * kp * ntile + 4 * ntile + osz * m * ntile
    vmem = _vmem_limit(2 * blk + 4 * m * ntile * 4)
    xkw = {"pipeline_mode": pl.Buffered(1)} if n_ct >= 2 else {}
    return pl.pallas_call(
        _make_packed_conv_kernel(m, mode),
        out_shape=jax.ShapeDtypeStruct((n, m, cout), out_dtype),
        grid=(n, n_ct),
        in_specs=[
            pl.BlockSpec((1, m, kp), lambda i, c: (i, 0, 0), **xkw),
            pl.BlockSpec((kp, ntile), lambda i, c: (0, c)),
            pl.BlockSpec((1, ntile), lambda i, c: (0, c)),
        ],
        out_specs=pl.BlockSpec((1, m, ntile), lambda i, c: (i, 0, c)),
        compiler_params=pltpu.CompilerParams(
            dimension_semantics=("parallel", "parallel"),
            vmem_limit_bytes=vmem,
        ),
    )(xf, wt, bias)


def _shifted_conv_pallas(xf, wt, bias, mask, offsets, m, ho, wo, mode,
                         out_dtype, ntile):
    n, l, cin = xf.shape
    t, cin_w, cout = wt.shape
    assert cin_w == cin and cin % 128 == 0 and cout % ntile == 0
    n_ct = cout // ntile
    osz = 4 if out_dtype == jnp.float32 else 2
    blk = 2 * l * cin + 2 * t * cin * ntile + 4 * ntile + osz * m * ntile
    vmem = _vmem_limit(2 * blk + 4 * m * ntile * 4)
    xkw = {"pipeline_mode": pl.Buffered(1)} if n_ct >= 2 else {}
    in_specs = [
        pl.BlockSpec((1, l, cin), lambda i, c: (i, 0, 0), **xkw),
        pl.BlockSpec((t, cin, ntile), lambda i, c: (0, 0, c)),
        pl.BlockSpec((1, ntile), lambda i, c: (0, c)),
    ]
    args = [xf, wt, bias]
    if mode == "in_lrelu":
        in_specs.append(pl.BlockSpec((m, 1), lambda i, c: (0, 0)))
        args.append(mask)
    return pl.pallas_call(
        _make_shifted_conv_kernel(offsets, m, ho, wo, mode),
        out_shape=jax.ShapeDtypeStruct((n, m, cout), out_dtype),
        grid=(n, n_ct),
        in_specs=in_specs,
        out_specs=pl.BlockSpec((1, m, ntile), lambda i, c: (i, 0, c)),
        compiler_params=pltpu.CompilerParams(
            dimension_semantics=("parallel", "parallel"),
            vmem_limit_bytes=vmem,
        ),
    )(*args)


# ----------------------------------------------------------------------------
# Layout glue (reflect pad, im2col for small-K layers, space-to-depth for
# stride-2 shifted layers, channel/width padding, flatten).  No large im2col
# is ever materialized for big-channel layers.
# ----------------------------------------------------------------------------
def _prep_packed_input(x, cin_true, stride):
    """x: (N,H,W,Cstore) -> (N, ho*wo, Kpad) bf16 with taps packed into K."""
    x = x[..., :cin_true]
    xp = jnp.pad(x, ((0, 0), (1, 1), (1, 1), (0, 0)), mode="reflect")
    n, hp, wp, c = xp.shape
    if stride == 1:
        ho, wo = hp - 3, wp - 3
        taps = [xp[:, di:di + ho, dj:dj + wo, :]
                for di in range(4) for dj in range(4)]
    else:
        ho, wo = hp // 2 - 1, wp // 2 - 1
        taps = [xp[:, di:di + 2 * ho - 1:2, dj:dj + 2 * wo - 1:2, :]
                for di in range(4) for dj in range(4)]
    xcol = jnp.concatenate(taps, axis=-1)                # (n, ho, wo, 16*c)
    k = 16 * c
    kpad = _round_up(k, 128) - k
    if kpad:
        xcol = jnp.pad(xcol, ((0, 0), (0, 0), (0, 0), (0, kpad)))
    xf = xcol.reshape(n, ho * wo, k + kpad).astype(jnp.bfloat16)
    return xf, ho, wo


def _prep_shifted_input(x, stride):
    """x: (N,H,W,Cstore) -> flattened bf16 buffer + static tap offsets."""
    xp = jnp.pad(x, ((0, 0), (1, 1), (1, 1), (0, 0)), mode="reflect")
    n, hp, wp, c = xp.shape
    if stride == 2:
        # space-to-depth 2x2: k=4,s=2 conv -> k=2,s=1 conv on 4*C channels.
        assert hp % 2 == 0 and wp % 2 == 0
        xp = (xp.reshape(n, hp // 2, 2, wp // 2, 2, c)
                .transpose(0, 1, 3, 2, 4, 5)
                .reshape(n, hp // 2, wp // 2, 4 * c))
        hp, wp, c = hp // 2, wp // 2, 4 * c
        k = 2
    else:
        k = 4
    cpad = _round_up(c, 128) - c
    if cpad:
        xp = jnp.pad(xp, ((0, 0), (0, 0), (0, 0), (0, cpad)))
        c += cpad
    ho, wo = hp - (k - 1), wp - (k - 1)
    wpad = _round_up(wp, 8) - wp                          # sublane-align rows
    if wpad:
        xp = jnp.pad(xp, ((0, 0), (0, 0), (0, wpad), (0, 0)))
    w_eff = wp + wpad
    xp = jnp.pad(xp, ((0, 0), (0, 1), (0, 0), (0, 0)))    # one extra zero row
    xf = xp.reshape(n, (hp + 1) * w_eff, c).astype(jnp.bfloat16)
    offsets = tuple(di * w_eff + dj for di in range(k) for dj in range(k))
    return xf, offsets, ho, wo, w_eff


# ----------------------------------------------------------------------------
# Parameters (synthetic weights matching the PyTorch module's shapes, packed
# into the layouts consumed by the kernels).
# ----------------------------------------------------------------------------
def _pack_packed_conv(w, b):
    """w: (Co, Ci, 4, 4) -> (Kpad, Co_pad) with rows ordered (di, dj, ci)."""
    co, ci, kh, kw = w.shape
    wt = jnp.transpose(w, (2, 3, 1, 0)).reshape(kh * kw * ci, co)
    kpad = _round_up(wt.shape[0], 128) - wt.shape[0]
    cpad = _round_up(co, 128) - co
    wt = jnp.pad(wt, ((0, kpad), (0, cpad)))
    bias = jnp.pad(b, (0, cpad)).reshape(1, -1).astype(jnp.float32)
    return wt.astype(jnp.bfloat16), bias


def _pack_shifted_conv(w, b, cin_store, stride):
    """w: (Co, Ci, 4, 4) -> (T, Kpad, Co_pad) per-tap weight matrices."""
    co, ci, _, _ = w.shape
    wt = jnp.transpose(w, (2, 3, 1, 0))                   # (di, dj, ci, co)
    if stride == 1:
        wt = wt.reshape(16, ci, co)                       # tap = di*4 + dj
        wt = jnp.pad(wt, ((0, 0), (0, cin_store - ci), (0, 0)))
        rows = cin_store
    else:
        # taps (a,b) over the space-to-depth input; rows ordered (p, q, ci).
        wt = wt.reshape(2, 2, 2, 2, ci, co)               # (a, p, b, q, ci, co)
        wt = jnp.transpose(wt, (0, 2, 1, 3, 4, 5))        # (a, b, p, q, ci, co)
        wt = jnp.pad(wt, ((0, 0),) * 4 + ((0, cin_store - ci), (0, 0)))
        wt = wt.reshape(4, 4 * cin_store, co)
        rows = 4 * cin_store
    rpad = _round_up(rows, 128) - rows
    cpad = _round_up(co, 128) - co
    wt = jnp.pad(wt, ((0, 0), (0, rpad), (0, cpad)))
    bias = jnp.pad(b, (0, cpad)).reshape(1, -1).astype(jnp.float32)
    return wt.astype(jnp.bfloat16), bias


def layer_configs(in_channels, features):
    """Mirrors the PyTorch module: initial conv (s2, LeakyReLU), blocks
    (conv + InstanceNorm + LeakyReLU, stride 2 only when out == features[-1]),
    final 1-channel conv + sigmoid."""
    cfgs = [dict(cin=in_channels, cout=features[0], stride=2, mode="lrelu")]
    cin = features[0]
    for f in features[1:]:
        stride = 2 if f == features[-1] else 1
        cfgs.append(dict(cin=cin, cout=f, stride=stride, mode="in_lrelu"))
        cin = f
    cfgs.append(dict(cin=cin, cout=1, stride=1, mode="sigmoid"))
    return cfgs


def init_discriminator_params(key, in_channels, features):
    params = []
    store_c = in_channels          # channel count of the stored activation
    for cfg in layer_configs(in_channels, features):
        ci, co, stride = cfg["cin"], cfg["cout"], cfg["stride"]
        key, k1, k2 = jax.random.split(key, 3)
        w = jax.random.normal(k1, (co, ci, 4, 4), jnp.float32) * 0.02
        b = jax.random.normal(k2, (co,), jnp.float32) * 0.02
        if _use_packed(ci):
            wt, bias = _pack_packed_conv(w, b)
        else:
            wt, bias = _pack_shifted_conv(w, b, store_c, stride)
        params.append((wt, bias))
        store_c = wt.shape[-1]     # 128-padded out-channels feed next layer
    return params


# ----------------------------------------------------------------------------
# Forward pass
# ----------------------------------------------------------------------------
@functools.partial(jax.jit, static_argnames=("in_channels", "features"))
def discriminator_forward(x_nchw, params, in_channels, features):
    cfgs = layer_configs(in_channels, features)
    x = jnp.transpose(x_nchw, (0, 2, 3, 1))               # NCHW -> NHWC
    n = x.shape[0]
    for (wt, bias), cfg in zip(params, cfgs):
        ci, stride, mode = cfg["cin"], cfg["stride"], cfg["mode"]
        out_dtype = jnp.float32 if mode == "sigmoid" else jnp.bfloat16
        cout_pad = wt.shape[-1]
        ntile = _pick_ntile(cout_pad)
        if _use_packed(ci):
            xf, ho, wo = _prep_packed_input(x, ci, stride)
            y = _packed_conv_pallas(xf, wt, bias, mode, out_dtype, ntile)
            x = y.reshape(n, ho, wo, cout_pad)
        else:
            xf, offsets, ho, wo, w_eff = _prep_shifted_input(x, stride)
            m = ho * w_eff
            mask = None
            if mode == "in_lrelu":
                col = jnp.arange(m, dtype=jnp.int32) % w_eff
                mask = (col < wo).astype(jnp.float32).reshape(m, 1)
            y = _shifted_conv_pallas(xf, wt, bias, mask, offsets, m, ho, wo,
                                     mode, out_dtype, ntile)
            x = y.reshape(n, ho, w_eff, cout_pad)[:, :, :wo, :]   # drop junk cols
    out = x[..., :1]                                      # real channel of final conv
    return jnp.transpose(out, (0, 3, 1, 2)).astype(jnp.float32)   # back to NCHW


if __name__ == "__main__":
    key = jax.random.PRNGKey(0)
    k_x, k_p = jax.random.split(key)

    # Small shapes consistent with the module: batch=2, in_channels=3,
    # spatial=16, features scaled down to (8, 16, 32, 64).
    in_channels = 3
    features = (8, 16, 32, 64)
    x = jax.random.normal(k_x, (2, in_channels, 16, 16), jnp.float32)

    params = init_discriminator_params(k_p, in_channels, features)

    out = discriminator_forward(x, params, in_channels, features)
    out = jax.block_until_ready(out)

    # Spatial trace: 16 ->(s2) 8 ->(s1) 7 ->(s1) 6 ->(s2) 3 ->(s1) 2
    assert out.shape == (2, 1, 2, 2), out.shape
    assert bool(jnp.all(jnp.isfinite(out)))
    assert bool(jnp.all((out >= 0.0) & (out <= 1.0)))     # sigmoid range
    print("KERNEL_OK")
</pallas_src>

<mosaic_0001>
module attributes {stable_mosaic.version = 11 : i64} {
  func.func @kernel(%arg0: i32, %arg1: i32, %arg2: memref<1x64x128xbf16, #tpu.memory_space<vmem>>, %arg3: memref<128x128xbf16, #tpu.memory_space<vmem>>, %arg4: memref<1x128xf32, #tpu.memory_space<vmem>>, %arg5: memref<1x64x128xbf16, #tpu.memory_space<vmem>>) attributes {dimension_semantics = [#tpu.dimension_semantics<parallel>, #tpu.dimension_semantics<parallel>], iteration_bounds = array<i64: 2, 1>, scalar_prefetch = 0 : i64, scratch_operands = 0 : i64, tpu.core_type = #tpu.core_type<tc>, window_params = [{transform_indices = @transform_0, window_bounds = array<i64: 1, 64, 128>}, {transform_indices = @transform_1, window_bounds = array<i64: 128, 128>}, {transform_indices = @transform_2, window_bounds = array<i64: 1, 128>}, {transform_indices = @transform_3, window_bounds = array<i64: 1, 64, 128>}]} {
    %c0 = arith.constant 0 : index
    %c0_0 = arith.constant 0 : index
    %c0_1 = arith.constant 0 : index
    %0 = vector.load %arg2[%c0, %c0_0, %c0_1] : memref<1x64x128xbf16, #tpu.memory_space<vmem>>, vector<1x64x128xbf16>
    %1 = vector.shape_cast %0 : vector<1x64x128xbf16> to vector<64x128xbf16>
    %c0_2 = arith.constant 0 : index
    %c0_3 = arith.constant 0 : index
    %2 = vector.load %arg3[%c0_2, %c0_3] : memref<128x128xbf16, #tpu.memory_space<vmem>>, vector<128x128xbf16>
    %cst = arith.constant dense<0.000000e+00> : vector<64x128xf32>
    %3 = tpu.matmul %1, %2, %cst {dimension_numbers = #tpu.dot_dimension_numbers<[1], [0], [0], [1], [0, 0, 1, 1], [], []>} : vector<64x128xbf16>, vector<128x128xbf16>, vector<64x128xf32> -> vector<64x128xf32>
    %c0_4 = arith.constant 0 : index
    %c0_5 = arith.constant 0 : index
    %4 = vector.load %arg4[%c0_4, %c0_5] : memref<1x128xf32, #tpu.memory_space<vmem>>, vector<1x128xf32>
    %5 = vector.broadcast %4 : vector<1x128xf32> to vector<64x128xf32>
    %6 = arith.addf %3, %5 : vector<64x128xf32>
    %cst_6 = arith.constant 0.000000e+00 : f32
    %7 = vector.broadcast %cst_6 : f32 to vector<64x128xf32>
    %8 = arith.cmpf oge, %6, %7 : vector<64x128xf32>
    %cst_7 = arith.constant 2.000000e-01 : f32
    %9 = vector.broadcast %cst_7 : f32 to vector<64x128xf32>
    %10 = arith.mulf %9, %6 : vector<64x128xf32>
    %11 = arith.select %8, %6, %10 : vector<64x128xi1>, vector<64x128xf32>
    %12 = arith.truncf %11 : vector<64x128xf32> to vector<64x128xbf16>
    %c0_8 = arith.constant 0 : index
    %c0_9 = arith.constant 0 : index
    %c0_10 = arith.constant 0 : index
    %13 = vector.load %arg5[%c0_8, %c0_9, %c0_10] : memref<1x64x128xbf16, #tpu.memory_space<vmem>>, vector<1x64x128xbf16>
    %14 = vector.shape_cast %13 : vector<1x64x128xbf16> to vector<64x128xbf16>
    %15 = vector.shape_cast %12 : vector<64x128xbf16> to vector<1x64x128xbf16>
    tpu.vector_store %arg5[%c0_8, %c0_9, %c0_10], %15 {strides = array<i32>} : memref<1x64x128xbf16, #tpu.memory_space<vmem>>, vector<1x64x128xbf16>,
    return
  }
  func.func @transform_0(%arg0: i32, %arg1: i32) -> (i32, i32, i32) {
    %c0_i32 = arith.constant 0 : i32
    %c0_i32_0 = arith.constant 0 : i32
    %c0_i32_1 = arith.constant 0 : i32
    return %arg0, %c0_i32, %c0_i32_0 : i32, i32, i32
  }
  func.func @transform_1(%arg0: i32, %arg1: i32) -> (i32, i32) {
    %c0_i32 = arith.constant 0 : i32
    %c0_i32_0 = arith.constant 0 : i32
    return %c0_i32, %arg1 : i32, i32
  }
  func.func @transform_2(%arg0: i32, %arg1: i32) -> (i32, i32) {
    %c0_i32 = arith.constant 0 : i32
    %c0_i32_0 = arith.constant 0 : i32
    return %c0_i32, %arg1 : i32, i32
  }
  func.func @transform_3(%arg0: i32, %arg1: i32) -> (i32, i32, i32) {
    %c0_i32 = arith.constant 0 : i32
    %c0_i32_0 = arith.constant 0 : i32
    return %arg0, %c0_i32, %arg1 : i32, i32, i32
  }
}

module attributes {stable_mosaic.version = 11 : i64} {
  func.func @kernel(%arg0: i32, %arg1: i32, %arg2: memref<1x49x128xbf16, #tpu.memory_space<vmem>>, %arg3: memref<128x128xbf16, #tpu.memory_space<vmem>>, %arg4: memref<1x128xf32, #tpu.memory_space<vmem>>, %arg5: memref<1x49x128xbf16, #tpu.memory_space<vmem>>) attributes {dimension_semantics = [#tpu.dimension_semantics<parallel>, #tpu.dimension_semantics<parallel>], iteration_bounds = array<i64: 2, 1>, scalar_prefetch = 0 : i64, scratch_operands = 0 : i64, tpu.core_type = #tpu.core_type<tc>, window_params = [{transform_indices = @transform_0, window_bounds = array<i64: 1, 49, 128>}, {transform_indices = @transform_1, window_bounds = array<i64: 128, 128>}, {transform_indices = @transform_2, window_bounds = array<i64: 1, 128>}, {transform_indices = @transform_3, window_bounds = array<i64: 1, 49, 128>}]} {
    %c0 = arith.constant 0 : index
    %c0_0 = arith.constant 0 : index
    %c0_1 = arith.constant 0 : index
    %0 = vector.load %arg2[%c0, %c0_0, %c0_1] : memref<1x49x128xbf16, #tpu.memory_space<vmem>>, vector<1x49x128xbf16>
    %1 = vector.shape_cast %0 : vector<1x49x128xbf16> to vector<49x128xbf16>
    %c0_2 = arith.constant 0 : index
    %c0_3 = arith.constant 0 : index
    %2 = vector.load %arg3[%c0_2, %c0_3] : memref<128x128xbf16, #tpu.memory_space<vmem>>, vector<128x128xbf16>
    %cst = arith.constant dense<0.000000e+00> : vector<49x128xf32>
    %3 = tpu.matmul %1, %2, %cst {dimension_numbers = #tpu.dot_dimension_numbers<[1], [0], [0], [1], [0, 0, 1, 1], [], []>} : vector<49x128xbf16>, vector<128x128xbf16>, vector<49x128xf32> -> vector<49x128xf32>
    %c0_4 = arith.constant 0 : index
    %c0_5 = arith.constant 0 : index
    %4 = vector.load %arg4[%c0_4, %c0_5] : memref<1x128xf32, #tpu.memory_space<vmem>>, vector<1x128xf32>
    %5 = vector.broadcast %4 : vector<1x128xf32> to vector<49x128xf32>
    %6 = arith.addf %3, %5 : vector<49x128xf32>
    %cst_6 = arith.constant dense<0.000000e+00> : vector<128xf32>
    %7 = vector.multi_reduction <add>, %6, %cst_6 [0] : vector<49x128xf32> to vector<128xf32>
    %8 = vector.shape_cast %7 : vector<128xf32> to vector<1x128xf32>
    %cst_7 = arith.constant 0.0204081628 : f32
    %9 = vector.broadcast %cst_7 : f32 to vector<1x128xf32>
    %10 = arith.mulf %8, %9 : vector<1x128xf32>
    %11 = arith.mulf %6, %6 : vector<49x128xf32>
    %cst_8 = arith.constant dense<0.000000e+00> : vector<128xf32>
    %12 = vector.multi_reduction <add>, %11, %cst_8 [0] : vector<49x128xf32> to vector<128xf32>
    %13 = vector.shape_cast %12 : vector<128xf32> to vector<1x128xf32>
    %cst_9 = arith.constant 0.0204081628 : f32
    %14 = vector.broadcast %cst_9 : f32 to vector<1x128xf32>
    %15 = arith.mulf %13, %14 : vector<1x128xf32>
    %16 = arith.mulf %10, %10 : vector<1x128xf32>
    %17 = arith.subf %15, %16 : vector<1x128xf32>
    %cst_10 = arith.constant 0.000000e+00 : f32
    %18 = vector.broadcast %cst_10 : f32 to vector<1x128xf32>
    %19 = arith.maximumf %17, %18 : vector<1x128xf32>
    %20 = vector.broadcast %10 : vector<1x128xf32> to vector<49x128xf32>
    %21 = arith.subf %6, %20 : vector<49x128xf32>
    %cst_11 = arith.constant 9.99999974E-6 : f32
    %22 = vector.broadcast %cst_11 : f32 to vector<1x128xf32>
    %23 = arith.addf %19, %22 : vector<1x128xf32>
    %24 = math.rsqrt %23 : vector<1x128xf32>
    %25 = vector.broadcast %24 : vector<1x128xf32> to vector<49x128xf32>
    %26 = arith.mulf %21, %25 : vector<49x128xf32>
    %cst_12 = arith.constant 0.000000e+00 : f32
    %27 = vector.broadcast %cst_12 : f32 to vector<49x128xf32>
    %28 = arith.cmpf oge, %26, %27 : vector<49x128xf32>
    %cst_13 = arith.constant 2.000000e-01 : f32
    %29 = vector.broadcast %cst_13 : f32 to vector<49x128xf32>
    %30 = arith.mulf %29, %26 : vector<49x128xf32>
    %31 = arith.select %28, %26, %30 : vector<49x128xi1>, vector<49x128xf32>
    %32 = arith.truncf %31 : vector<49x128xf32> to vector<49x128xbf16>
    %c0_14 = arith.constant 0 : index
    %c0_15 = arith.constant 0 : index
    %c0_16 = arith.constant 0 : index
    %33 = vector.load %arg5[%c0_14, %c0_15, %c0_16] : memref<1x49x128xbf16, #tpu.memory_space<vmem>>, vector<1x49x128xbf16>
    %34 = vector.shape_cast %33 : vector<1x49x128xbf16> to vector<49x128xbf16>
    %35 = vector.shape_cast %32 : vector<49x128xbf16> to vector<1x49x128xbf16>
    tpu.vector_store %arg5[%c0_14, %c0_15, %c0_16], %35 {strides = array<i32>} : memref<1x49x128xbf16, #tpu.memory_space<vmem>>, vector<1x49x128xbf16>,
    return
  }
  func.func @transform_0(%arg0: i32, %arg1: i32) -> (i32, i32, i32) {
    %c0_i32 = arith.constant 0 : i32
    %c0_i32_0 = arith.constant 0 : i32
    %c0_i32_1 = arith.constant 0 : i32
    return %arg0, %c0_i32, %c0_i32_0 : i32, i32, i32
  }
  func.func @transform_1(%arg0: i32, %arg1: i32) -> (i32, i32) {
    %c0_i32 = arith.constant 0 : i32
    %c0_i32_0 = arith.constant 0 : i32
    return %c0_i32, %arg1 : i32, i32
  }
  func.func @transform_2(%arg0: i32, %arg1: i32) -> (i32, i32) {
    %c0_i32 = arith.constant 0 : i32
    %c0_i32_0 = arith.constant 0 : i32
    return %c0_i32, %arg1 : i32, i32
  }
  func.func @transform_3(%arg0: i32, %arg1: i32) -> (i32, i32, i32) {
    %c0_i32 = arith.constant 0 : i32
    %c0_i32_0 = arith.constant 0 : i32
    return %arg0, %c0_i32, %arg1 : i32, i32, i32
  }
}

module attributes {stable_mosaic.version = 11 : i64} {
  func.func @kernel(%arg0: i32, %arg1: i32, %arg2: memref<1x36x256xbf16, #tpu.memory_space<vmem>>, %arg3: memref<256x128xbf16, #tpu.memory_space<vmem>>, %arg4: memref<1x128xf32, #tpu.memory_space<vmem>>, %arg5: memref<1x36x128xbf16, #tpu.memory_space<vmem>>) attributes {dimension_semantics = [#tpu.dimension_semantics<parallel>, #tpu.dimension_semantics<parallel>], iteration_bounds = array<i64: 2, 1>, scalar_prefetch = 0 : i64, scratch_operands = 0 : i64, tpu.core_type = #tpu.core_type<tc>, window_params = [{transform_indices = @transform_0, window_bounds = array<i64: 1, 36, 256>}, {transform_indices = @transform_1, window_bounds = array<i64: 256, 128>}, {transform_indices = @transform_2, window_bounds = array<i64: 1, 128>}, {transform_indices = @transform_3, window_bounds = array<i64: 1, 36, 128>}]} {
    %c0 = arith.constant 0 : index
    %c0_0 = arith.constant 0 : index
    %c0_1 = arith.constant 0 : index
    %0 = vector.load %arg2[%c0, %c0_0, %c0_1] : memref<1x36x256xbf16, #tpu.memory_space<vmem>>, vector<1x36x256xbf16>
    %1 = vector.shape_cast %0 : vector<1x36x256xbf16> to vector<36x256xbf16>
    %c0_2 = arith.constant 0 : index
    %c0_3 = arith.constant 0 : index
    %2 = vector.load %arg3[%c0_2, %c0_3] : memref<256x128xbf16, #tpu.memory_space<vmem>>, vector<256x128xbf16>
    %cst = arith.constant dense<0.000000e+00> : vector<36x128xf32>
    %3 = tpu.matmul %1, %2, %cst {dimension_numbers = #tpu.dot_dimension_numbers<[1], [0], [0], [1], [0, 0, 1, 1], [], []>} : vector<36x256xbf16>, vector<256x128xbf16>, vector<36x128xf32> -> vector<36x128xf32>
    %c0_4 = arith.constant 0 : index
    %c0_5 = arith.constant 0 : index
    %4 = vector.load %arg4[%c0_4, %c0_5] : memref<1x128xf32, #tpu.memory_space<vmem>>, vector<1x128xf32>
    %5 = vector.broadcast %4 : vector<1x128xf32> to vector<36x128xf32>
    %6 = arith.addf %3, %5 : vector<36x128xf32>
    %cst_6 = arith.constant dense<0.000000e+00> : vector<128xf32>
    %7 = vector.multi_reduction <add>, %6, %cst_6 [0] : vector<36x128xf32> to vector<128xf32>
    %8 = vector.shape_cast %7 : vector<128xf32> to vector<1x128xf32>
    %cst_7 = arith.constant 0.027777778 : f32
    %9 = vector.broadcast %cst_7 : f32 to vector<1x128xf32>
    %10 = arith.mulf %8, %9 : vector<1x128xf32>
    %11 = arith.mulf %6, %6 : vector<36x128xf32>
    %cst_8 = arith.constant dense<0.000000e+00> : vector<128xf32>
    %12 = vector.multi_reduction <add>, %11, %cst_8 [0] : vector<36x128xf32> to vector<128xf32>
    %13 = vector.shape_cast %12 : vector<128xf32> to vector<1x128xf32>
    %cst_9 = arith.constant 0.027777778 : f32
    %14 = vector.broadcast %cst_9 : f32 to vector<1x128xf32>
    %15 = arith.mulf %13, %14 : vector<1x128xf32>
    %16 = arith.mulf %10, %10 : vector<1x128xf32>
    %17 = arith.subf %15, %16 : vector<1x128xf32>
    %cst_10 = arith.constant 0.000000e+00 : f32
    %18 = vector.broadcast %cst_10 : f32 to vector<1x128xf32>
    %19 = arith.maximumf %17, %18 : vector<1x128xf32>
    %20 = vector.broadcast %10 : vector<1x128xf32> to vector<36x128xf32>
    %21 = arith.subf %6, %20 : vector<36x128xf32>
    %cst_11 = arith.constant 9.99999974E-6 : f32
    %22 = vector.broadcast %cst_11 : f32 to vector<1x128xf32>
    %23 = arith.addf %19, %22 : vector<1x128xf32>
    %24 = math.rsqrt %23 : vector<1x128xf32>
    %25 = vector.broadcast %24 : vector<1x128xf32> to vector<36x128xf32>
    %26 = arith.mulf %21, %25 : vector<36x128xf32>
    %cst_12 = arith.constant 0.000000e+00 : f32
    %27 = vector.broadcast %cst_12 : f32 to vector<36x128xf32>
    %28 = arith.cmpf oge, %26, %27 : vector<36x128xf32>
    %cst_13 = arith.constant 2.000000e-01 : f32
    %29 = vector.broadcast %cst_13 : f32 to vector<36x128xf32>
    %30 = arith.mulf %29, %26 : vector<36x128xf32>
    %31 = arith.select %28, %26, %30 : vector<36x128xi1>, vector<36x128xf32>
    %32 = arith.truncf %31 : vector<36x128xf32> to vector<36x128xbf16>
    %c0_14 = arith.constant 0 : index
    %c0_15 = arith.constant 0 : index
    %c0_16 = arith.constant 0 : index
    %33 = vector.load %arg5[%c0_14, %c0_15, %c0_16] : memref<1x36x128xbf16, #tpu.memory_space<vmem>>, vector<1x36x128xbf16>
    %34 = vector.shape_cast %33 : vector<1x36x128xbf16> to vector<36x128xbf16>
    %35 = vector.shape_cast %32 : vector<36x128xbf16> to vector<1x36x128xbf16>
    tpu.vector_store %arg5[%c0_14, %c0_15, %c0_16], %35 {strides = array<i32>} : memref<1x36x128xbf16, #tpu.memory_space<vmem>>, vector<1x36x128xbf16>,
    return
  }
  func.func @transform_0(%arg0: i32, %arg1: i32) -> (i32, i32, i32) {
    %c0_i32 = arith.constant 0 : i32
    %c0_i32_0 = arith.constant 0 : i32
    %c0_i32_1 = arith.constant 0 : i32
    return %arg0, %c0_i32, %c0_i32_0 : i32, i32, i32
  }
  func.func @transform_1(%arg0: i32, %arg1: i32) -> (i32, i32) {
    %c0_i32 = arith.constant 0 : i32
    %c0_i32_0 = arith.constant 0 : i32
    return %c0_i32, %arg1 : i32, i32
  }
  func.func @transform_2(%arg0: i32, %arg1: i32) -> (i32, i32) {
    %c0_i32 = arith.constant 0 : i32
    %c0_i32_0 = arith.constant 0 : i32
    return %c0_i32, %arg1 : i32, i32
  }
  func.func @transform_3(%arg0: i32, %arg1: i32) -> (i32, i32, i32) {
    %c0_i32 = arith.constant 0 : i32
    %c0_i32_0 = arith.constant 0 : i32
    return %arg0, %c0_i32, %arg1 : i32, i32, i32
  }
}

module attributes {stable_mosaic.version = 11 : i64} {
  func.func @kernel(%arg0: i32, %arg1: i32, %arg2: memref<1x40x512xbf16, #tpu.memory_space<vmem>>, %arg3: memref<4x512x128xbf16, #tpu.memory_space<vmem>>, %arg4: memref<1x128xf32, #tpu.memory_space<vmem>>, %arg5: memref<24x1xf32, #tpu.memory_space<vmem>>, %arg6: memref<1x24x128xbf16, #tpu.memory_space<vmem>>) attributes {dimension_semantics = [#tpu.dimension_semantics<parallel>, #tpu.dimension_semantics<parallel>], iteration_bounds = array<i64: 2, 1>, scalar_prefetch = 0 : i64, scratch_operands = 0 : i64, tpu.core_type = #tpu.core_type<tc>, window_params = [{transform_indices = @transform_0, window_bounds = array<i64: 1, 40, 512>}, {transform_indices = @transform_1, window_bounds = array<i64: 4, 512, 128>}, {transform_indices = @transform_2, window_bounds = array<i64: 1, 128>}, {pipeline_mode = #tpu.pipeline_mode<synchronous>, transform_indices = @transform_3, window_bounds = array<i64: 24, 1>}, {transform_indices = @transform_4, window_bounds = array<i64: 1, 24, 128>}]} {
    %c0 = arith.constant 0 : index
    %c0_0 = arith.constant 0 : index
    %c0_1 = arith.constant 0 : index
    %0 = vector.load %arg2[%c0, %c0_0, %c0_1] : memref<1x40x512xbf16, #tpu.memory_space<vmem>>, vector<1x24x512xbf16>
    %1 = vector.shape_cast %0 : vector<1x24x512xbf16> to vector<24x512xbf16>
    %c0_2 = arith.constant 0 : index
    %c0_3 = arith.constant 0 : index
    %c0_4 = arith.constant 0 : index
    %2 = vector.load %arg3[%c0_2, %c0_3, %c0_4] : memref<4x512x128xbf16, #tpu.memory_space<vmem>>, vector<1x512x128xbf16>
    %3 = vector.shape_cast %2 : vector<1x512x128xbf16> to vector<512x128xbf16>
    %cst = arith.constant dense<0.000000e+00> : vector<24x128xf32>
    %4 = tpu.matmul %1, %3, %cst {dimension_numbers = #tpu.dot_dimension_numbers<[1], [0], [0], [1], [0, 0, 1, 1], [], []>} : vector<24x512xbf16>, vector<512x128xbf16>, vector<24x128xf32> -> vector<24x128xf32>
    %c0_5 = arith.constant 0 : index
    %c1 = arith.constant 1 : index
    %c0_6 = arith.constant 0 : index
    %5 = vector.load %arg2[%c0_5, %c1, %c0_6] : memref<1x40x512xbf16, #tpu.memory_space<vmem>>, vector<1x24x512xbf16>
    %6 = vector.shape_cast %5 : vector<1x24x512xbf16> to vector<24x512xbf16>
    %c1_7 = arith.constant 1 : index
    %c0_8 = arith.constant 0 : index
    %c0_9 = arith.constant 0 : index
    %7 = vector.load %arg3[%c1_7, %c0_8, %c0_9] : memref<4x512x128xbf16, #tpu.memory_space<vmem>>, vector<1x512x128xbf16>
    %8 = vector.shape_cast %7 : vector<1x512x128xbf16> to vector<512x128xbf16>
    %cst_10 = arith.constant dense<0.000000e+00> : vector<24x128xf32>
    %9 = tpu.matmul %6, %8, %cst_10 {dimension_numbers = #tpu.dot_dimension_numbers<[1], [0], [0], [1], [0, 0, 1, 1], [], []>} : vector<24x512xbf16>, vector<512x128xbf16>, vector<24x128xf32> -> vector<24x128xf32>
    %10 = arith.addf %4, %9 : vector<24x128xf32>
    %c0_11 = arith.constant 0 : index
    %c8 = arith.constant 8 : index
    %c0_12 = arith.constant 0 : index
    %11 = vector.load %arg2[%c0_11, %c8, %c0_12] : memref<1x40x512xbf16, #tpu.memory_space<vmem>>, vector<1x24x512xbf16>
    %12 = vector.shape_cast %11 : vector<1x24x512xbf16> to vector<24x512xbf16>
    %c2 = arith.constant 2 : index
    %c0_13 = arith.constant 0 : index
    %c0_14 = arith.constant 0 : index
    %13 = vector.load %arg3[%c2, %c0_13, %c0_14] : memref<4x512x128xbf16, #tpu.memory_space<vmem>>, vector<1x512x128xbf16>
    %14 = vector.shape_cast %13 : vector<1x512x128xbf16> to vector<512x128xbf16>
    %cst_15 = arith.constant dense<0.000000e+00> : vector<24x128xf32>
    %15 = tpu.matmul %12, %14, %cst_15 {dimension_numbers = #tpu.dot_dimension_numbers<[1], [0], [0], [1], [0, 0, 1, 1], [], []>} : vector<24x512xbf16>, vector<512x128xbf16>, vector<24x128xf32> -> vector<24x128xf32>
    %16 = arith.addf %10, %15 : vector<24x128xf32>
    %c0_16 = arith.constant 0 : index
    %c9 = arith.constant 9 : index
    %c0_17 = arith.constant 0 : index
    %17 = vector.load %arg2[%c0_16, %c9, %c0_17] : memref<1x40x512xbf16, #tpu.memory_space<vmem>>, vector<1x24x512xbf16>
    %18 = vector.shape_cast %17 : vector<1x24x512xbf16> to vector<24x512xbf16>
    %c3 = arith.constant 3 : index
    %c0_18 = arith.constant 0 : index
    %c0_19 = arith.constant 0 : index
    %19 = vector.load %arg3[%c3, %c0_18, %c0_19] : memref<4x512x128xbf16, #tpu.memory_space<vmem>>, vector<1x512x128xbf16>
    %20 = vector.shape_cast %19 : vector<1x512x128xbf16> to vector<512x128xbf16>
    %cst_20 = arith.constant dense<0.000000e+00> : vector<24x128xf32>
    %21 = tpu.matmul %18, %20, %cst_20 {dimension_numbers = #tpu.dot_dimension_numbers<[1], [0], [0], [1], [0, 0, 1, 1], [], []>} : vector<24x512xbf16>, vector<512x128xbf16>, vector<24x128xf32> -> vector<24x128xf32>
    %22 = arith.addf %16, %21 : vector<24x128xf32>
    %c0_21 = arith.constant 0 : index
    %c0_22 = arith.constant 0 : index
    %23 = vector.load %arg4[%c0_21, %c0_22] : memref<1x128xf32, #tpu.memory_space<vmem>>, vector<1x128xf32>
    %24 = vector.broadcast %23 : vector<1x128xf32> to vector<24x128xf32>
    %25 = arith.addf %22, %24 : vector<24x128xf32>
    %c0_23 = arith.constant 0 : index
    %c0_24 = arith.constant 0 : index
    %26 = vector.load %arg5[%c0_23, %c0_24] : memref<24x1xf32, #tpu.memory_space<vmem>>, vector<24x1xf32>
    %27 = vector.broadcast %26 : vector<24x1xf32> to vector<24x128xf32>
    %28 = arith.mulf %25, %27 : vector<24x128xf32>
    %cst_25 = arith.constant dense<0.000000e+00> : vector<128xf32>
    %29 = vector.multi_reduction <add>, %28, %cst_25 [0] : vector<24x128xf32> to vector<128xf32>
    %30 = vector.shape_cast %29 : vector<128xf32> to vector<1x128xf32>
    %cst_26 = arith.constant 0.111111112 : f32
    %31 = vector.broadcast %cst_26 : f32 to vector<1x128xf32>
    %32 = arith.mulf %30, %31 : vector<1x128xf32>
    %33 = arith.mulf %28, %28 : vector<24x128xf32>
    %cst_27 = arith.constant dense<0.000000e+00> : vector<128xf32>
    %34 = vector.multi_reduction <add>, %33, %cst_27 [0] : vector<24x128xf32> to vector<128xf32>
    %35 = vector.shape_cast %34 : vector<128xf32> to vector<1x128xf32>
    %cst_28 = arith.constant 0.111111112 : f32
    %36 = vector.broadcast %cst_28 : f32 to vector<1x128xf32>
    %37 = arith.mulf %35, %36 : vector<1x128xf32>
    %38 = arith.mulf %32, %32 : vector<1x128xf32>
    %39 = arith.subf %37, %38 : vector<1x128xf32>
    %cst_29 = arith.constant 0.000000e+00 : f32
    %40 = vector.broadcast %cst_29 : f32 to vector<1x128xf32>
    %41 = arith.maximumf %39, %40 : vector<1x128xf32>
    %42 = vector.broadcast %32 : vector<1x128xf32> to vector<24x128xf32>
    %43 = arith.subf %25, %42 : vector<24x128xf32>
    %cst_30 = arith.constant 9.99999974E-6 : f32
    %44 = vector.broadcast %cst_30 : f32 to vector<1x128xf32>
    %45 = arith.addf %41, %44 : vector<1x128xf32>
    %46 = math.rsqrt %45 : vector<1x128xf32>
    %47 = vector.broadcast %46 : vector<1x128xf32> to vector<24x128xf32>
    %48 = arith.mulf %43, %47 : vector<24x128xf32>
    %cst_31 = arith.constant 0.000000e+00 : f32
    %49 = vector.broadcast %cst_31 : f32 to vector<24x128xf32>
    %50 = arith.cmpf oge, %48, %49 : vector<24x128xf32>
    %cst_32 = arith.constant 2.000000e-01 : f32
    %51 = vector.broadcast %cst_32 : f32 to vector<24x128xf32>
    %52 = arith.mulf %51, %48 : vector<24x128xf32>
    %53 = arith.select %50, %48, %52 : vector<24x128xi1>, vector<24x128xf32>
    %54 = arith.truncf %53 : vector<24x128xf32> to vector<24x128xbf16>
    %c0_33 = arith.constant 0 : index
    %c0_34 = arith.constant 0 : index
    %c0_35 = arith.constant 0 : index
    %55 = vector.load %arg6[%c0_33, %c0_34, %c0_35] : memref<1x24x128xbf16, #tpu.memory_space<vmem>>, vector<1x24x128xbf16>
    %56 = vector.shape_cast %55 : vector<1x24x128xbf16> to vector<24x128xbf16>
    %57 = vector.shape_cast %54 : vector<24x128xbf16> to vector<1x24x128xbf16>
    tpu.vector_store %arg6[%c0_33, %c0_34, %c0_35], %57 {strides = array<i32>} : memref<1x24x128xbf16, #tpu.memory_space<vmem>>, vector<1x24x128xbf16>,
    return
  }
  func.func @transform_0(%arg0: i32, %arg1: i32) -> (i32, i32, i32) {
    %c0_i32 = arith.constant 0 : i32
    %c0_i32_0 = arith.constant 0 : i32
    %c0_i32_1 = arith.constant 0 : i32
    return %arg0, %c0_i32, %c0_i32_0 : i32, i32, i32
  }
  func.func @transform_1(%arg0: i32, %arg1: i32) -> (i32, i32, i32) {
    %c0_i32 = arith.constant 0 : i32
    %c0_i32_0 = arith.constant 0 : i32
    %c0_i32_1 = arith.constant 0 : i32
    return %c0_i32, %c0_i32_0, %arg1 : i32, i32, i32
  }
  func.func @transform_2(%arg0: i32, %arg1: i32) -> (i32, i32) {
    %c0_i32 = arith.constant 0 : i32
    %c0_i32_0 = arith.constant 0 : i32
    return %c0_i32, %arg1 : i32, i32
  }
  func.func @transform_3(%arg0: i32, %arg1: i32) -> (i32, i32) {
    %c0_i32 = arith.constant 0 : i32
    %c0_i32_0 = arith.constant 0 : i32
    %c0_i32_1 = arith.constant 0 : i32
    return %c0_i32, %c0_i32_0 : i32, i32
  }
  func.func @transform_4(%arg0: i32, %arg1: i32) -> (i32, i32, i32) {
    %c0_i32 = arith.constant 0 : i32
    %c0_i32_0 = arith.constant 0 : i32
    return %arg0, %c0_i32, %arg1 : i32, i32, i32
  }
}

module attributes {stable_mosaic.version = 11 : i64} {
  func.func @kernel(%arg0: i32, %arg1: i32, %arg2: memref<1x48x128xbf16, #tpu.memory_space<vmem>>, %arg3: memref<16x128x128xbf16, #tpu.memory_space<vmem>>, %arg4: memref<1x128xf32, #tpu.memory_space<vmem>>, %arg5: memref<1x16x128xf32, #tpu.memory_space<vmem>>) attributes {dimension_semantics = [#tpu.dimension_semantics<parallel>, #tpu.dimension_semantics<parallel>], iteration_bounds = array<i64: 2, 1>, scalar_prefetch = 0 : i64, scratch_operands = 0 : i64, tpu.core_type = #tpu.core_type<tc>, window_params = [{transform_indices = @transform_0, window_bounds = array<i64: 1, 48, 128>}, {transform_indices = @transform_1, window_bounds = array<i64: 16, 128, 128>}, {transform_indices = @transform_2, window_bounds = array<i64: 1, 128>}, {transform_indices = @transform_3, window_bounds = array<i64: 1, 16, 128>}]} {
    %c0 = arith.constant 0 : index
    %c0_0 = arith.constant 0 : index
    %c0_1 = arith.constant 0 : index
    %0 = vector.load %arg2[%c0, %c0_0, %c0_1] : memref<1x48x128xbf16, #tpu.memory_space<vmem>>, vector<1x16x128xbf16>
    %1 = vector.shape_cast %0 : vector<1x16x128xbf16> to vector<16x128xbf16>
    %c0_2 = arith.constant 0 : index
    %c0_3 = arith.constant 0 : index
    %c0_4 = arith.constant 0 : index
    %2 = vector.load %arg3[%c0_2, %c0_3, %c0_4] : memref<16x128x128xbf16, #tpu.memory_space<vmem>>, vector<1x128x128xbf16>
    %3 = vector.shape_cast %2 : vector<1x128x128xbf16> to vector<128x128xbf16>
    %cst = arith.constant dense<0.000000e+00> : vector<16x128xf32>
    %4 = tpu.matmul %1, %3, %cst {dimension_numbers = #tpu.dot_dimension_numbers<[1], [0], [0], [1], [0, 0, 1, 1], [], []>} : vector<16x128xbf16>, vector<128x128xbf16>, vector<16x128xf32> -> vector<16x128xf32>
    %c0_5 = arith.constant 0 : index
    %c1 = arith.constant 1 : index
    %c0_6 = arith.constant 0 : index
    %5 = vector.load %arg2[%c0_5, %c1, %c0_6] : memref<1x48x128xbf16, #tpu.memory_space<vmem>>, vector<1x16x128xbf16>
    %6 = vector.shape_cast %5 : vector<1x16x128xbf16> to vector<16x128xbf16>
    %c1_7 = arith.constant 1 : index
    %c0_8 = arith.constant 0 : index
    %c0_9 = arith.constant 0 : index
    %7 = vector.load %arg3[%c1_7, %c0_8, %c0_9] : memref<16x128x128xbf16, #tpu.memory_space<vmem>>, vector<1x128x128xbf16>
    %8 = vector.shape_cast %7 : vector<1x128x128xbf16> to vector<128x128xbf16>
    %cst_10 = arith.constant dense<0.000000e+00> : vector<16x128xf32>
    %9 = tpu.matmul %6, %8, %cst_10 {dimension_numbers = #tpu.dot_dimension_numbers<[1], [0], [0], [1], [0, 0, 1, 1], [], []>} : vector<16x128xbf16>, vector<128x128xbf16>, vector<16x128xf32> -> vector<16x128xf32>
    %10 = arith.addf %4, %9 : vector<16x128xf32>
    %c0_11 = arith.constant 0 : index
    %c2 = arith.constant 2 : index
    %c0_12 = arith.constant 0 : index
    %11 = vector.load %arg2[%c0_11, %c2, %c0_12] : memref<1x48x128xbf16, #tpu.memory_space<vmem>>, vector<1x16x128xbf16>
    %12 = vector.shape_cast %11 : vector<1x16x128xbf16> to vector<16x128xbf16>
    %c2_13 = arith.constant 2 : index
    %c0_14 = arith.constant 0 : index
    %c0_15 = arith.constant 0 : index
    %13 = vector.load %arg3[%c2_13, %c0_14, %c0_15] : memref<16x128x128xbf16, #tpu.memory_space<vmem>>, vector<1x128x128xbf16>
    %14 = vector.shape_cast %13 : vector<1x128x128xbf16> to vector<128x128xbf16>
    %cst_16 = arith.constant dense<0.000000e+00> : vector<16x128xf32>
    %15 = tpu.matmul %12, %14, %cst_16 {dimension_numbers = #tpu.dot_dimension_numbers<[1], [0], [0], [1], [0, 0, 1, 1], [], []>} : vector<16x128xbf16>, vector<128x128xbf16>, vector<16x128xf32> -> vector<16x128xf32>
    %16 = arith.addf %10, %15 : vector<16x128xf32>
    %c0_17 = arith.constant 0 : index
    %c3 = arith.constant 3 : index
    %c0_18 = arith.constant 0 : index
    %17 = vector.load %arg2[%c0_17, %c3, %c0_18] : memref<1x48x128xbf16, #tpu.memory_space<vmem>>, vector<1x16x128xbf16>
    %18 = vector.shape_cast %17 : vector<1x16x128xbf16> to vector<16x128xbf16>
    %c3_19 = arith.constant 3 : index
    %c0_20 = arith.constant 0 : index
    %c0_21 = arith.constant 0 : index
    %19 = vector.load %arg3[%c3_19, %c0_20, %c0_21] : memref<16x128x128xbf16, #tpu.memory_space<vmem>>, vector<1x128x128xbf16>
    %20 = vector.shape_cast %19 : vector<1x128x128xbf16> to vector<128x128xbf16>
    %cst_22 = arith.constant dense<0.000000e+00> : vector<16x128xf32>
    %21 = tpu.matmul %18, %20, %cst_22 {dimension_numbers = #tpu.dot_dimension_numbers<[1], [0], [0], [1], [0, 0, 1, 1], [], []>} : vector<16x128xbf16>, vector<128x128xbf16>, vector<16x128xf32> -> vector<16x128xf32>
    %22 = arith.addf %16, %21 : vector<16x128xf32>
    %c0_23 = arith.constant 0 : index
    %c8 = arith.constant 8 : index
    %c0_24 = arith.constant 0 : index
    %23 = vector.load %arg2[%c0_23, %c8, %c0_24] : memref<1x48x128xbf16, #tpu.memory_space<vmem>>, vector<1x16x128xbf16>
    %24 = vector.shape_cast %23 : vector<1x16x128xbf16> to vector<16x128xbf16>
    %c4 = arith.constant 4 : index
    %c0_25 = arith.constant 0 : index
    %c0_26 = arith.constant 0 : index
    %25 = vector.load %arg3[%c4, %c0_25, %c0_26] : memref<16x128x128xbf16, #tpu.memory_space<vmem>>, vector<1x128x128xbf16>
    %26 = vector.shape_cast %25 : vector<1x128x128xbf16> to vector<128x128xbf16>
    %cst_27 = arith.constant dense<0.000000e+00> : vector<16x128xf32>
    %27 = tpu.matmul %24, %26, %cst_27 {dimension_numbers = #tpu.dot_dimension_numbers<[1], [0], [0], [1], [0, 0, 1, 1], [], []>} : vector<16x128xbf16>, vector<128x128xbf16>, vector<16x128xf32> -> vector<16x128xf32>
    %28 = arith.addf %22, %27 : vector<16x128xf32>
    %c0_28 = arith.constant 0 : index
    %c9 = arith.constant 9 : index
    %c0_29 = arith.constant 0 : index
    %29 = vector.load %arg2[%c0_28, %c9, %c0_29] : memref<1x48x128xbf16, #tpu.memory_space<vmem>>, vector<1x16x128xbf16>
    %30 = vector.shape_cast %29 : vector<1x16x128xbf16> to vector<16x128xbf16>
    %c5 = arith.constant 5 : index
    %c0_30 = arith.constant 0 : index
    %c0_31 = arith.constant 0 : index
    %31 = vector.load %arg3[%c5, %c0_30, %c0_31] : memref<16x128x128xbf16, #tpu.memory_space<vmem>>, vector<1x128x128xbf16>
    %32 = vector.shape_cast %31 : vector<1x128x128xbf16> to vector<128x128xbf16>
    %cst_32 = arith.constant dense<0.000000e+00> : vector<16x128xf32>
    %33 = tpu.matmul %30, %32, %cst_32 {dimension_numbers = #tpu.dot_dimension_numbers<[1], [0], [0], [1], [0, 0, 1, 1], [], []>} : vector<16x128xbf16>, vector<128x128xbf16>, vector<16x128xf32> -> vector<16x128xf32>
    %34 = arith.addf %28, %33 : vector<16x128xf32>
    %c0_33 = arith.constant 0 : index
    %c10 = arith.constant 10 : index
    %c0_34 = arith.constant 0 : index
    %35 = vector.load %arg2[%c0_33, %c10, %c0_34] : memref<1x48x128xbf16, #tpu.memory_space<vmem>>, vector<1x16x128xbf16>
    %36 = vector.shape_cast %35 : vector<1x16x128xbf16> to vector<16x128xbf16>
    %c6 = arith.constant 6 : index
    %c0_35 = arith.constant 0 : index
    %c0_36 = arith.constant 0 : index
    %37 = vector.load %arg3[%c6, %c0_35, %c0_36] : memref<16x128x128xbf16, #tpu.memory_space<vmem>>, vector<1x128x128xbf16>
    %38 = vector.shape_cast %37 : vector<1x128x128xbf16> to vector<128x128xbf16>
    %cst_37 = arith.constant dense<0.000000e+00> : vector<16x128xf32>
    %39 = tpu.matmul %36, %38, %cst_37 {dimension_numbers = #tpu.dot_dimension_numbers<[1], [0], [0], [1], [0, 0, 1, 1], [], []>} : vector<16x128xbf16>, vector<128x128xbf16>, vector<16x128xf32> -> vector<16x128xf32>
    %40 = arith.addf %34, %39 : vector<16x128xf32>
    %c0_38 = arith.constant 0 : index
    %c11 = arith.constant 11 : index
    %c0_39 = arith.constant 0 : index
    %41 = vector.load %arg2[%c0_38, %c11, %c0_39] : memref<1x48x128xbf16, #tpu.memory_space<vmem>>, vector<1x16x128xbf16>
    %42 = vector.shape_cast %41 : vector<1x16x128xbf16> to vector<16x128xbf16>
    %c7 = arith.constant 7 : index
    %c0_40 = arith.constant 0 : index
    %c0_41 = arith.constant 0 : index
    %43 = vector.load %arg3[%c7, %c0_40, %c0_41] : memref<16x128x128xbf16, #tpu.memory_space<vmem>>, vector<1x128x128xbf16>
    %44 = vector.shape_cast %43 : vector<1x128x128xbf16> to vector<128x128xbf16>
    %cst_42 = arith.constant dense<0.000000e+00> : vector<16x128xf32>
    %45 = tpu.matmul %42, %44, %cst_42 {dimension_numbers = #tpu.dot_dimension_numbers<[1], [0], [0], [1], [0, 0, 1, 1], [], []>} : vector<16x128xbf16>, vector<128x128xbf16>, vector<16x128xf32> -> vector<16x128xf32>
    %46 = arith.addf %40, %45 : vector<16x128xf32>
    %c0_43 = arith.constant 0 : index
    %c16 = arith.constant 16 : index
    %c0_44 = arith.constant 0 : index
    %47 = vector.load %arg2[%c0_43, %c16, %c0_44] : memref<1x48x128xbf16, #tpu.memory_space<vmem>>, vector<1x16x128xbf16>
    %48 = vector.shape_cast %47 : vector<1x16x128xbf16> to vector<16x128xbf16>
    %c8_45 = arith.constant 8 : index
    %c0_46 = arith.constant 0 : index
    %c0_47 = arith.constant 0 : index
    %49 = vector.load %arg3[%c8_45, %c0_46, %c0_47] : memref<16x128x128xbf16, #tpu.memory_space<vmem>>, vector<1x128x128xbf16>
    %50 = vector.shape_cast %49 : vector<1x128x128xbf16> to vector<128x128xbf16>
    %cst_48 = arith.constant dense<0.000000e+00> : vector<16x128xf32>
    %51 = tpu.matmul %48, %50, %cst_48 {dimension_numbers = #tpu.dot_dimension_numbers<[1], [0], [0], [1], [0, 0, 1, 1], [], []>} : vector<16x128xbf16>, vector<128x128xbf16>, vector<16x128xf32> -> vector<16x128xf32>
    %52 = arith.addf %46, %51 : vector<16x128xf32>
    %c0_49 = arith.constant 0 : index
    %c17 = arith.constant 17 : index
    %c0_50 = arith.constant 0 : index
    %53 = vector.load %arg2[%c0_49, %c17, %c0_50] : memref<1x48x128xbf16, #tpu.memory_space<vmem>>, vector<1x16x128xbf16>
    %54 = vector.shape_cast %53 : vector<1x16x128xbf16> to vector<16x128xbf16>
    %c9_51 = arith.constant 9 : index
    %c0_52 = arith.constant 0 : index
    %c0_53 = arith.constant 0 : index
    %55 = vector.load %arg3[%c9_51, %c0_52, %c0_53] : memref<16x128x128xbf16, #tpu.memory_space<vmem>>, vector<1x128x128xbf16>
    %56 = vector.shape_cast %55 : vector<1x128x128xbf16> to vector<128x128xbf16>
    %cst_54 = arith.constant dense<0.000000e+00> : vector<16x128xf32>
    %57 = tpu.matmul %54, %56, %cst_54 {dimension_numbers = #tpu.dot_dimension_numbers<[1], [0], [0], [1], [0, 0, 1, 1], [], []>} : vector<16x128xbf16>, vector<128x128xbf16>, vector<16x128xf32> -> vector<16x128xf32>
    %58 = arith.addf %52, %57 : vector<16x128xf32>
    %c0_55 = arith.constant 0 : index
    %c18 = arith.constant 18 : index
    %c0_56 = arith.constant 0 : index
    %59 = vector.load %arg2[%c0_55, %c18, %c0_56] : memref<1x48x128xbf16, #tpu.memory_space<vmem>>, vector<1x16x128xbf16>
    %60 = vector.shape_cast %59 : vector<1x16x128xbf16> to vector<16x128xbf16>
    %c10_57 = arith.constant 10 : index
    %c0_58 = arith.constant 0 : index
    %c0_59 = arith.constant 0 : index
    %61 = vector.load %arg3[%c10_57, %c0_58, %c0_59] : memref<16x128x128xbf16, #tpu.memory_space<vmem>>, vector<1x128x128xbf16>
    %62 = vector.shape_cast %61 : vector<1x128x128xbf16> to vector<128x128xbf16>
    %cst_60 = arith.constant dense<0.000000e+00> : vector<16x128xf32>
    %63 = tpu.matmul %60, %62, %cst_60 {dimension_numbers = #tpu.dot_dimension_numbers<[1], [0], [0], [1], [0, 0, 1, 1], [], []>} : vector<16x128xbf16>, vector<128x128xbf16>, vector<16x128xf32> -> vector<16x128xf32>
    %64 = arith.addf %58, %63 : vector<16x128xf32>
    %c0_61 = arith.constant 0 : index
    %c19 = arith.constant 19 : index
    %c0_62 = arith.constant 0 : index
    %65 = vector.load %arg2[%c0_61, %c19, %c0_62] : memref<1x48x128xbf16, #tpu.memory_space<vmem>>, vector<1x16x128xbf16>
    %66 = vector.shape_cast %65 : vector<1x16x128xbf16> to vector<16x128xbf16>
    %c11_63 = arith.constant 11 : index
    %c0_64 = arith.constant 0 : index
    %c0_65 = arith.constant 0 : index
    %67 = vector.load %arg3[%c11_63, %c0_64, %c0_65] : memref<16x128x128xbf16, #tpu.memory_space<vmem>>, vector<1x128x128xbf16>
    %68 = vector.shape_cast %67 : vector<1x128x128xbf16> to vector<128x128xbf16>
    %cst_66 = arith.constant dense<0.000000e+00> : vector<16x128xf32>
    %69 = tpu.matmul %66, %68, %cst_66 {dimension_numbers = #tpu.dot_dimension_numbers<[1], [0], [0], [1], [0, 0, 1, 1], [], []>} : vector<16x128xbf16>, vector<128x128xbf16>, vector<16x128xf32> -> vector<16x128xf32>
    %70 = arith.addf %64, %69 : vector<16x128xf32>
    %c0_67 = arith.constant 0 : index
    %c24 = arith.constant 24 : index
    %c0_68 = arith.constant 0 : index
    %71 = vector.load %arg2[%c0_67, %c24, %c0_68] : memref<1x48x128xbf16, #tpu.memory_space<vmem>>, vector<1x16x128xbf16>
    %72 = vector.shape_cast %71 : vector<1x16x128xbf16> to vector<16x128xbf16>
    %c12 = arith.constant 12 : index
    %c0_69 = arith.constant 0 : index
    %c0_70 = arith.constant 0 : index
    %73 = vector.load %arg3[%c12, %c0_69, %c0_70] : memref<16x128x128xbf16, #tpu.memory_space<vmem>>, vector<1x128x128xbf16>
    %74 = vector.shape_cast %73 : vector<1x128x128xbf16> to vector<128x128xbf16>
    %cst_71 = arith.constant dense<0.000000e+00> : vector<16x128xf32>
    %75 = tpu.matmul %72, %74, %cst_71 {dimension_numbers = #tpu.dot_dimension_numbers<[1], [0], [0], [1], [0, 0, 1, 1], [], []>} : vector<16x128xbf16>, vector<128x128xbf16>, vector<16x128xf32> -> vector<16x128xf32>
    %76 = arith.addf %70, %75 : vector<16x128xf32>
    %c0_72 = arith.constant 0 : index
    %c25 = arith.constant 25 : index
    %c0_73 = arith.constant 0 : index
    %77 = vector.load %arg2[%c0_72, %c25, %c0_73] : memref<1x48x128xbf16, #tpu.memory_space<vmem>>, vector<1x16x128xbf16>
    %78 = vector.shape_cast %77 : vector<1x16x128xbf16> to vector<16x128xbf16>
    %c13 = arith.constant 13 : index
    %c0_74 = arith.constant 0 : index
    %c0_75 = arith.constant 0 : index
    %79 = vector.load %arg3[%c13, %c0_74, %c0_75] : memref<16x128x128xbf16, #tpu.memory_space<vmem>>, vector<1x128x128xbf16>
    %80 = vector.shape_cast %79 : vector<1x128x128xbf16> to vector<128x128xbf16>
    %cst_76 = arith.constant dense<0.000000e+00> : vector<16x128xf32>
    %81 = tpu.matmul %78, %80, %cst_76 {dimension_numbers = #tpu.dot_dimension_numbers<[1], [0], [0], [1], [0, 0, 1, 1], [], []>} : vector<16x128xbf16>, vector<128x128xbf16>, vector<16x128xf32> -> vector<16x128xf32>
    %82 = arith.addf %76, %81 : vector<16x128xf32>
    %c0_77 = arith.constant 0 : index
    %c26 = arith.constant 26 : index
    %c0_78 = arith.constant 0 : index
    %83 = vector.load %arg2[%c0_77, %c26, %c0_78] : memref<1x48x128xbf16, #tpu.memory_space<vmem>>, vector<1x16x128xbf16>
    %84 = vector.shape_cast %83 : vector<1x16x128xbf16> to vector<16x128xbf16>
    %c14 = arith.constant 14 : index
    %c0_79 = arith.constant 0 : index
    %c0_80 = arith.constant 0 : index
    %85 = vector.load %arg3[%c14, %c0_79, %c0_80] : memref<16x128x128xbf16, #tpu.memory_space<vmem>>, vector<1x128x128xbf16>
    %86 = vector.shape_cast %85 : vector<1x128x128xbf16> to vector<128x128xbf16>
    %cst_81 = arith.constant dense<0.000000e+00> : vector<16x128xf32>
    %87 = tpu.matmul %84, %86, %cst_81 {dimension_numbers = #tpu.dot_dimension_numbers<[1], [0], [0], [1], [0, 0, 1, 1], [], []>} : vector<16x128xbf16>, vector<128x128xbf16>, vector<16x128xf32> -> vector<16x128xf32>
    %88 = arith.addf %82, %87 : vector<16x128xf32>
    %c0_82 = arith.constant 0 : index
    %c27 = arith.constant 27 : index
    %c0_83 = arith.constant 0 : index
    %89 = vector.load %arg2[%c0_82, %c27, %c0_83] : memref<1x48x128xbf16, #tpu.memory_space<vmem>>, vector<1x16x128xbf16>
    %90 = vector.shape_cast %89 : vector<1x16x128xbf16> to vector<16x128xbf16>
    %c15 = arith.constant 15 : index
    %c0_84 = arith.constant 0 : index
    %c0_85 = arith.constant 0 : index
    %91 = vector.load %arg3[%c15, %c0_84, %c0_85] : memref<16x128x128xbf16, #tpu.memory_space<vmem>>, vector<1x128x128xbf16>
    %92 = vector.shape_cast %91 : vector<1x128x128xbf16> to vector<128x128xbf16>
    %cst_86 = arith.constant dense<0.000000e+00> : vector<16x128xf32>
    %93 = tpu.matmul %90, %92, %cst_86 {dimension_numbers = #tpu.dot_dimension_numbers<[1], [0], [0], [1], [0, 0, 1, 1], [], []>} : vector<16x128xbf16>, vector<128x128xbf16>, vector<16x128xf32> -> vector<16x128xf32>
    %94 = arith.addf %88, %93 : vector<16x128xf32>
    %c0_87 = arith.constant 0 : index
    %c0_88 = arith.constant 0 : index
    %95 = vector.load %arg4[%c0_87, %c0_88] : memref<1x128xf32, #tpu.memory_space<vmem>>, vector<1x128xf32>
    %96 = vector.broadcast %95 : vector<1x128xf32> to vector<16x128xf32>
    %97 = arith.addf %94, %96 : vector<16x128xf32>
    %98 = arith.negf %97 : vector<16x128xf32>
    %99 = math.exp %98 : vector<16x128xf32>
    %cst_89 = arith.constant 1.000000e+00 : f32
    %100 = vector.broadcast %cst_89 : f32 to vector<16x128xf32>
    %101 = arith.addf %100, %99 : vector<16x128xf32>
    %102 = arith.divf %100, %101 : vector<16x128xf32>
    %c0_90 = arith.constant 0 : index
    %c0_91 = arith.constant 0 : index
    %c0_92 = arith.constant 0 : index
    %103 = vector.load %arg5[%c0_90, %c0_91, %c0_92] : memref<1x16x128xf32, #tpu.memory_space<vmem>>, vector<1x16x128xf32>
    %104 = vector.shape_cast %103 : vector<1x16x128xf32> to vector<16x128xf32>
    %105 = vector.shape_cast %102 : vector<16x128xf32> to vector<1x16x128xf32>
    tpu.vector_store %arg5[%c0_90, %c0_91, %c0_92], %105 {strides = array<i32>} : memref<1x16x128xf32, #tpu.memory_space<vmem>>, vector<1x16x128xf32>,
    return
  }
  func.func @transform_0(%arg0: i32, %arg1: i32) -> (i32, i32, i32) {
    %c0_i32 = arith.constant 0 : i32
    %c0_i32_0 = arith.constant 0 : i32
    %c0_i32_1 = arith.constant 0 : i32
    return %arg0, %c0_i32, %c0_i32_0 : i32, i32, i32
  }
  func.func @transform_1(%arg0: i32, %arg1: i32) -> (i32, i32, i32) {
    %c0_i32 = arith.constant 0 : i32
    %c0_i32_0 = arith.constant 0 : i32
    %c0_i32_1 = arith.constant 0 : i32
    return %c0_i32, %c0_i32_0, %arg1 : i32, i32, i32
  }
  func.func @transform_2(%arg0: i32, %arg1: i32) -> (i32, i32) {
    %c0_i32 = arith.constant 0 : i32
    %c0_i32_0 = arith.constant 0 : i32
    return %c0_i32, %arg1 : i32, i32
  }
  func.func @transform_3(%arg0: i32, %arg1: i32) -> (i32, i32, i32) {
    %c0_i32 = arith.constant 0 : i32
    %c0_i32_0 = arith.constant 0 : i32
    return %arg0, %c0_i32, %arg1 : i32, i32, i32
  }
}

</mosaic_0001>

<bundles_post_ra>
// kernel: discriminator_forward.5
= control target key start
LH: loop header
LB: loop body
LE: loop exit
PB: predicated region body
PF: predicated region fallthrough
CT: control target
= control target key end

     0   :  { %s759_s12 = smov 0   ;;  %s761_s13 = smov 0   ;;  %s834_s0 = inlined_call_operand.vmem [shape: bf16[2,64,128], index: 0, kind: input, shape index: {}]   ;;  %s835_s1 = inlined_call_operand.vmem [shape: bf16[128,128], index: 1, kind: input, shape index: {}]   ;;  %s836_s2 = inlined_call_operand.vmem [shape: f32[1,128], index: 2, kind: input, shape index: {}]   ;;  %s837_s3 = inlined_call_operand.vmem [shape: bf16[2,64,128], index: 3, kind: output, shape index: {}]  }
   0x1   :  { %s763_s14 = smov 0  }
   0x2 LB: > { %s25_s15 = sadd.s32 1, %s733_s13  ;;  %p566_p0 = scmp.ge.s32.totalorder %s737_s14, 1  ;;  %s737_s14 = sphi %s763_s14, %s13_s14   ;;  %s733_s13 = sphi %s761_s13, %s839_s13   ;;  %s729_s12 = sphi %s759_s12, %s838_s12  }
   0x3   : > { %p27_p1 = scmp.ge.s32.totalorder %s25_s15, 2  ;;  %p168_p2 = scmp.lt.s32.totalorder %s737_s14, 3 }
   0x5   : > { %s841_s15 = smov (%p27_p1, %s25_s15), 0  ;;  %p169_p3 = pnand %p566_p0, %p168_p2 }
   0x6   : > { %v703_v0 = vld [vmem:[%s835_s1] sm:$0xff] (!%p169_p3)   ;;  %p202_p4 = scmp.lt.s32.totalorder (!%p169_p3), %s729_s12, 1  ;;  %v704_v1 = vld [vmem:[%s835_s1 + $0x8] sm:$0xff] (!%p169_p3)   ;;  %v705_v2 = vld [vmem:[%s835_s1 + $0x10] sm:$0xff] (!%p169_p3)  }
   0x7   : > { %172 = sbr.rel (%p169_p3) target bundleno = 264 (0x108), region = 32  ;;  %639 = vmatprep.subr.bf16.mxu0 (!%p169_p3), %v703_v0  ;;  %663 = vmatprep.subr.bf16.mxu1 (!%p169_p3), %v703_v0  ;;  %v706_v3 = vld [vmem:[%s835_s1 + $0x18] sm:$0xff] (!%p169_p3)   ;;  %v707_v6 = vld [vmem:[%s835_s1 + $0x20] sm:$0xff] (!%p169_p3)   ;;  %v708_v7 = vld [vmem:[%s835_s1 + $0x28] sm:$0xff] (!%p169_p3)  }
   0x8   : > { %640 = vmatpush3.bf16.msra.mxu0 (!%p169_p3), %v703_v0  ;;  %671 = vmatpush3.bf16.msra.mxu1 (!%p169_p3), %v703_v0  ;;  %v709_v8 = vld [vmem:[%s835_s1 + $0x30] sm:$0xff] (!%p169_p3)   ;;  %v710_v9 = vld [vmem:[%s835_s1 + $0x38] sm:$0xff] (!%p169_p3)   ;;  %v571_v12 = vld [vmem:[%s836_s2] ss:$0 sm:$0xff] (!%p169_p3) }
   0x9   : > { %641 = vmatprep.subr.bf16.mxu0 (!%p169_p3), %v704_v1  ;;  %664 = vmatprep.subr.bf16.mxu1 (!%p169_p3), %v704_v1 }
   0xc   : > { %642 = vmatpush3.bf16.msra.mxu0 (!%p169_p3), %v704_v1  ;;  %672 = vmatpush3.bf16.msra.mxu1 (!%p169_p3), %v704_v1 }
   0xd   : > { %643 = vmatprep.subr.bf16.mxu0 (!%p169_p3), %v705_v2  ;;  %665 = vmatprep.subr.bf16.mxu1 (!%p169_p3), %v705_v2 }
   0xe   : > { %s843_s12 = smov (!%p202_p4, %s729_s12), 1 }
   0xf   : > { %s594_s22 = sshll.u32 %s843_s12, 5 }
  0x10   : > { %s794_s25 = scalar_lea.vmem %s834_s0, %s594_s22  ;;  %644 = vmatpush3.bf16.msra.mxu0 %v705_v2  ;;  %673 = vmatpush3.bf16.msra.mxu1 %v705_v2  ;;  %s221_s17 = scalar_lea.vmem %s837_s3, %s594_s22 }
  0x11   : > { %v711_v4 = vld [vmem:[%s794_s25] sm:$0xff]   ;;  %v712_v5 = vld [vmem:[%s794_s25 + $0x10] sm:$0xff]   ;;  %645 = vmatprep.subr.bf16.mxu0 %v706_v3  ;;  %666 = vmatprep.subr.bf16.mxu1 %v706_v3  ;;  %v713_v10 = vld [vmem:[%s794_s25 + $0x8] sm:$0xff]  }
  0x12   : > { %655 = vmatprep.mubr.bf16.mxu0 %v711_v4  ;;  %659 = vmatprep.mubr.bf16.mxu1 %v712_v5  ;;  %v714_v11 = vld [vmem:[%s794_s25 + $0x18] sm:$0xff]  }
  0x14   : > { %646 = vmatpush3.bf16.msra.mxu0 %v706_v3  ;;  %674 = vmatpush3.bf16.msra.mxu1 %v706_v3 }
  0x15   : > { %647 = vmatprep.subr.bf16.mxu0 %v707_v6  ;;  %667 = vmatprep.subr.bf16.mxu1 %v707_v6 }
  0x18   : > { %648 = vmatpush3.bf16.msra.mxu0 %v707_v6  ;;  %675 = vmatpush3.bf16.msra.mxu1 %v707_v6 }
  0x19   : > { %649 = vmatprep.subr.bf16.mxu0 %v708_v7  ;;  %668 = vmatprep.subr.bf16.mxu1 %v708_v7 }
  0x1c   : > { %650 = vmatpush3.bf16.msra.mxu0 %v708_v7  ;;  %676 = vmatpush3.bf16.msra.mxu1 %v708_v7 }
  0x1d   : > { %651 = vmatprep.subr.bf16.mxu0 %v709_v8  ;;  %669 = vmatprep.subr.bf16.mxu1 %v709_v8 }
  0x20   : > { %652 = vmatpush3.bf16.msra.mxu0 %v709_v8  ;;  %677 = vmatpush3.bf16.msra.mxu1 %v709_v8 }
  0x21   : > { %653 = vmatprep.subr.bf16.mxu0 %v710_v9  ;;  %670 = vmatprep.subr.bf16.mxu1 %v710_v9 }
  0x24   : > { %654 = vmatpush3.bf16.msra.mxu0 %v710_v9  ;;  %678 = vmatpush3.bf16.msra.mxu1 %v710_v9 }
  0x27   : > { %656 = vmatmul.mubr.bf16.vlgmr.msra.gmra.mrb[0].mxu0 %v713_v10  ;;  %660 = vmatmul.mubr.bf16.vlgmr.msra.gmra.mrb[0].mxu1 %v714_v11 }
  0xfa   : > { %v657_v13 = vpop.f32.mrb[0].mxu0  ;;  %v661_v14 = vpop.f32.mrb[0].mxu1 }
  0xfb   : > { %v369_v15 = vadd.f32 %v657_v13, %v571_v12  ;;  %v385_v16 = vadd.f32 %v661_v14, %v571_v12  ;;  %v360_v17 = vpop.f32.mrb[1].mxu0  ;;  %v376_v18 = vpop.f32.mrb[1].mxu1 }
  0xfc   : > { %v361_v19 = vadd.f32 %v571_v12, %v360_v17  ;;  %v377_v20 = vadd.f32 %v571_v12, %v376_v18  ;;  %v658_v21 = vpop.f32.mrb[2].mxu0  ;;  %v662_v22 = vpop.f32.mrb[2].mxu1 }
  0xfd   : > { %vm393_vm0 = vcmp.ge.f32.partialorder %v369_v15, 0.0  ;;  %v401_v23 = vmul.f32 0.2, %v369_v15  ;;  %vm397_vm1 = vcmp.ge.f32.partialorder %v385_v16, 0.0  ;;  %v405_v24 = vmul.f32 0.2, %v385_v16 }
  0xfe   : > { %vm391_vm2 = vcmp.ge.f32.partialorder %v361_v19, 0.0  ;;  %v399_v25 = vmul.f32 0.2, %v361_v19  ;;  %vm395_vm3 = vcmp.ge.f32.partialorder %v377_v20, 0.0  ;;  %v403_v26 = vmul.f32 0.2, %v377_v20 }
  0xff   : > { %v372_v27 = vadd.f32 %v658_v21, %v571_v12  ;;  %v388_v28 = vadd.f32 %v662_v22, %v571_v12  ;;  %v363_v29 = vpop.f32.mrb[3].mxu0  ;;  %v379_v30 = vpop.f32.mrb[3].mxu1  ;;  %v409_v31 = vsel %vm393_vm0, %v369_v15, %v401_v23  ;;  %v413_v32 = vsel %vm397_vm1, %v385_v16, %v405_v24 }
 0x100   : > { %v364_v33 = vadd.f32 %v571_v12, %v363_v29  ;;  %v380_v34 = vadd.f32 %v571_v12, %v379_v30  ;;  %v407_v39 = vsel %vm391_vm2, %v361_v19, %v399_v25  ;;  %v411_v40 = vsel %vm395_vm3, %v377_v20, %v403_v26 }
 0x101   : > { %vm394_vm4 = vcmp.ge.f32.partialorder %v372_v27, 0.0  ;;  %v402_v35 = vmul.f32 0.2, %v372_v27  ;;  %vm398_vm5 = vcmp.ge.f32.partialorder %v388_v28, 0.0  ;;  %v406_v36 = vmul.f32 0.2, %v388_v28 }
 0x102   : > { %vm392_vm6 = vcmp.ge.f32.partialorder %v364_v33, 0.0  ;;  %v400_v37 = vmul.f32 0.2, %v364_v33  ;;  %vm396_vm7 = vcmp.ge.f32.partialorder %v380_v34, 0.0  ;;  %v404_v38 = vmul.f32 0.2, %v380_v34 }
 0x103   : > { %v410_v41 = vsel %vm394_vm4, %v372_v27, %v402_v35  ;;  %v414_v42 = vsel %vm398_vm5, %v388_v28, %v406_v36 }
 0x104   : > { %v612_v43 = vpack.c.bf16 %v410_v41, %v409_v31  ;;  %v622_v44 = vpack.c.bf16 %v414_v42, %v413_v32  ;;  %v408_v45 = vsel %vm392_vm6, %v364_v33, %v400_v37  ;;  %v412_v46 = vsel %vm396_vm7, %v380_v34, %v404_v38 }
 0x105   : > { %v607_v47 = vpack.c.bf16 %v408_v45, %v407_v39  ;;  %v617_v48 = vpack.c.bf16 %v412_v46, %v411_v40 }
 0x106   : > { %624 = vst [vmem:[%s221_s17 + $0x8] sm:$0xff] %v612_v43   ;;  %626 = vst [vmem:[%s221_s17 + $0x18] sm:$0xff] %v622_v44  }
 0x107   : > { %608 = vst [vmem:[%s221_s17] sm:$0xff] %v607_v47   ;;  %625 = vst [vmem:[%s221_s17 + $0x10] sm:$0xff] %v617_v48  }
 0x108 PF: > { %s13_s14 = sadd.s32 1, %s737_s14   ;;  %s838_s12 = smov %s733_s13 }
 0x109   : > { %p10_p5 = scmp.ge.s32.totalorder %s13_s14, 4   ;;  %s839_s13 = smov %s841_s15 }
 0x10b   :  { %12 = sbr.rel (!%p10_p5) target bundleno = 2 (0x2), region = 68 }

// kernel: discriminator_forward.6
= control target key start
LH: loop header
LB: loop body
LE: loop exit
PB: predicated region body
PF: predicated region fallthrough
CT: control target
= control target key end

     0   :  { %s799_s12 = smov 0   ;;  %s801_s13 = smov 0   ;;  %s879_s0 = inlined_call_operand.vmem [shape: bf16[2,49,128], index: 0, kind: input, shape index: {}]   ;;  %s880_s1 = inlined_call_operand.vmem [shape: bf16[128,128], index: 1, kind: input, shape index: {}]   ;;  %s881_s2 = inlined_call_operand.vmem [shape: f32[1,128], index: 2, kind: input, shape index: {}]   ;;  %s882_s3 = inlined_call_operand.vmem [shape: bf16[2,49,128], index: 3, kind: output, shape index: {}]  }
   0x1   :  { %s803_s14 = smov 0  }
   0x2 LB: > { %s25_s15 = sadd.s32 1, %s773_s13  ;;  %p615_p0 = scmp.ge.s32.totalorder %s777_s14, 1  ;;  %s777_s14 = sphi %s803_s14, %s13_s14   ;;  %s773_s13 = sphi %s801_s13, %s884_s13   ;;  %s769_s12 = sphi %s799_s12, %s883_s12  }
   0x3   : > { %p27_p1 = scmp.ge.s32.totalorder %s25_s15, 2  ;;  %p168_p2 = scmp.lt.s32.totalorder %s777_s14, 3 }
   0x5   : > { %s886_s15 = smov (%p27_p1, %s25_s15), 0  ;;  %p169_p3 = pnand %p615_p0, %p168_p2 }
   0x6   : > { %v741_v0 = vld [vmem:[%s880_s1] sm:$0xff] (!%p169_p3)   ;;  %p202_p4 = scmp.lt.s32.totalorder (!%p169_p3), %s769_s12, 1  ;;  %v742_v1 = vld [vmem:[%s880_s1 + $0x8] sm:$0xff] (!%p169_p3)   ;;  %v743_v2 = vld [vmem:[%s880_s1 + $0x10] sm:$0xff] (!%p169_p3)   ;;  %vm392_vm0 = vcmask (!%p169_p3), 1040384  }
   0x7   : > { %172 = sbr.rel (%p169_p3) target bundleno = 313 (0x139), region = 32  ;;  %676 = vmatprep.subr.bf16.mxu0 (!%p169_p3), %v741_v0  ;;  %700 = vmatprep.subr.bf16.mxu1 (!%p169_p3), %v741_v0  ;;  %v744_v3 = vld [vmem:[%s880_s1 + $0x18] sm:$0xff] (!%p169_p3)   ;;  %v745_v6 = vld [vmem:[%s880_s1 + $0x20] sm:$0xff] (!%p169_p3)   ;;  %v746_v7 = vld [vmem:[%s880_s1 + $0x28] sm:$0xff] (!%p169_p3)   ;;  %vm499_vm1 = vsmask.f32 (!%p169_p3), 256 }
   0x8   : > { %677 = vmatpush3.bf16.msra.mxu0 (!%p169_p3), %v741_v0  ;;  %708 = vmatpush3.bf16.msra.mxu1 (!%p169_p3), %v741_v0  ;;  %v747_v8 = vld [vmem:[%s880_s1 + $0x30] sm:$0xff] (!%p169_p3)   ;;  %v748_v9 = vld [vmem:[%s880_s1 + $0x38] sm:$0xff] (!%p169_p3)   ;;  %v618_v12 = vld [vmem:[%s881_s2] ss:$0 sm:$0xff] (!%p169_p3) }
   0x9   : > { %678 = vmatprep.subr.bf16.mxu0 (!%p169_p3), %v742_v1  ;;  %701 = vmatprep.subr.bf16.mxu1 (!%p169_p3), %v742_v1  ;;  %vm500_vm9 = vmand (!%p169_p3), %vm392_vm0, %vm499_vm1 }
   0xc   : > { %679 = vmatpush3.bf16.msra.mxu0 (!%p169_p3), %v742_v1  ;;  %709 = vmatpush3.bf16.msra.mxu1 (!%p169_p3), %v742_v1 }
   0xd   : > { %680 = vmatprep.subr.bf16.mxu0 (!%p169_p3), %v743_v2  ;;  %702 = vmatprep.subr.bf16.mxu1 (!%p169_p3), %v743_v2 }
   0xe   : > { %s888_s12 = smov (!%p202_p4, %s769_s12), 1 }
   0xf   : > { %s716_s22 = smul.u32 28, %s888_s12 }
  0x10   : > { %681 = vmatpush3.bf16.msra.mxu0 %v743_v2  ;;  %710 = vmatpush3.bf16.msra.mxu1 %v743_v2 }
  0x11   : > { %s834_s25 = scalar_lea.vmem %s879_s0, %s716_s22  ;;  %682 = vmatprep.subr.bf16.mxu0 %v744_v3  ;;  %703 = vmatprep.subr.bf16.mxu1 %v744_v3  ;;  %s221_s17 = scalar_lea.vmem %s882_s3, %s716_s22 }
  0x12   : > { %v749_v4 = vld [vmem:[%s834_s25] sm:$0xff]   ;;  %v751_v5 = vld [vmem:[%s834_s25 + $0x10] sm:$0xff]   ;;  %v750_v10 = vld [vmem:[%s834_s25 + $0x8] sm:$0xff]  }
  0x13   : > { %692 = vmatprep.mubr.bf16.mxu0 %v749_v4  ;;  %696 = vmatprep.mubr.bf16.mxu1 %v751_v5  ;;  %v752_v11 = vld [vmem:[%s834_s25 + $0x18] ss:$0 sps:$4 sm:$0x11]  }
  0x14   : > { %683 = vmatpush3.bf16.msra.mxu0 %v744_v3  ;;  %711 = vmatpush3.bf16.msra.mxu1 %v744_v3 }
  0x15   : > { %684 = vmatprep.subr.bf16.mxu0 %v745_v6  ;;  %704 = vmatprep.subr.bf16.mxu1 %v745_v6 }
  0x18   : > { %685 = vmatpush3.bf16.msra.mxu0 %v745_v6  ;;  %712 = vmatpush3.bf16.msra.mxu1 %v745_v6 }
  0x19   : > { %686 = vmatprep.subr.bf16.mxu0 %v746_v7  ;;  %705 = vmatprep.subr.bf16.mxu1 %v746_v7 }
  0x1c   : > { %687 = vmatpush3.bf16.msra.mxu0 %v746_v7  ;;  %713 = vmatpush3.bf16.msra.mxu1 %v746_v7 }
  0x1d   : > { %688 = vmatprep.subr.bf16.mxu0 %v747_v8  ;;  %706 = vmatprep.subr.bf16.mxu1 %v747_v8 }
  0x20   : > { %689 = vmatpush3.bf16.msra.mxu0 %v747_v8  ;;  %714 = vmatpush3.bf16.msra.mxu1 %v747_v8 }
  0x21   : > { %690 = vmatprep.subr.bf16.mxu0 %v748_v9  ;;  %707 = vmatprep.subr.bf16.mxu1 %v748_v9 }
  0x24   : > { %691 = vmatpush3.bf16.msra.mxu0 %v748_v9  ;;  %715 = vmatpush3.bf16.msra.mxu1 %v748_v9 }
  0x27   : > { %693 = vmatmul.mubr.bf16.vlgmr.msra.gmra.mrb[0].mxu0 %v750_v10  ;;  %697 = vmatmul.mubr.bf16.vlgmr.msra.gmra.mrb[0].mxu1 %v752_v11 }
  0xfa   : > { %v694_v13 = vpop.f32.mrb[0].mxu0  ;;  %v698_v14 = vpop.f32.mrb[0].mxu1 }
  0xfb   : > { %v357_v15 = vpop.f32.mrb[1].mxu0  ;;  %v373_v16 = vpop.f32.mrb[1].mxu1  ;;  %v366_v22 = vadd.f32 %v694_v13, %v618_v12  ;;  %v382_v32 = vadd.f32 %v698_v14, %v618_v12 }
  0xfc   : > { %v358_v17 = vadd.f32 %v618_v12, %v357_v15  ;;  %v695_v18 = vpop.f32.mrb[2].mxu0  ;;  %v699_v19 = vpop.f32.mrb[2].mxu1  ;;  %v374_v24 = vadd.f32 %v618_v12, %v373_v16 }
  0xfd   : > { %v360_v20 = vpop.f32.mrb[3].mxu0  ;;  %v376_v21 = vpop.f32.mrb[3].mxu1  ;;  %v369_v26 = vadd.f32 %v695_v18, %v618_v12  ;;  %v404_v29 = vmul.f32 %v366_v22, %v366_v22  ;;  %v408_v40 = vmul.f32 %v382_v32, %v382_v32  ;;  %v393_v44 = vsel %vm392_vm0, %v382_v32, 0.0 }
  0xfe   : > { %v361_v23 = vadd.f32 %v618_v12, %v360_v20  ;;  %v402_v25 = vmul.f32 %v358_v17, %v358_v17  ;;  %v406_v33 = vmul.f32 %v374_v24, %v374_v24  ;;  %v377_v37 = vadd.f32 %v618_v12, %v376_v21 }
  0xff   : > { %v405_v34 = vmul.f32 %v369_v26, %v369_v26  ;;  %v414_v47 = vsel %vm392_vm0, %v408_v40, 0.0 }
 0x100   : > { %v387_v27 = vadd.f32 %v361_v23, %v358_v17  ;;  %v403_v28 = vmul.f32 %v361_v23, %v361_v23  ;;  %v407_v43 = vmul.f32 %v377_v37, %v377_v37 }
 0x102   : > { %v388_v30 = vadd.f32 %v387_v27, %v366_v22  ;;  %v409_v31 = vadd.f32 %v403_v28, %v402_v25 }
 0x104   : > { %v410_v35 = vadd.f32 %v409_v31, %v404_v29  ;;  %v389_v36 = vadd.f32 %v388_v30, %v369_v26  ;;  %v501_v29 = vld [vmem:[%s221_s17 + $0x18] sm:$0x1] }
 0x106   : > { %v390_v38 = vadd.f32 %v389_v36, %v374_v24  ;;  %v411_v39 = vadd.f32 %v410_v35, %v405_v34 }
 0x108   : > { %v412_v41 = vadd.f32 %v411_v39, %v406_v33  ;;  %v391_v42 = vadd.f32 %v390_v38, %v377_v37 }
 0x10a   : > { %v394_v45 = vadd.f32 %v393_v44, %v391_v42  ;;  %v413_v46 = vadd.f32 %v412_v41, %v407_v43 }
 0x10c   : > { %v395_v48 = vrot.slane %v394_v45, 4  ;;  %v415_v49 = vadd.f32 %v414_v47, %v413_v46 }
 0x10e   : > { %v396_v50 = vadd.f32 %v395_v48, %v394_v45  ;;  %v416_v51 = vrot.slane %v415_v49, 4 }
 0x110   : > { %v397_v52 = vrot.slane %v396_v50, 2  ;;  %v417_v53 = vadd.f32 %v416_v51, %v415_v49 }
 0x112   : > { %v398_v54 = vadd.f32 %v397_v52, %v396_v50  ;;  %v418_v55 = vrot.slane %v417_v53, 2 }
 0x114   : > { %v399_v56 = vrot.slane %v398_v54, 1  ;;  %v419_v57 = vadd.f32 %v418_v55, %v417_v53 }
 0x116   : > { %v400_v58 = vadd.f32 %v399_v56, %v398_v54  ;;  %v420_v59 = vrot.slane %v419_v57, 1 }
 0x118   : > { %v401_v60 = vmul.f32 0.020408163, %v400_v58  ;;  %v421_v61 = vadd.f32 %v420_v59, %v419_v57 }
 0x11a   : > { %v422_v62 = vmul.f32 0.020408163, %v421_v61  ;;  %v423_v63 = vmul.f32 %v401_v60, %v401_v60  ;;  %v426_v0 = vsub.f32 %v358_v17, %v401_v60  ;;  %v427_v1 = vsub.f32 %v361_v23, %v401_v60 }
 0x11b   : > { %v428_v2 = vsub.f32 %v366_v22, %v401_v60  ;;  %v429_v3 = vsub.f32 %v369_v26, %v401_v60  ;;  %v430_v4 = vsub.f32 %v374_v24, %v401_v60  ;;  %v431_v5 = vsub.f32 %v377_v37, %v401_v60 }
 0x11c   : > { %v424_v6 = vsub.f32 %v422_v62, %v423_v63  ;;  %v432_v7 = vsub.f32 %v382_v32, %v401_v60 }
 0x11e   : > { %v425_v8 = vmax.f32 %v424_v6, 0.0 }
 0x120   : > { %v433_v9 = vadd.f32 1e-05, %v425_v8 }
 0x122   : > { %753 = vrsqrt.f32 %v433_v9 }
 0x12c   : > { %v754_v10 = vpop.eup %753 }
 0x12d   : > { %v435_v11 = vmul.f32 %v754_v10, %v426_v0  ;;  %v436_v12 = vmul.f32 %v754_v10, %v427_v1  ;;  %v437_v13 = vmul.f32 %v754_v10, %v428_v2  ;;  %v438_v14 = vmul.f32 %v754_v10, %v429_v3 }
 0x12e   : > { %v439_v15 = vmul.f32 %v754_v10, %v430_v4  ;;  %v440_v16 = vmul.f32 %v754_v10, %v431_v5  ;;  %v441_v17 = vmul.f32 %v754_v10, %v432_v7 }
 0x12f   : > { %vm442_vm2 = vcmp.ge.f32.partialorder %v435_v11, 0.0  ;;  %vm443_vm3 = vcmp.ge.f32.partialorder %v436_v12, 0.0  ;;  %vm444_vm4 = vcmp.ge.f32.partialorder %v437_v13, 0.0  ;;  %vm445_vm5 = vcmp.ge.f32.partialorder %v438_v14, 0.0 }
 0x130   : > { %vm446_vm6 = vcmp.ge.f32.partialorder %v439_v15, 0.0  ;;  %vm447_vm7 = vcmp.ge.f32.partialorder %v440_v16, 0.0  ;;  %vm448_vm8 = vcmp.ge.f32.partialorder %v441_v17, 0.0  ;;  %v449_v18 = vmul.f32 0.2, %v435_v11 }
 0x131   : > { %v450_v19 = vmul.f32 0.2, %v436_v12  ;;  %v451_v20 = vmul.f32 0.2, %v437_v13  ;;  %v452_v21 = vmul.f32 0.2, %v438_v14 }
 0x132   : > { %v453_v22 = vmul.f32 0.2, %v439_v15  ;;  %v454_v23 = vmul.f32 0.2, %v440_v16  ;;  %v455_v24 = vmul.f32 0.2, %v441_v17  ;;  %v456_v25 = vsel %vm442_vm2, %v435_v11, %v449_v18 }
 0x133   : > { %v457_v26 = vsel %vm443_vm3, %v436_v12, %v450_v19  ;;  %v458_v27 = vsel %vm444_vm4, %v437_v13, %v451_v20  ;;  %v459_v28 = vsel %vm445_vm5, %v438_v14, %v452_v21 }
 0x134   : > { %v460_v30 = vsel %vm446_vm6, %v439_v15, %v453_v22  ;;  %v461_v31 = vsel %vm447_vm7, %v440_v16, %v454_v23  ;;  %v462_v32 = vsel %vm448_vm8, %v441_v17, %v455_v24  ;;  %v650_v33 = vpack.c.bf16 %v457_v26, %v456_v25 }
 0x135   : > { %v646_v34 = vpack.c.bf16 %v462_v32, %v462_v32  ;;  %v655_v35 = vpack.c.bf16 %v459_v28, %v458_v27  ;;  %v660_v36 = vpack.c.bf16 %v461_v31, %v460_v30 }
 0x136   : > { %651 = vst [vmem:[%s221_s17] sm:$0xff] %v650_v33  }
 0x137   : > { %662 = vst [vmem:[%s221_s17 + $0x8] sm:$0xff] %v655_v35   ;;  %663 = vst [vmem:[%s221_s17 + $0x10] sm:$0xff] %v660_v36   ;;  %v502_v37 = vsel %vm500_vm9, %v646_v34, %v501_v29 }
 0x138   : > { %503 = vst [vmem:[%s221_s17 + $0x18] sm:$0x1] %v502_v37 }
 0x139 PF: > { %s13_s14 = sadd.s32 1, %s777_s14   ;;  %s883_s12 = smov %s773_s13 }
 0x13a   : > { %p10_p5 = scmp.ge.s32.totalorder %s13_s14, 4   ;;  %s884_s13 = smov %s886_s15 }
 0x13c   :  { %12 = sbr.rel (!%p10_p5) target bundleno = 2 (0x2), region = 68 }

// kernel: discriminator_forward.7
= control target key start
LH: loop header
LB: loop body
LE: loop exit
PB: predicated region body
PF: predicated region fallthrough
CT: control target
= control target key end

     0   :  { %s838_s12 = smov 0   ;;  %s840_s13 = smov 0   ;;  %s926_s0 = inlined_call_operand.vmem [shape: bf16[2,36,256], index: 0, kind: input, shape index: {}]   ;;  %s927_s1 = inlined_call_operand.vmem [shape: bf16[256,128], index: 1, kind: input, shape index: {}]   ;;  %s928_s2 = inlined_call_operand.vmem [shape: f32[1,128], index: 2, kind: input, shape index: {}]   ;;  %s929_s3 = inlined_call_operand.vmem [shape: bf16[2,36,128], index: 3, kind: output, shape index: {}]  }
   0x1   :  { %s842_s14 = smov 0  }
   0x2 LB: > { %s25_s15 = sadd.s32 1, %s812_s13  ;;  %p643_p0 = scmp.ge.s32.totalorder %s816_s14, 1  ;;  %s816_s14 = sphi %s842_s14, %s13_s14   ;;  %s812_s13 = sphi %s840_s13, %s931_s13   ;;  %s808_s12 = sphi %s838_s12, %s930_s12  }
   0x3   : > { %p27_p1 = scmp.ge.s32.totalorder %s25_s15, 2  ;;  %p168_p2 = scmp.lt.s32.totalorder %s816_s14, 3 }
   0x5   : > { %s933_s15 = smov (%p27_p1, %s25_s15), 0  ;;  %p169_p3 = pnand %p643_p0, %p168_p2 }
   0x6   : > { %v768_v0 = vld [vmem:[%s927_s1 + $0x40] sm:$0xff] (!%p169_p3)   ;;  %v770_v2 = vld [vmem:[%s927_s1 + $0x48] sm:$0xff] (!%p169_p3)   ;;  %p202_p4 = scmp.lt.s32.totalorder (!%p169_p3), %s808_s12, 1  ;;  %v772_v4 = vld [vmem:[%s927_s1 + $0x50] sm:$0xff] (!%p169_p3)   ;;  %vm449_vm0 = vcmask (!%p169_p3), 1043456  }
   0x7   : > { %172 = sbr.rel (%p169_p3) target bundleno = 310 (0x136), region = 32  ;;  %v769_v1 = vld [vmem:[%s927_s1] sm:$0xff] (!%p169_p3)   ;;  %692 = vmatprep.subr.bf16.mxu0 (!%p169_p3), %v768_v0  ;;  %726 = vmatprep.subr.bf16.mxu1 (!%p169_p3), %v768_v0  ;;  %v771_v3 = vld [vmem:[%s927_s1 + $0x8] sm:$0xff] (!%p169_p3)   ;;  %v773_v5 = vld [vmem:[%s927_s1 + $0x10] sm:$0xff] (!%p169_p3)  }
   0x8   : > { %693 = vmatpush3.bf16.msra.mxu0 (!%p169_p3), %v769_v1  ;;  %734 = vmatpush3.bf16.msra.mxu1 (!%p169_p3), %v769_v1  ;;  %v774_v6 = vld [vmem:[%s927_s1 + $0x58] sm:$0xff] (!%p169_p3)   ;;  %v776_v8 = vld [vmem:[%s927_s1 + $0x60] sm:$0xff] (!%p169_p3)   ;;  %v778_v10 = vld [vmem:[%s927_s1 + $0x68] sm:$0xff] (!%p169_p3)  }
   0x9   : > { %694 = vmatprep.subr.bf16.mxu0 (!%p169_p3), %v770_v2  ;;  %727 = vmatprep.subr.bf16.mxu1 (!%p169_p3), %v770_v2  ;;  %v775_v7 = vld [vmem:[%s927_s1 + $0x18] sm:$0xff] (!%p169_p3)   ;;  %v777_v9 = vld [vmem:[%s927_s1 + $0x20] sm:$0xff] (!%p169_p3)   ;;  %v779_v13 = vld [vmem:[%s927_s1 + $0x28] sm:$0xff] (!%p169_p3)  }
   0xa   : > { %v780_v14 = vld [vmem:[%s927_s1 + $0x70] sm:$0xff] (!%p169_p3)   ;;  %v782_v16 = vld [vmem:[%s927_s1 + $0x78] sm:$0xff] (!%p169_p3)   ;;  %v646_v25 = vld [vmem:[%s928_s2] ss:$0 sm:$0xff] (!%p169_p3) }
   0xb   : > { %v781_v15 = vld [vmem:[%s927_s1 + $0x30] sm:$0xff] (!%p169_p3)   ;;  %v783_v17 = vld [vmem:[%s927_s1 + $0x38] sm:$0xff] (!%p169_p3)  }
   0xc   : > { %695 = vmatpush3.bf16.msra.mxu0 (!%p169_p3), %v771_v3  ;;  %735 = vmatpush3.bf16.msra.mxu1 (!%p169_p3), %v771_v3 }
   0xd   : > { %696 = vmatprep.subr.bf16.mxu0 (!%p169_p3), %v772_v4  ;;  %728 = vmatprep.subr.bf16.mxu1 (!%p169_p3), %v772_v4 }
   0xe   : > { %s935_s12 = smov (!%p202_p4, %s808_s12), 1 }
   0xf   : > { %s742_s30 = smul.u32 40, %s935_s12 }
  0x10   : > { %697 = vmatpush3.bf16.msra.mxu0 %v773_v5  ;;  %736 = vmatpush3.bf16.msra.mxu1 %v773_v5  ;;  %s743_s4 = smul.u32 20, %s935_s12 }
  0x11   : > { %698 = vmatprep.subr.bf16.mxu0 %v774_v6  ;;  %729 = vmatprep.subr.bf16.mxu1 %v774_v6  ;;  %s206_s10 = scalar_lea.vmem %s926_s0, %s742_s30 }
  0x12   : > { %v786_v11 = vld [vmem:[%s206_s10 + $0x4] ss:$8 sps:$4 sm:$0xff]   ;;  %v789_v12 = vld [vmem:[%s206_s10 + $0x14] ss:$8 sps:$4 sm:$0xff]   ;;  %v784_v19 = vld [vmem:[%s206_s10] ss:$8 sps:$4 sm:$0xff]   ;;  %s221_s7 = scalar_lea.vmem %s929_s3, %s743_s4 }
  0x13   : > { %422 = vmatprep.mubr.bf16.mxu0 %v786_v11  ;;  %430 = vmatprep.mubr.bf16.mxu1 %v789_v12  ;;  %v227_v18 = vld [vmem:[%s206_s10 + $0x20] sm:$0x33]  ;;  %v787_v20 = vld [vmem:[%s206_s10 + $0x10] ss:$8 sps:$4 sm:$0xff]  }
  0x14   : > { %699 = vmatpush3.bf16.msra.mxu0 %v775_v7  ;;  %737 = vmatpush3.bf16.msra.mxu1 %v775_v7  ;;  %v652_v21 = vcombine.high %v227_v18, %v227_v18  ;;  %v651_v22 = vcombine.low %v227_v18, %v227_v18 }
  0x15   : > { %700 = vmatprep.subr.bf16.mxu0 %v776_v8  ;;  %730 = vmatprep.subr.bf16.mxu1 %v776_v8 }
  0x18   : > { %701 = vmatpush3.bf16.msra.mxu0 %v777_v9  ;;  %738 = vmatpush3.bf16.msra.mxu1 %v777_v9 }
  0x19   : > { %702 = vmatprep.subr.bf16.mxu0 %v778_v10  ;;  %731 = vmatprep.subr.bf16.mxu1 %v778_v10 }
  0x1c   : > { %703 = vmatpush3.bf16.msra.mxu0 %v779_v13  ;;  %739 = vmatpush3.bf16.msra.mxu1 %v779_v13 }
  0x1d   : > { %704 = vmatprep.subr.bf16.mxu0 %v780_v14  ;;  %732 = vmatprep.subr.bf16.mxu1 %v780_v14 }
  0x20   : > { %705 = vmatpush3.bf16.msra.mxu0 %v781_v15  ;;  %740 = vmatpush3.bf16.msra.mxu1 %v781_v15 }
  0x21   : > { %706 = vmatprep.subr.bf16.mxu0 %v782_v16  ;;  %733 = vmatprep.subr.bf16.mxu1 %v782_v16 }
  0x24   : > { %707 = vmatpush3.bf16.msra.mxu0 %v783_v17  ;;  %741 = vmatpush3.bf16.msra.mxu1 %v783_v17 }
  0x27   : > { %423 = vmatmul.mubr.bf16.vlgmr.msra.gmra.mrb[0].mxu0 %v784_v19  ;;  %431 = vmatmul.mubr.bf16.vlgmr.msra.gmra.mrb[0].mxu1 %v787_v20 }
  0x28   : > { %438 = vmatprep.mubr.bf16.mxu1 %v652_v21 }
  0x2f   : > { %439 = vmatmul.mubr.bf16.gmra.mrb[4].mxu1 %v651_v22 }
  0xfa   : > { %v708_v23 = vpop.f32.mrb[0].mxu0  ;;  %v714_v24 = vpop.f32.mrb[0].mxu1 }
  0xfb   : > { %v709_v26 = vpop.f32.mrb[1].mxu0  ;;  %v715_v27 = vpop.f32.mrb[1].mxu1 }
  0xfc   : > { %v710_v28 = vadd.f32 %v709_v26, %v708_v23  ;;  %v716_v29 = vadd.f32 %v715_v27, %v714_v24  ;;  %v711_v30 = vpop.f32.mrb[2].mxu0  ;;  %v717_v31 = vpop.f32.mrb[2].mxu1 }
  0xfd   : > { %v712_v32 = vpop.f32.mrb[3].mxu0  ;;  %v718_v33 = vpop.f32.mrb[3].mxu1 }
  0xfe   : > { %v425_v34 = vadd.f32 %v710_v28, %v646_v25  ;;  %v713_v35 = vadd.f32 %v712_v32, %v711_v30  ;;  %v719_v36 = vadd.f32 %v718_v33, %v717_v31  ;;  %v433_v37 = vadd.f32 %v716_v29, %v646_v25 }
 0x100   : > { %v428_v38 = vadd.f32 %v713_v35, %v646_v25  ;;  %v459_v39 = vmul.f32 %v425_v34, %v425_v34  ;;  %v436_v42 = vadd.f32 %v719_v36, %v646_v25  ;;  %v461_v45 = vmul.f32 %v433_v37, %v433_v37 }
 0x102   : > { %v446_v40 = vadd.f32 %v428_v38, %v425_v34  ;;  %v460_v41 = vmul.f32 %v428_v38, %v428_v38  ;;  %v720_v43 = vpop.f32.mrb[4].mxu1  ;;  %v462_v52 = vmul.f32 %v436_v42, %v436_v42 }
 0x103   : > { %v721_v44 = vpop.f32.mrb[5].mxu1 }
 0x104   : > { %v464_v46 = vadd.f32 %v460_v41, %v459_v39  ;;  %v447_v47 = vadd.f32 %v446_v40, %v433_v37  ;;  %v722_v48 = vadd.f32 %v721_v44, %v720_v43  ;;  %v723_v49 = vpop.f32.mrb[6].mxu1 }
 0x105   : > { %v724_v50 = vpop.f32.mrb[7].mxu1 }
 0x106   : > { %v448_v51 = vadd.f32 %v447_v47, %v436_v42  ;;  %v465_v53 = vadd.f32 %v464_v46, %v461_v45  ;;  %v441_v54 = vadd.f32 %v722_v48, %v646_v25 }
 0x108   : > { %v466_v55 = vadd.f32 %v465_v53, %v462_v52  ;;  %v450_v56 = vsel %vm449_vm0, %v441_v54, 0.0  ;;  %v463_v57 = vmul.f32 %v441_v54, %v441_v54 }
 0x109   : > { %v451_v58 = vadd.f32 %v450_v56, %v448_v51 }
 0x10a   : > { %v467_v59 = vsel %vm449_vm0, %v463_v57, 0.0 }
 0x10b   : > { %v452_v60 = vrot.slane %v451_v58, 4  ;;  %v468_v61 = vadd.f32 %v467_v59, %v466_v55 }
 0x10d   : > { %v453_v62 = vadd.f32 %v452_v60, %v451_v58  ;;  %v469_v63 = vrot.slane %v468_v61, 4 }
 0x10f   : > { %v454_v0 = vrot.slane %v453_v62, 2  ;;  %v470_v1 = vadd.f32 %v469_v63, %v468_v61 }
 0x111   : > { %v455_v2 = vadd.f32 %v454_v0, %v453_v62  ;;  %v471_v3 = vrot.slane %v470_v1, 2 }
 0x113   : > { %v456_v4 = vrot.slane %v455_v2, 1  ;;  %v472_v5 = vadd.f32 %v471_v3, %v470_v1 }
 0x115   : > { %v457_v6 = vadd.f32 %v456_v4, %v455_v2  ;;  %v473_v7 = vrot.slane %v472_v5, 1 }
 0x117   : > { %v458_v8 = vmul.f32 0.027777778, %v457_v6  ;;  %v474_v9 = vadd.f32 %v473_v7, %v472_v5 }
 0x119   : > { %v475_v10 = vmul.f32 0.027777778, %v474_v9  ;;  %v476_v11 = vmul.f32 %v458_v8, %v458_v8  ;;  %v479_v12 = vsub.f32 %v425_v34, %v458_v8  ;;  %v480_v13 = vsub.f32 %v428_v38, %v458_v8 }
 0x11a   : > { %v481_v14 = vsub.f32 %v433_v37, %v458_v8  ;;  %v482_v15 = vsub.f32 %v436_v42, %v458_v8  ;;  %v483_v16 = vsub.f32 %v441_v54, %v458_v8 }
 0x11b   : > { %v477_v17 = vsub.f32 %v475_v10, %v476_v11 }
 0x11d   : > { %v478_v18 = vmax.f32 %v477_v17, 0.0 }
 0x11f   : > { %v484_v19 = vadd.f32 1e-05, %v478_v18 }
 0x121   : > { %792 = vrsqrt.f32 %v484_v19 }
 0x12b   : > { %v793_v20 = vpop.eup %792 }
 0x12c   : > { %v486_v21 = vmul.f32 %v793_v20, %v479_v12  ;;  %v487_v22 = vmul.f32 %v793_v20, %v480_v13  ;;  %v488_v23 = vmul.f32 %v793_v20, %v481_v14  ;;  %v489_v24 = vmul.f32 %v793_v20, %v482_v15 }
 0x12d   : > { %v490_v25 = vmul.f32 %v793_v20, %v483_v16 }
 0x12e   : > { %vm491_vm1 = vcmp.ge.f32.partialorder %v486_v21, 0.0  ;;  %vm492_vm2 = vcmp.ge.f32.partialorder %v487_v22, 0.0  ;;  %vm493_vm3 = vcmp.ge.f32.partialorder %v488_v23, 0.0  ;;  %vm494_vm4 = vcmp.ge.f32.partialorder %v489_v24, 0.0 }
 0x12f   : > { %vm495_vm5 = vcmp.ge.f32.partialorder %v490_v25, 0.0  ;;  %v496_v26 = vmul.f32 0.2, %v486_v21  ;;  %v497_v27 = vmul.f32 0.2, %v487_v22 }
 0x130   : > { %v498_v28 = vmul.f32 0.2, %v488_v23  ;;  %v499_v29 = vmul.f32 0.2, %v489_v24  ;;  %v500_v30 = vmul.f32 0.2, %v490_v25 }
 0x131   : > { %v501_v31 = vsel %vm491_vm1, %v486_v21, %v496_v26  ;;  %v502_v32 = vsel %vm492_vm2, %v487_v22, %v497_v27 }
 0x132   : > { %v503_v33 = vsel %vm493_vm3, %v488_v23, %v498_v28  ;;  %v504_v34 = vsel %vm494_vm4, %v489_v24, %v499_v29  ;;  %v505_v35 = vsel %vm495_vm5, %v490_v25, %v500_v30  ;;  %v684_v36 = vpack.c.bf16 %v502_v32, %v501_v31 }
 0x133   : > { %v680_v37 = vpack.c.bf16 %v505_v35, %v505_v35  ;;  %v689_v38 = vpack.c.bf16 %v504_v34, %v503_v33 }
 0x134   : > { %685 = vst [vmem:[%s221_s7] sm:$0xff] %v684_v36  }
 0x135   : > { %691 = vst [vmem:[%s221_s7 + $0x8] sm:$0xff] %v689_v38   ;;  %531 = vst [vmem:[%s221_s7 + $0x10] sm:$0x3] %v680_v37 }
 0x136 PF: > { %s13_s14 = sadd.s32 1, %s816_s14   ;;  %s930_s12 = smov %s812_s13 }
 0x137   : > { %p10_p5 = scmp.ge.s32.totalorder %s13_s14, 4   ;;  %s931_s13 = smov %s933_s15 }
 0x139   :  { %12 = sbr.rel (!%p10_p5) target bundleno = 2 (0x2), region = 68 }

// kernel: discriminator_forward.8
= control target key start
LH: loop header
LB: loop body
LE: loop exit
PB: predicated region body
PF: predicated region fallthrough
CT: control target
= control target key end

     0   :  { %s2941_s15 = smov 0   ;;  %s2943_s16 = smov 0   ;;  %s3488_s0 = inlined_call_operand.vmem [shape: bf16[2,40,512], index: 0, kind: input, shape index: {}]   ;;  %s3489_s1 = inlined_call_operand.vmem [shape: bf16[4,512,128], index: 1, kind: input, shape index: {}]   ;;  %s3490_s2 = inlined_call_operand.vmem [shape: f32[1,128], index: 2, kind: input, shape index: {}]   ;;  %s3491_s3 = inlined_call_operand.vmem [shape: f32[24,1], index: 3, kind: input, shape index: {}]   ;;  %s3492_s4 = inlined_call_operand.vmem [shape: bf16[2,24,128], index: 4, kind: output, shape index: {}]  }
   0x1   :  { %s2945_s17 = smov 0  }
   0x2 LB: > { %s26_s18 = sadd.s32 1, %s2909_s16  ;;  %p2119_p0 = scmp.ge.s32.totalorder %s2913_s17, 1  ;;  %s2913_s17 = sphi %s2945_s17, %s14_s17   ;;  %s2909_s16 = sphi %s2943_s16, %s3494_s16   ;;  %s2905_s15 = sphi %s2941_s15, %s3493_s15  }
   0x3   : > { %p28_p1 = scmp.ge.s32.totalorder %s26_s18, 2  ;;  %p193_p2 = scmp.lt.s32.totalorder %s2913_s17, 3 }
   0x5   : > { %s3496_s18 = smov (%p28_p1, %s26_s18), 0  ;;  %p194_p3 = pnand %p2119_p0, %p193_p2 }
   0x6   : > { %v2737_v0 = vld [vmem:[%s3489_s1 + $0x140] sm:$0xff] (!%p194_p3)   ;;  %v2741_v4 = vld [vmem:[%s3489_s1 + $0x148] sm:$0xff] (!%p194_p3)   ;;  %v2745_v8 = vld [vmem:[%s3489_s1 + $0x150] sm:$0xff] (!%p194_p3)   ;;  %p229_p4 = scmp.lt.s32.totalorder (!%p194_p3), %s2905_s15, 1  ;;  %v2915_v25 = vmov (!%p194_p3), 0  }
   0x7   : > { %197 = sbr.rel (%p194_p3) target bundleno = 413 (0x19d), region = 36  ;;  %v2738_v1 = vld [vmem:[%s3489_s1 + $0x1c0] sm:$0xff] (!%p194_p3)   ;;  %2484 = vmatprep.subr.bf16.mxu0 (!%p194_p3), %v2737_v0  ;;  %v2742_v5 = vld [vmem:[%s3489_s1 + $0x1c8] sm:$0xff] (!%p194_p3)   ;;  %v2746_v9 = vld [vmem:[%s3489_s1 + $0x1d0] sm:$0xff] (!%p194_p3)   ;;  %2735 = vset.pattern.permute.xlu0 (!%p194_p3), %v2915_v25  ;;  %vm419_vm0 = vsmask.f32 (!%p194_p3), 7424 }
   0x8   : > { %v2739_v2 = vld [vmem:[%s3489_s1 + $0x100] sm:$0xff] (!%p194_p3)   ;;  %2512 = vmatprep.subr.bf16.mxu1 (!%p194_p3), %v2738_v1  ;;  %v2743_v6 = vld [vmem:[%s3489_s1 + $0x108] sm:$0xff] (!%p194_p3)   ;;  %v2747_v10 = vld [vmem:[%s3489_s1 + $0x110] sm:$0xff] (!%p194_p3)   ;;  %2736 = vset.pattern.permute.xlu1 (!%p194_p3), %v2915_v25 }
   0x9   : > { %v2740_v3 = vld [vmem:[%s3489_s1 + $0x180] sm:$0xff] (!%p194_p3)   ;;  %2485 = vmatpush3.bf16.msra.mxu0 (!%p194_p3), %v2739_v2  ;;  %v2744_v7 = vld [vmem:[%s3489_s1 + $0x188] sm:$0xff] (!%p194_p3)   ;;  %v2748_v11 = vld [vmem:[%s3489_s1 + $0x190] sm:$0xff] (!%p194_p3)  }
   0xa   : > { %2513 = vmatpush3.bf16.msra.mxu1 (!%p194_p3), %v2740_v3  ;;  %2486 = vmatprep.subr.bf16.mxu0 (!%p194_p3), %v2741_v4  ;;  %v2749_v12 = vld [vmem:[%s3489_s1 + $0x158] sm:$0xff] (!%p194_p3)   ;;  %v2753_v16 = vld [vmem:[%s3489_s1 + $0x160] sm:$0xff] (!%p194_p3)   ;;  %v2757_v20 = vld [vmem:[%s3489_s1 + $0x168] sm:$0xff] (!%p194_p3)  }
   0xb   : > { %2514 = vmatprep.subr.bf16.mxu1 (!%p194_p3), %v2742_v5  ;;  %v2750_v13 = vld [vmem:[%s3489_s1 + $0x1d8] sm:$0xff] (!%p194_p3)   ;;  %v2754_v17 = vld [vmem:[%s3489_s1 + $0x1e0] sm:$0xff] (!%p194_p3)   ;;  %v2758_v21 = vld [vmem:[%s3489_s1 + $0x1e8] sm:$0xff] (!%p194_p3)  }
   0xc   : > { %v2751_v14 = vld [vmem:[%s3489_s1 + $0x118] sm:$0xff] (!%p194_p3)   ;;  %v2755_v18 = vld [vmem:[%s3489_s1 + $0x120] sm:$0xff] (!%p194_p3)   ;;  %v2759_v22 = vld [vmem:[%s3489_s1 + $0x128] sm:$0xff] (!%p194_p3)  }
   0xd   : > { %2487 = vmatpush3.bf16.msra.mxu0 (!%p194_p3), %v2743_v6  ;;  %v2752_v15 = vld [vmem:[%s3489_s1 + $0x198] sm:$0xff] (!%p194_p3)   ;;  %v2756_v19 = vld [vmem:[%s3489_s1 + $0x1a0] sm:$0xff] (!%p194_p3)   ;;  %v2760_v23 = vld [vmem:[%s3489_s1 + $0x1a8] sm:$0xff] (!%p194_p3)  }
   0xe   : > { %2515 = vmatpush3.bf16.msra.mxu1 %v2744_v7  ;;  %2488 = vmatprep.subr.bf16.mxu0 %v2745_v8  ;;  %s3498_s15 = smov (!%p229_p4, %s2905_s15), 1  ;;  %v2761_v24 = vld [vmem:[%s3489_s1 + $0x170] sm:$0xff]   ;;  %v2765_v29 = vld [vmem:[%s3489_s1 + $0x178] sm:$0xff]   ;;  %v2777_v51 = vld [vmem:[%s3489_s1 + $0x40] sm:$0xff]  }
   0xf   : > { %2516 = vmatprep.subr.bf16.mxu1 %v2746_v9  ;;  %v2762_v26 = vld [vmem:[%s3489_s1 + $0x1f0] sm:$0xff]   ;;  %s2708_s27 = smul.u32 80, %s3498_s15  ;;  %v2766_v30 = vld [vmem:[%s3489_s1 + $0x1f8] sm:$0xff]   ;;  %v2778_v60 = vld [vmem:[%s3489_s1 + $0xc0] sm:$0xff]  }
  0x10   : > { %v2763_v27 = vld [vmem:[%s3489_s1 + $0x130] sm:$0xff]   ;;  %v2767_v31 = vld [vmem:[%s3489_s1 + $0x138] sm:$0xff]   ;;  %v2779_v8 = vld [vmem:[%s3489_s1] sm:$0xff]   ;;  %s2709_s5 = smul.u32 12, %s3498_s15 }
  0x11   : > { %2489 = vmatpush3.bf16.msra.mxu0 %v2747_v10  ;;  %v2764_v28 = vld [vmem:[%s3489_s1 + $0x1b0] sm:$0xff]   ;;  %s3059_s12 = scalar_lea.vmem %s3488_s0, %s2708_s27  ;;  %v2768_v32 = vld [vmem:[%s3489_s1 + $0x1b8] sm:$0xff]  }
  0x12   : > { %2517 = vmatpush3.bf16.msra.mxu1 %v2748_v11  ;;  %2490 = vmatprep.subr.bf16.mxu0 %v2749_v12  ;;  %v250_v33 = vld [vmem:[%s3059_s12] sm:$0xff]  ;;  %v3069_v34 = vld [vmem:[%s3059_s12 + $0x10] sm:$0xff]  ;;  %v251_v38 = vld [vmem:[%s3059_s12 + $0x8] sm:$0xff]  ;;  %s248_s8 = scalar_lea.vmem %s3492_s4, %s2709_s5 }
  0x13   : > { %2518 = vmatprep.subr.bf16.mxu1 %v2750_v13  ;;  %v3072_v35 = vld [vmem:[%s3059_s12 + $0x20] sm:$0xff]  ;;  %v320_v36 = vld [vmem:[%s3059_s12 + $0x30] sm:$0x11]  ;;  %v3076_v37 = vcombine.high %v250_v33, %v3069_v34  ;;  %v3080_v39 = vld [vmem:[%s3059_s12 + $0x18] sm:$0xff]  ;;  %v3083_v40 = vcombine.low %v250_v33, %v3069_v34 }
  0x14   : > { %v2191_v41 = vcombine.high %v3072_v35, %v320_v36  ;;  %v3087_v42 = vld [vmem:[%s3059_s12 + $0x28] sm:$0xff]  ;;  %v321_v43 = vld [vmem:[%s3059_s12 + $0x38] sm:$0x11]  ;;  %v3091_v44 = vcombine.high %v251_v38, %v3080_v39  ;;  %v2190_v45 = vcombine.low %v3072_v35, %v320_v36  ;;  %v3095_v46 = vcombine.low %v251_v38, %v3080_v39  ;;  %v2788_v36 = vld [vmem:[%s3489_s1 + $0x90] sm:$0xff]  }
  0x15   : > { %2491 = vmatpush3.bf16.msra.mxu0 %v2751_v14  ;;  %v433_v47 = vshrl.u32 %v3076_v37, 16  ;;  %v435_v48 = vshll.u32 %v3076_v37, 16  ;;  %v2193_v49 = vcombine.high %v3087_v42, %v321_v43  ;;  %v421_v50 = vshrl.u32 %v3083_v40, 16  ;;  %v2781_v11 = vld [vmem:[%s3489_s1 + $0x48] sm:$0xff]   ;;  %v2789_v33 = vld [vmem:[%s3489_s1 + $0x58] sm:$0xff]  }
  0x16   : > { %2519 = vmatpush3.bf16.msra.mxu1 %v2752_v15  ;;  %2492 = vmatprep.subr.bf16.mxu0 %v2753_v16  ;;  %v440_v52 = vshll.u32 %v2191_v41, 16  ;;  %v457_v53 = vshrl.u32 %v3091_v44, 16  ;;  %v459_v54 = vshll.u32 %v3091_v44, 16  ;;  %v423_v55 = vshll.u32 %v3083_v40, 16  ;;  %v2780_v15 = vld [vmem:[%s3489_s1 + $0x80] sm:$0xff]  }
  0x17   : > { %2520 = vmatprep.subr.bf16.mxu1 %v2754_v17  ;;  %v437_v56 = vrot.slane %v435_v48, 1  ;;  %v464_v57 = vshll.u32 %v2193_v49, 16  ;;  %v428_v58 = vshll.u32 %v2190_v45, 16  ;;  %v2192_v59 = vcombine.low %v3087_v42, %v321_v43  ;;  %v2782_v17 = vld [vmem:[%s3489_s1 + $0xc8] sm:$0xff]   ;;  %v2791_v43 = vld [vmem:[%s3489_s1 + $0x18] sm:$0xff]   ;;  %v2794_v48 = vld [vmem:[%s3489_s1 + $0xe0] sm:$0xff]  }
  0x18   : > { %v442_v61 = vrot.slane %v440_v52, 1  ;;  %v461_v62 = vrot.slane %v459_v54, 1  ;;  %v425_v63 = vrot.slane %v423_v55, 1  ;;  %v445_v0 = vshrl.u32 %v3095_v46, 16  ;;  %v2801_v52 = vld [vmem:[%s3489_s1 + $0x70] sm:$0xff]  }
  0x19   : > { %2493 = vmatpush3.bf16.msra.mxu0 %v2755_v18  ;;  %v438_v1 = vor.u32 %v437_v56, %v433_v47  ;;  %v466_v2 = vrot.slane %v464_v57, 1  ;;  %v430_v3 = vrot.slane %v428_v58, 1  ;;  %v447_v4 = vshll.u32 %v3095_v46, 16  ;;  %v2792_v47 = vld [vmem:[%s3489_s1 + $0x98] sm:$0xff]   ;;  %v2802_v54 = vld [vmem:[%s3489_s1 + $0xf0] sm:$0xff]  }
  0x1a   : > { %2521 = vmatpush3.bf16.msra.mxu1 %v2756_v19  ;;  %2494 = vmatprep.subr.bf16.mxu0 %v2757_v20  ;;  %v462_v5 = vor.u32 %v461_v62, %v457_v53  ;;  %v426_v6 = vor.u32 %v425_v63, %v421_v50  ;;  %v452_v7 = vshll.u32 %v2192_v59, 16  ;;  %v471_v18 = vshrl.u32 %v2191_v41, 16  ;;  %v2790_v41 = vld [vmem:[%s3489_s1 + $0xd8] sm:$0xff]   ;;  %v2796_v50 = vld [vmem:[%s3489_s1 + $0xa0] sm:$0xff]   ;;  %v2800_v53 = vld [vmem:[%s3489_s1 + $0xa8] sm:$0xff]  }
  0x1b   : > { %2522 = vmatprep.subr.bf16.mxu1 %v2758_v21  ;;  %v443_v9 = vsel %vm419_vm0, %v438_v1, %v442_v61  ;;  %v449_v10 = vrot.slane %v447_v4, 1  ;;  %v3130_v19 = vcombine.low %v3069_v34, %v3072_v35  ;;  %v3134_v20 = vcombine.low %v3080_v39, %v3087_v42  ;;  %v2783_v21 = vld [vmem:[%s3489_s1 + $0x8] sm:$0xff]   ;;  %v2803_v55 = vld [vmem:[%s3489_s1 + $0x30] sm:$0xff]   ;;  %v2805_v56 = vld [vmem:[%s3489_s1 + $0x78] sm:$0xff]  }
  0x1c   : > { %712 = vmatprep.mubr.bf16.mxu0 %v443_v9  ;;  %v467_v12 = vsel %vm419_vm0, %v462_v5, %v466_v2  ;;  %v431_v13 = vsel %vm419_vm0, %v426_v6, %v430_v3  ;;  %v454_v14 = vrot.slane %v452_v7, 1  ;;  %v473_v25 = vor.u32 %v471_v18, %v442_v61  ;;  %v2804_v57 = vld [vmem:[%s3489_s1 + $0xb0] sm:$0xff]   ;;  %v2806_v58 = vld [vmem:[%s3489_s1 + $0xf8] sm:$0xff]   ;;  %v2810_v62 = vld [vmem:[%s3489_s1 + $0x2c0] sm:$0xff]  }
  0x1d   : > { %2495 = vmatpush3.bf16.msra.mxu0 %v2759_v22  ;;  %760 = vmatprep.mubr.bf16.mxu1 %v467_v12  ;;  %v450_v16 = vor.u32 %v449_v10, %v445_v0  ;;  %v477_v22 = vshrl.u32 %v2193_v49, 16  ;;  %v2795_v49 = vld [vmem:[%s3489_s1 + $0x20] sm:$0xff]   ;;  %v2808_v61 = vld [vmem:[%s3489_s1 + $0xb8] sm:$0xff]   ;;  %v2813_v0 = vld [vmem:[%s3489_s1 + $0x248] sm:$0xff]   ;;  %v2227_v1 = vcombine.high %v3072_v35, %v3072_v35  ;;  %v2229_v4 = vcombine.high %v3087_v42, %v3087_v42 }
  0x1e   : > { %2523 = vmatpush3.bf16.msra.mxu1 %v2760_v23  ;;  %2496 = vmatprep.subr.bf16.mxu0 %v2761_v24  ;;  %v2785_v24 = vld [vmem:[%s3489_s1 + $0x50] sm:$0xff]   ;;  %v2811_v63 = vld [vmem:[%s3489_s1 + $0x200] sm:$0xff]   ;;  %v2815_v5 = vld [vmem:[%s3489_s1 + $0x208] sm:$0xff]   ;;  %v2226_v7 = vcombine.low %v3072_v35, %v3072_v35  ;;  %v3263_v10 = vcombine.high %v3069_v34, %v3072_v35  ;;  %v2228_v12 = vcombine.low %v3087_v42, %v3087_v42 }
  0x1f   : > { %2524 = vmatprep.subr.bf16.mxu1 %v2762_v26  ;;  %v455_v23 = vsel %vm419_vm0, %v450_v16, %v454_v14  ;;  %v468_v26 = vshrl.u32 %v2190_v45, 16  ;;  %v2793_v45 = vld [vmem:[%s3489_s1 + $0x60] sm:$0xff]   ;;  %v2819_v6 = vld [vmem:[%s3489_s1 + $0x250] sm:$0xff]   ;;  %v2827_v34 = vld [vmem:[%s3489_s1 + $0x218] sm:$0xff]  }
  0x20   : > { %v2822_v9 = vld [vmem:[%s3489_s1 + $0x210] sm:$0xff]   ;;  %v2829_v35 = vld [vmem:[%s3489_s1 + $0x260] sm:$0xff]   ;;  %v2833_v16 = vld [vmem:[%s3489_s1 + $0x268] sm:$0xff]  }
  0x21   : > { %2497 = vmatpush3.bf16.msra.mxu0 %v2763_v27  ;;  %v2784_v27 = vld [vmem:[%s3489_s1 + $0x88] sm:$0xff]  }
  0x22   : > { %2525 = vmatpush3.bf16.msra.mxu1 %v2764_v28  ;;  %2498 = vmatprep.subr.bf16.mxu0 %v2765_v29  ;;  %v479_v28 = vor.u32 %v477_v22, %v466_v2  ;;  %v474_v29 = vshrl.u32 %v2192_v59, 16  ;;  %v2807_v59 = vld [vmem:[%s3489_s1 + $0x38] sm:$0xff]   ;;  %v2812_v2 = vld [vmem:[%s3489_s1 + $0x280] sm:$0xff]   ;;  %v2834_v18 = vld [vmem:[%s3489_s1 + $0x2e8] sm:$0xff]  }
  0x23   : > { %2526 = vmatprep.subr.bf16.mxu1 %v2766_v30  ;;  %v2786_v30 = vld [vmem:[%s3489_s1 + $0xd0] sm:$0xff]  }
  0x24   : > { %v476_v38 = vor.u32 %v474_v29, %v454_v14  ;;  %v3275_v14 = vcombine.high %v3080_v39, %v3087_v42  ;;  %v2830_v39 = vld [vmem:[%s3489_s1 + $0x2e0] sm:$0xff]   ;;  %v2837_v22 = vld [vmem:[%s3489_s1 + $0x270] sm:$0xff]   ;;  %v2843_v29 = vld [vmem:[%s3489_s1 + $0x238] sm:$0xff]  }
  0x25   : > { %2499 = vmatpush3.bf16.msra.mxu0 %v2767_v31  ;;  %v470_v31 = vor.u32 %v468_v26, %v430_v3  ;;  %v2814_v3 = vld [vmem:[%s3489_s1 + $0x2c8] sm:$0xff]   ;;  %v2831_v42 = vld [vmem:[%s3489_s1 + $0x220] sm:$0xff]   ;;  %v2841_v26 = vld [vmem:[%s3489_s1 + $0x278] sm:$0xff]  }
  0x26   : > { %2527 = vmatpush3.bf16.msra.mxu1 %v2768_v32  ;;  %2540 = vmatprep.subr.bf16.mxu0 %v2777_v51  ;;  %v2787_v32 = vld [vmem:[%s3489_s1 + $0x10] sm:$0xff]   ;;  %v2799_v51 = vld [vmem:[%s3489_s1 + $0x28] sm:$0xff]  }
  0x27   : > { %2568 = vmatprep.subr.bf16.mxu1 %v2778_v60  ;;  %v2809_v60 = vld [vmem:[%s3489_s1 + $0x240] sm:$0xff]  }
  0x28   : > { %713 = vmatmul.mubr.bf16.vlgmr.msra.gmra.mrb[0].mxu0 %v431_v13  ;;  %v2826_v13 = vld [vmem:[%s3489_s1 + $0x2d8] sm:$0xff]  }
  0x29   : > { %2541 = vmatpush3.bf16.msra.mxu0 %v2779_v8  ;;  %761 = vmatmul.mubr.bf16.vlgmr.msra.gmra.mrb[0].mxu1 %v455_v23  ;;  %v2820_v8 = vld [vmem:[%s3489_s1 + $0x2d0] sm:$0xff]   ;;  %v2836_v23 = vld [vmem:[%s3489_s1 + $0x2a8] sm:$0xff]  }
  0x2a   : > { %2542 = vmatprep.subr.bf16.mxu0 %v2781_v11  ;;  %2569 = vmatpush3.bf16.msra.mxu1 %v2780_v15  ;;  %v2823_v11 = vld [vmem:[%s3489_s1 + $0x290] sm:$0xff]   ;;  %v2828_v15 = vld [vmem:[%s3489_s1 + $0x298] sm:$0xff]  }
  0x2b   : > { %720 = vmatprep.mubr.bf16.mxu0 %v473_v25  ;;  %2570 = vmatprep.subr.bf16.mxu1 %v2782_v17  ;;  %v2832_v17 = vld [vmem:[%s3489_s1 + $0x2a0] sm:$0xff]   ;;  %v2839_v25 = vld [vmem:[%s3489_s1 + $0x230] sm:$0xff]  }
  0x2c   : > { %768 = vmatprep.mubr.bf16.mxu1 %v479_v28  ;;  %v2842_v28 = vld [vmem:[%s3489_s1 + $0x2f8] sm:$0xff]  }
  0x2d   : > { %2543 = vmatpush3.bf16.msra.mxu0 %v2783_v21  ;;  %v2835_v21 = vld [vmem:[%s3489_s1 + $0x228] sm:$0xff]  }
  0x2e   : > { %2544 = vmatprep.subr.bf16.mxu0 %v2785_v24  ;;  %2571 = vmatpush3.bf16.msra.mxu1 %v2784_v27  ;;  %v2838_v24 = vld [vmem:[%s3489_s1 + $0x2f0] sm:$0xff]  }
  0x2f   : > { %2572 = vmatprep.subr.bf16.mxu1 %v2786_v30  ;;  %v2840_v27 = vld [vmem:[%s3489_s1 + $0x2b0] sm:$0xff]   ;;  %v2849_v30 = vld [vmem:[%s3489_s1 + $0x340] sm:$0xff]  }
  0x30   : > { %721 = vmatmul.mubr.bf16.gmra.mrb[4].mxu0 %v470_v31  ;;  %v2844_v31 = vld [vmem:[%s3489_s1 + $0x2b8] sm:$0xff]  }
  0x31   : > { %2545 = vmatpush3.bf16.msra.mxu0 %v2787_v32  ;;  %1012 = vmatprep.mubr.bf16.mxu0 %v3076_v37  ;;  %v2797_v37 = vld [vmem:[%s3489_s1 + $0x68] sm:$0xff]   ;;  %v2850_v32 = vld [vmem:[%s3489_s1 + $0x3c0] sm:$0xff]  }
  0x32   : > { %2546 = vmatprep.subr.bf16.mxu0 %v2789_v33  ;;  %769 = vmatmul.mubr.bf16.gmra.mrb[4].mxu1 %v476_v38  ;;  %v2851_v33 = vld [vmem:[%s3489_s1 + $0x300] sm:$0xff]  }
  0x33   : > { %2573 = vmatpush3.bf16.msra.mxu1 %v2788_v36  ;;  %1060 = vmatprep.mubr.bf16.mxu1 %v3091_v44  ;;  %v2798_v44 = vld [vmem:[%s3489_s1 + $0xe8] sm:$0xff]   ;;  %v2852_v38 = vld [vmem:[%s3489_s1 + $0x380] sm:$0xff]  }
  0x34   : > { %2574 = vmatprep.subr.bf16.mxu1 %v2790_v41  ;;  %v2853_v36 = vld [vmem:[%s3489_s1 + $0x348] sm:$0xff]  }
  0x35   : > { %2547 = vmatpush3.bf16.msra.mxu0 %v2791_v43  ;;  %v2854_v41 = vld [vmem:[%s3489_s1 + $0x3c8] sm:$0xff]  }
  0x36   : > { %2548 = vmatprep.subr.bf16.mxu0 %v2793_v45  ;;  %v2855_v43 = vld [vmem:[%s3489_s1 + $0x308] sm:$0xff]  }
  0x37   : > { %2575 = vmatpush3.bf16.msra.mxu1 %v2792_v47  ;;  %v2856_v45 = vld [vmem:[%s3489_s1 + $0x388] sm:$0xff]   ;;  %v3359_v47 = vld [vmem:[%s3059_s12 + $0x30] sm:$0xff] }
  0x38   : > { %2576 = vmatprep.subr.bf16.mxu1 %v2794_v48  ;;  %v3362_v48 = vld [vmem:[%s3059_s12 + $0x38] sm:$0xff] }
  0x39   : > { %2549 = vmatpush3.bf16.msra.mxu0 %v2795_v49  ;;  %v2331_v49 = vcombine.high %v3359_v47, %v3359_v47 }
  0x3a   : > { %2550 = vmatprep.subr.bf16.mxu0 %v2797_v37  ;;  %v2333_v37 = vcombine.high %v3362_v48, %v3362_v48 }
  0x3b   : > { %2577 = vmatpush3.bf16.msra.mxu1 %v2796_v50  ;;  %v2861_v50 = vld [vmem:[%s3489_s1 + $0x350] sm:$0xff]  }
  0x3c   : > { %2578 = vmatprep.subr.bf16.mxu1 %v2798_v44  ;;  %v2330_v44 = vcombine.low %v3359_v47, %v3359_v47 }
  0x3d   : > { %2551 = vmatpush3.bf16.msra.mxu0 %v2799_v51  ;;  %v2862_v51 = vld [vmem:[%s3489_s1 + $0x3d0] sm:$0xff]  }
  0x3e   : > { %2552 = vmatprep.subr.bf16.mxu0 %v2801_v52  ;;  %v2863_v52 = vld [vmem:[%s3489_s1 + $0x310] sm:$0xff]  }
  0x3f   : > { %2579 = vmatpush3.bf16.msra.mxu1 %v2800_v53  ;;  %v2864_v53 = vld [vmem:[%s3489_s1 + $0x390] sm:$0xff]  }
  0x40   : > { %2580 = vmatprep.subr.bf16.mxu1 %v2802_v54  ;;  %v2332_v54 = vcombine.low %v3362_v48, %v3362_v48 }
  0x41   : > { %2553 = vmatpush3.bf16.msra.mxu0 %v2803_v55  ;;  %v2865_v55 = vld [vmem:[%s3489_s1 + $0x358] sm:$0xff]  }
  0x42   : > { %2554 = vmatprep.subr.bf16.mxu0 %v2805_v56  ;;  %v2866_v56 = vld [vmem:[%s3489_s1 + $0x3d8] sm:$0xff]  }
  0x43   : > { %2581 = vmatpush3.bf16.msra.mxu1 %v2804_v57  ;;  %v2867_v57 = vld [vmem:[%s3489_s1 + $0x318] sm:$0xff]  }
  0x44   : > { %2582 = vmatprep.subr.bf16.mxu1 %v2806_v58  ;;  %v2868_v58 = vld [vmem:[%s3489_s1 + $0x398] sm:$0xff]  }
  0x45   : > { %2555 = vmatpush3.bf16.msra.mxu0 %v2807_v59  ;;  %v2869_v59 = vld [vmem:[%s3489_s1 + $0x360] sm:$0xff]  }
  0x46   : > { %2596 = vmatprep.subr.bf16.mxu0 %v2809_v60  ;;  %v2870_v60 = vld [vmem:[%s3489_s1 + $0x3e0] sm:$0xff]  }
  0x47   : > { %2583 = vmatpush3.bf16.msra.mxu1 %v2808_v61  ;;  %v2871_v61 = vld [vmem:[%s3489_s1 + $0x320] sm:$0xff]  }
  0x48   : > { %1013 = vmatmul.mubr.bf16.vlgmr.msra.gmra.mrb[8].mxu0 %v3083_v40  ;;  %2624 = vmatprep.subr.bf16.mxu1 %v2810_v62  ;;  %v2816_v40 = vld [vmem:[%s3489_s1 + $0x288] sm:$0xff]   ;;  %v2872_v62 = vld [vmem:[%s3489_s1 + $0x3a0] sm:$0xff]  }
  0x49   : > { %2597 = vmatpush3.bf16.msra.mxu0 %v2811_v63  ;;  %1020 = vmatprep.mubr.bf16.mxu0 %v2227_v1  ;;  %v2873_v63 = vld [vmem:[%s3489_s1 + $0x368] sm:$0xff]  }
  0x4a   : > { %2598 = vmatprep.subr.bf16.mxu0 %v2813_v0  ;;  %1061 = vmatmul.mubr.bf16.vlgmr.msra.gmra.mrb[8].mxu1 %v3095_v46  ;;  %v2825_v46 = vld [vmem:[%s3489_s1 + $0x258] sm:$0xff]   ;;  %v1576_v0 = vshll.u32 %v3263_v10, 16  ;;  %v2874_v1 = vld [vmem:[%s3489_s1 + $0x3e8] sm:$0xff]  }
  0x4b   : > { %2625 = vmatpush3.bf16.msra.mxu1 %v2812_v2  ;;  %1068 = vmatprep.mubr.bf16.mxu1 %v2229_v4  ;;  %v2875_v2 = vld [vmem:[%s3489_s1 + $0x328] sm:$0xff]  }
  0x4c   : > { %2626 = vmatprep.subr.bf16.mxu1 %v2814_v3  ;;  %v1574_v3 = vshrl.u32 %v3263_v10, 16  ;;  %v2876_v4 = vld [vmem:[%s3489_s1 + $0x3a8] sm:$0xff]  }
  0x4d   : > { %2599 = vmatpush3.bf16.msra.mxu0 %v2815_v5  ;;  %v1598_v5 = vshrl.u32 %v3275_v14, 16 }
  0x4e   : > { %2600 = vmatprep.subr.bf16.mxu0 %v2819_v6  ;;  %v2877_v6 = vld [vmem:[%s3489_s1 + $0x370] sm:$0xff]  }
  0x4f   : > { %2627 = vmatpush3.bf16.msra.mxu1 %v2816_v40  ;;  %v1578_v40 = vrot.slane %v1576_v0, 1 }
  0x50   : > { %1021 = vmatmul.mubr.bf16.gmra.mrb[12].mxu0 %v2226_v7  ;;  %2628 = vmatprep.subr.bf16.mxu1 %v2820_v8  ;;  %v2878_v7 = vld [vmem:[%s3489_s1 + $0x3f0] sm:$0xff]   ;;  %v1600_v8 = vshll.u32 %v3275_v14, 16 }
  0x51   : > { %2601 = vmatpush3.bf16.msra.mxu0 %v2822_v9  ;;  %1389 = vmatprep.mubr.bf16.mxu0 %v3263_v10  ;;  %v2879_v9 = vld [vmem:[%s3489_s1 + $0x330] sm:$0xff]  }
  0x52   : > { %2602 = vmatprep.subr.bf16.mxu0 %v2825_v46  ;;  %1069 = vmatmul.mubr.bf16.gmra.mrb[12].mxu1 %v2228_v12  ;;  %v1564_v46 = vshll.u32 %v3130_v19, 16  ;;  %v2880_v10 = vld [vmem:[%s3489_s1 + $0x3b0] sm:$0xff]   ;;  %v2881_v12 = vld [vmem:[%s3489_s1 + $0x378] sm:$0xff]  }
  0x53   : > { %2629 = vmatpush3.bf16.msra.mxu1 %v2823_v11  ;;  %1437 = vmatprep.mubr.bf16.mxu1 %v3275_v14  ;;  %v1588_v11 = vshll.u32 %v3134_v20, 16  ;;  %v2882_v14 = vld [vmem:[%s3489_s1 + $0x3f8] sm:$0xff]  }
  0x54   : > { %2630 = vmatprep.subr.bf16.mxu1 %v2826_v13  ;;  %v1562_v13 = vshrl.u32 %v3130_v19, 16 }
  0x55   : > { %2603 = vmatpush3.bf16.msra.mxu0 %v2827_v34  ;;  %v1602_v34 = vrot.slane %v1600_v8, 1 }
  0x56   : > { %2604 = vmatprep.subr.bf16.mxu0 %v2829_v35  ;;  %v2883_v35 = vld [vmem:[%s3489_s1 + $0x338] sm:$0xff]  }
  0x57   : > { %2631 = vmatpush3.bf16.msra.mxu1 %v2828_v15  ;;  %v1566_v15 = vrot.slane %v1564_v46, 1 }
  0x58   : > { %2632 = vmatprep.subr.bf16.mxu1 %v2830_v39  ;;  %v1462_v39 = vld [vmem:[%s3059_s12 + $0x40] sm:$0x11] }
  0x59   : > { %2605 = vmatpush3.bf16.msra.mxu0 %v2831_v42  ;;  %v1586_v42 = vshrl.u32 %v3134_v20, 16 }
  0x5a   : > { %2606 = vmatprep.subr.bf16.mxu0 %v2833_v16  ;;  %v1590_v16 = vrot.slane %v1588_v11, 1 }
  0x5b   : > { %2633 = vmatpush3.bf16.msra.mxu1 %v2832_v17  ;;  %v2435_v17 = vcombine.high %v3359_v47, %v1462_v39 }
  0x5c   : > { %2634 = vmatprep.subr.bf16.mxu1 %v2834_v18  ;;  %v1579_v18 = vor.u32 %v1578_v40, %v1574_v3 }
  0x5d   : > { %2607 = vmatpush3.bf16.msra.mxu0 %v2835_v21  ;;  %v1463_v21 = vld [vmem:[%s3059_s12 + $0x48] sm:$0x11] }
  0x5e   : > { %2608 = vmatprep.subr.bf16.mxu0 %v2837_v22  ;;  %v1930_v22 = vld [vmem:[%s3491_s3] sm:$0xff] }
  0x5f   : > { %2635 = vmatpush3.bf16.msra.mxu1 %v2836_v23  ;;  %v2884_v23 = vld [vmem:[%s3489_s1 + $0x3b8] sm:$0xff]   ;;  %1935 = vperm.xlu0 %2735, %v1930_v22  }
  0x60   : > { %2636 = vmatprep.subr.bf16.mxu1 %v2838_v24  ;;  %v2436_v24 = vcombine.low %v3362_v48, %v1463_v21 }
  0x61   : > { %2609 = vmatpush3.bf16.msra.mxu0 %v2839_v25  ;;  %v1603_v25 = vor.u32 %v1602_v34, %v1598_v5 }
  0x62   : > { %2610 = vmatprep.subr.bf16.mxu0 %v2841_v26  ;;  %v1932_v26 = vld [vmem:[%s3491_s3 + $0x10] sm:$0xff] }
  0x63   : > { %2637 = vmatpush3.bf16.msra.mxu1 %v2840_v27  ;;  %v1581_v27 = vshll.u32 %v2435_v17, 16  ;;  %1945 = vperm.xlu1 %2736, %v1932_v26  }
  0x64   : > { %2638 = vmatprep.subr.bf16.mxu1 %v2842_v28  ;;  %v1567_v28 = vor.u32 %v1566_v15, %v1562_v13 }
  0x65   : > { %2611 = vmatpush3.bf16.msra.mxu0 %v2843_v29 }
  0x66   : > { %2652 = vmatprep.subr.bf16.mxu0 %v2849_v30  ;;  %v1612_v30 = vshrl.u32 %v2435_v17, 16 }
  0x67   : > { %2639 = vmatpush3.bf16.msra.mxu1 %v2844_v31  ;;  %v1931_v31 = vld [vmem:[%s3491_s3 + $0x8] sm:$0xff] }
  0x68   : > { %1390 = vmatmul.mubr.bf16.vlgmr.msra.gmra.mrb[16].mxu0 %v3130_v19  ;;  %2680 = vmatprep.subr.bf16.mxu1 %v2850_v32  ;;  %v2434_v19 = vcombine.low %v3359_v47, %v1462_v39 }
  0x69   : > { %2653 = vmatpush3.bf16.msra.mxu0 %v2851_v33  ;;  %1397 = vmatprep.mubr.bf16.mxu0 %v2331_v49  ;;  %v1591_v33 = vor.u32 %v1590_v16, %v1586_v42 }
  0x6a   : > { %2654 = vmatprep.subr.bf16.mxu0 %v2853_v36  ;;  %1438 = vmatmul.mubr.bf16.vlgmr.msra.gmra.mrb[16].mxu1 %v3134_v20  ;;  %v2437_v20 = vcombine.high %v3362_v48, %v1463_v21  ;;  %v1569_v29 = vshll.u32 %v2434_v19, 16  ;;  %v1593_v36 = vshll.u32 %v2436_v24, 16 }
  0x6b   : > { %2681 = vmatpush3.bf16.msra.mxu1 %v2852_v38  ;;  %1445 = vmatprep.mubr.bf16.mxu1 %v2333_v37 }
  0x6c   : > { %2682 = vmatprep.subr.bf16.mxu1 %v2854_v41  ;;  %v1605_v32 = vshll.u32 %v2437_v20, 16  ;;  %v1618_v38 = vshrl.u32 %v2437_v20, 16  ;;  %v1583_v41 = vrot.slane %v1581_v27, 1  ;;  %v1595_v47 = vrot.slane %v1593_v36, 1  ;;  %1940 = vperm.xlu0 %2735, %v1931_v31  }
  0x6d   : > { %2655 = vmatpush3.bf16.msra.mxu0 %v2855_v43  ;;  %v1571_v43 = vrot.slane %v1569_v29, 1 }
  0x6e   : > { %2656 = vmatprep.subr.bf16.mxu0 %v2861_v50  ;;  %v1584_v48 = vsel %vm419_vm0, %v1579_v18, %v1583_v41  ;;  %v1614_v37 = vor.u32 %v1612_v30, %v1583_v41 }
  0x6f   : > { %2683 = vmatpush3.bf16.msra.mxu1 %v2856_v45  ;;  %v1607_v45 = vrot.slane %v1605_v32, 1  ;;  %v1572_v49 = vsel %vm419_vm0, %v1567_v28, %v1571_v43 }
  0x70   : > { %1398 = vmatmul.mubr.bf16.gmra.mrb[20].mxu0 %v2330_v44  ;;  %2684 = vmatprep.subr.bf16.mxu1 %v2862_v51  ;;  %v1596_v44 = vsel %vm419_vm0, %v1591_v33, %v1595_v47 }
  0x71   : > { %2657 = vmatpush3.bf16.msra.mxu0 %v2863_v52  ;;  %1853 = vmatprep.mubr.bf16.mxu0 %v1584_v48  ;;  %v1608_v50 = vsel %vm419_vm0, %v1603_v25, %v1607_v45  ;;  %v1620_v51 = vor.u32 %v1618_v38, %v1607_v45  ;;  %v1609_v52 = vshrl.u32 %v2434_v19, 16 }
  0x72   : > { %2658 = vmatprep.subr.bf16.mxu0 %v2865_v55  ;;  %1446 = vmatmul.mubr.bf16.gmra.mrb[20].mxu1 %v2332_v54 }
  0x73   : > { %2685 = vmatpush3.bf16.msra.mxu1 %v2864_v53  ;;  %1901 = vmatprep.mubr.bf16.mxu1 %v1608_v50  ;;  %v1615_v53 = vshrl.u32 %v2436_v24, 16  ;;  %v1611_v54 = vor.u32 %v1609_v52, %v1571_v43 }
  0x74   : > { %2686 = vmatprep.subr.bf16.mxu1 %v2866_v56 }
  0x75   : > { %2659 = vmatpush3.bf16.msra.mxu0 %v2867_v57  ;;  %v1617_v55 = vor.u32 %v1615_v53, %v1595_v47 }
  0x76   : > { %2660 = vmatprep.subr.bf16.mxu0 %v2869_v59 }
  0x77   : > { %2687 = vmatpush3.bf16.msra.mxu1 %v2868_v58 }
  0x78   : > { %2688 = vmatprep.subr.bf16.mxu1 %v2870_v60 }
  0x79   : > { %2661 = vmatpush3.bf16.msra.mxu0 %v2871_v61 }
  0x7a   : > { %2662 = vmatprep.subr.bf16.mxu0 %v2873_v63 }
  0x7b   : > { %2689 = vmatpush3.bf16.msra.mxu1 %v2872_v62 }
  0x7c   : > { %2690 = vmatprep.subr.bf16.mxu1 %v2874_v1 }
  0x7d   : > { %2663 = vmatpush3.bf16.msra.mxu0 %v2875_v2 }
  0x7e   : > { %2664 = vmatprep.subr.bf16.mxu0 %v2877_v6 }
  0x7f   : > { %2691 = vmatpush3.bf16.msra.mxu1 %v2876_v4 }
  0x80   : > { %2692 = vmatprep.subr.bf16.mxu1 %v2878_v7 }
  0x81   : > { %2665 = vmatpush3.bf16.msra.mxu0 %v2879_v9 }
  0x82   : > { %2666 = vmatprep.subr.bf16.mxu0 %v2881_v12 }
  0x83   : > { %2693 = vmatpush3.bf16.msra.mxu1 %v2880_v10 }
  0x84   : > { %2694 = vmatprep.subr.bf16.mxu1 %v2882_v14 }
  0x85   : > { %2667 = vmatpush3.bf16.msra.mxu0 %v2883_v35 }
  0x87   : > { %2695 = vmatpush3.bf16.msra.mxu1 %v2884_v23 }
  0x88   : > { %1854 = vmatmul.mubr.bf16.vlgmr.msra.gmra.mrb[24].mxu0 %v1572_v49 }
  0x89   : > { %1861 = vmatprep.mubr.bf16.mxu0 %v1614_v37 }
  0x8a   : > { %1902 = vmatmul.mubr.bf16.vlgmr.msra.gmra.mrb[24].mxu1 %v1596_v44 }
  0x8b   : > { %1909 = vmatprep.mubr.bf16.mxu1 %v1620_v51 }
  0x90   : > { %1862 = vmatmul.mubr.bf16.gmra.mrb[28].mxu0 %v1611_v54 }
  0x92   : > { %1910 = vmatmul.mubr.bf16.gmra.mrb[28].mxu1 %v1617_v55 }
  0xfb   : > { %v2500_v56 = vpop.f32.mrb[0].mxu0 }
  0xfc   : > { %v2501_v57 = vpop.f32.mrb[1].mxu0  ;;  %v2528_v60 = vpop.f32.mrb[0].mxu1 }
  0xfd   : > { %v2502_v58 = vadd.f32 %v2501_v57, %v2500_v56  ;;  %v2503_v59 = vpop.f32.mrb[2].mxu0  ;;  %v2529_v62 = vpop.f32.mrb[1].mxu1 }
  0xfe   : > { %v2504_v61 = vpop.f32.mrb[3].mxu0  ;;  %v2530_v0 = vadd.f32 %v2529_v62, %v2528_v60  ;;  %v2531_v1 = vpop.f32.mrb[2].mxu1 }
  0xff   : > { %v2505_v63 = vadd.f32 %v2504_v61, %v2503_v59  ;;  %v2532_v2 = vpop.f32.mrb[3].mxu1 }
 0x100   : > { %v763_v3 = vadd.f32 %v2530_v0, %v2502_v58  ;;  %v2533_v4 = vadd.f32 %v2532_v2, %v2531_v1 }
 0x102   : > { %v766_v6 = vadd.f32 %v2533_v4, %v2505_v63 }
 0x103   : > { %v2506_v5 = vpop.f32.mrb[4].mxu0 }
 0x104   : > { %v2507_v40 = vpop.f32.mrb[5].mxu0 }
 0x105   : > { %v2508_v7 = vadd.f32 %v2507_v40, %v2506_v5  ;;  %v2509_v8 = vpop.f32.mrb[6].mxu0  ;;  %v2534_v9 = vpop.f32.mrb[4].mxu1 }
 0x106   : > { %v2510_v46 = vpop.f32.mrb[7].mxu0  ;;  %v2535_v10 = vpop.f32.mrb[5].mxu1 }
 0x107   : > { %v2536_v11 = vadd.f32 %v2535_v10, %v2534_v9  ;;  %v2537_v12 = vpop.f32.mrb[6].mxu1  ;;  %v1936_v9 = vpop.permute.xlu0 %1935 }
 0x108   : > { %v2538_v13 = vpop.f32.mrb[7].mxu1 }
 0x109   : > { %v771_v14 = vadd.f32 %v2536_v11, %v2508_v7 }
 0x11b   : > { %v2556_v34 = vpop.f32.mrb[8].mxu0 }
 0x11c   : > { %v2557_v35 = vpop.f32.mrb[9].mxu0 }
 0x11d   : > { %v2558_v15 = vadd.f32 %v2557_v35, %v2556_v34  ;;  %v2559_v39 = vpop.f32.mrb[10].mxu0  ;;  %v2584_v42 = vpop.f32.mrb[8].mxu1 }
 0x11e   : > { %v2560_v16 = vpop.f32.mrb[11].mxu0  ;;  %v2585_v17 = vpop.f32.mrb[9].mxu1 }
 0x11f   : > { %v1015_v19 = vadd.f32 %v2558_v15, %v763_v3  ;;  %v2561_v18 = vadd.f32 %v2560_v16, %v2559_v39  ;;  %v2586_v21 = vadd.f32 %v2585_v17, %v2584_v42  ;;  %v2587_v22 = vpop.f32.mrb[10].mxu1 }
 0x120   : > { %v2588_v24 = vpop.f32.mrb[11].mxu1 }
 0x121   : > { %v1018_v23 = vadd.f32 %v2561_v18, %v766_v6  ;;  %v1063_v20 = vadd.f32 %v2586_v21, %v1015_v19  ;;  %v2589_v25 = vadd.f32 %v2588_v24, %v2587_v22  ;;  %v2470_v19 = vld [vmem:[%s3490_s2] ss:$0 sm:$0xff]  ;;  %v1941_v22 = vpop.permute.xlu0 %1940 }
 0x123   : > { %v2562_v26 = vpop.f32.mrb[12].mxu0  ;;  %v1066_v27 = vadd.f32 %v2589_v25, %v1018_v23 }
 0x124   : > { %v2563_v28 = vpop.f32.mrb[13].mxu0 }
 0x125   : > { %v2564_v29 = vadd.f32 %v2563_v28, %v2562_v26  ;;  %v2565_v30 = vpop.f32.mrb[14].mxu0  ;;  %v2590_v31 = vpop.f32.mrb[12].mxu1 }
 0x126   : > { %v2566_v32 = vpop.f32.mrb[15].mxu0  ;;  %v2591_v36 = vpop.f32.mrb[13].mxu1 }
 0x127   : > { %v1023_v33 = vadd.f32 %v2564_v29, %v771_v14  ;;  %v2592_v38 = vadd.f32 %v2591_v36, %v2590_v31  ;;  %v2593_v41 = vpop.f32.mrb[14].mxu1 }
 0x128   : > { %v2594_v43 = vpop.f32.mrb[15].mxu1 }
 0x129   : > { %v1071_v45 = vadd.f32 %v2592_v38, %v1023_v33 }
 0x13b   : > { %v2612_v47 = vpop.f32.mrb[16].mxu0 }
 0x13c   : > { %v2613_v48 = vpop.f32.mrb[17].mxu0 }
 0x13d   : > { %v2614_v49 = vadd.f32 %v2613_v48, %v2612_v47  ;;  %v2615_v37 = vpop.f32.mrb[18].mxu0  ;;  %v2640_v50 = vpop.f32.mrb[16].mxu1 }
 0x13e   : > { %v2616_v44 = vpop.f32.mrb[19].mxu0  ;;  %v2641_v51 = vpop.f32.mrb[17].mxu1 }
 0x13f   : > { %v2617_v52 = vadd.f32 %v2616_v44, %v2615_v37  ;;  %v2642_v53 = vadd.f32 %v2641_v51, %v2640_v50  ;;  %v2643_v54 = vpop.f32.mrb[18].mxu1 }
 0x140   : > { %v2644_v55 = vpop.f32.mrb[19].mxu1 }
 0x141   : > { %v1440_v56 = vadd.f32 %v2642_v53, %v2614_v49  ;;  %v2645_v57 = vadd.f32 %v2644_v55, %v2643_v54  ;;  %v1946_v49 = vpop.permute.xlu1 %1945 }
 0x143   : > { %v2618_v58 = vpop.f32.mrb[20].mxu0  ;;  %v1453_v59 = vadd.f32 %v1440_v56, %v1063_v20  ;;  %v1443_v60 = vadd.f32 %v2645_v57, %v2617_v52 }
 0x144   : > { %v2619_v61 = vpop.f32.mrb[21].mxu0 }
 0x145   : > { %v2620_v62 = vadd.f32 %v2619_v61, %v2618_v58  ;;  %v2621_v63 = vpop.f32.mrb[22].mxu0  ;;  %v1454_v0 = vadd.f32 %v1443_v60, %v1066_v27  ;;  %v2646_v1 = vpop.f32.mrb[20].mxu1 }
 0x146   : > { %v2622_v2 = vpop.f32.mrb[23].mxu0  ;;  %v2647_v3 = vpop.f32.mrb[21].mxu1 }
 0x147   : > { %v2648_v4 = vadd.f32 %v2647_v3, %v2646_v1  ;;  %v2649_v5 = vpop.f32.mrb[22].mxu1 }
 0x148   : > { %v2650_v6 = vpop.f32.mrb[23].mxu1 }
 0x149   : > { %v1448_v40 = vadd.f32 %v2648_v4, %v2620_v62 }
 0x14b   : > { %v1455_v7 = vadd.f32 %v1448_v40, %v1071_v45 }
 0x15b   : > { %v2668_v8 = vpop.f32.mrb[24].mxu0 }
 0x15c   : > { %v2669_v10 = vpop.f32.mrb[25].mxu0 }
 0x15d   : > { %v2696_v46 = vpop.f32.mrb[24].mxu1  ;;  %v2670_v11 = vadd.f32 %v2669_v10, %v2668_v8  ;;  %v2671_v13 = vpop.f32.mrb[26].mxu0 }
 0x15e   : > { %v2697_v12 = vpop.f32.mrb[25].mxu1  ;;  %v2672_v35 = vpop.f32.mrb[27].mxu0 }
 0x15f   : > { %v2698_v14 = vadd.f32 %v2697_v12, %v2696_v46  ;;  %v2699_v34 = vpop.f32.mrb[26].mxu1  ;;  %v2673_v15 = vadd.f32 %v2672_v35, %v2671_v13 }
 0x160   : > { %v2700_v39 = vpop.f32.mrb[27].mxu1 }
 0x161   : > { %v1904_v42 = vadd.f32 %v2698_v14, %v2670_v11  ;;  %v2701_v16 = vadd.f32 %v2700_v39, %v2699_v34 }
 0x163   : > { %v1907_v17 = vadd.f32 %v2701_v16, %v2673_v15  ;;  %v1917_v18 = vadd.f32 %v1904_v42, %v1453_v59  ;;  %v2674_v21 = vpop.f32.mrb[28].mxu0 }
 0x164   : > { %v2675_v20 = vpop.f32.mrb[29].mxu0 }
 0x165   : > { %v1927_v23 = vadd.f32 %v2470_v19, %v1917_v18  ;;  %v2702_v24 = vpop.f32.mrb[28].mxu1  ;;  %v1918_v25 = vadd.f32 %v1907_v17, %v1454_v0  ;;  %v2676_v26 = vadd.f32 %v2675_v20, %v2674_v21  ;;  %v2677_v28 = vpop.f32.mrb[30].mxu0 }
 0x166   : > { %v2703_v27 = vpop.f32.mrb[29].mxu1  ;;  %v2678_v33 = vpop.f32.mrb[31].mxu0 }
 0x167   : > { %v1948_v29 = vmul.f32 %v1936_v9, %v1927_v23  ;;  %v2704_v30 = vadd.f32 %v2703_v27, %v2702_v24  ;;  %v2705_v31 = vpop.f32.mrb[30].mxu1  ;;  %v1928_v32 = vadd.f32 %v2470_v19, %v1918_v25 }
 0x168   : > { %v2706_v36 = vpop.f32.mrb[31].mxu1 }
 0x169   : > { %v1912_v38 = vadd.f32 %v2704_v30, %v2676_v26  ;;  %v1949_v41 = vmul.f32 %v1941_v22, %v1928_v32  ;;  %v1960_v43 = vmul.f32 %v1948_v29, %v1948_v29 }
 0x16b   : > { %v1951_v45 = vadd.f32 %v1949_v41, %v1948_v29  ;;  %v1961_v47 = vmul.f32 %v1949_v41, %v1949_v41  ;;  %v1919_v48 = vadd.f32 %v1912_v38, %v1455_v7 }
 0x16d   : > { %v1963_v37 = vadd.f32 %v1961_v47, %v1960_v43  ;;  %v1929_v50 = vadd.f32 %v2470_v19, %v1919_v48 }
 0x16f   : > { %v1950_v44 = vmul.f32 %v1946_v49, %v1929_v50 }
 0x171   : > { %v1952_v51 = vadd.f32 %v1951_v45, %v1950_v44  ;;  %v1962_v52 = vmul.f32 %v1950_v44, %v1950_v44 }
 0x173   : > { %v1953_v53 = vrot.slane %v1952_v51, 4  ;;  %v1964_v54 = vadd.f32 %v1963_v37, %v1962_v52 }
 0x175   : > { %v1954_v55 = vadd.f32 %v1953_v53, %v1952_v51  ;;  %v1965_v56 = vrot.slane %v1964_v54, 4 }
 0x177   : > { %v1955_v57 = vrot.slane %v1954_v55, 2  ;;  %v1966_v58 = vadd.f32 %v1965_v56, %v1964_v54 }
 0x179   : > { %v1956_v59 = vadd.f32 %v1955_v57, %v1954_v55  ;;  %v1967_v60 = vrot.slane %v1966_v58, 2 }
 0x17b   : > { %v1957_v61 = vrot.slane %v1956_v59, 1  ;;  %v1968_v62 = vadd.f32 %v1967_v60, %v1966_v58 }
 0x17d   : > { %v1958_v63 = vadd.f32 %v1957_v61, %v1956_v59  ;;  %v1969_v0 = vrot.slane %v1968_v62, 1 }
 0x17f   : > { %v1959_v1 = vmul.f32 0.11111111, %v1958_v63  ;;  %v1970_v2 = vadd.f32 %v1969_v0, %v1968_v62 }
 0x181   : > { %v1971_v3 = vmul.f32 0.11111111, %v1970_v2  ;;  %v1972_v4 = vmul.f32 %v1959_v1, %v1959_v1  ;;  %v1975_v5 = vsub.f32 %v1927_v23, %v1959_v1  ;;  %v1976_v6 = vsub.f32 %v1928_v32, %v1959_v1 }
 0x182   : > { %v1977_v40 = vsub.f32 %v1929_v50, %v1959_v1 }
 0x183   : > { %v1973_v7 = vsub.f32 %v1971_v3, %v1972_v4 }
 0x185   : > { %v1974_v8 = vmax.f32 %v1973_v7, 0.0 }
 0x187   : > { %v1978_v9 = vadd.f32 1e-05, %v1974_v8 }
 0x189   : > { %2889 = vrsqrt.f32 %v1978_v9 }
 0x193   : > { %v2890_v46 = vpop.eup %2889 }
 0x194   : > { %v1980_v10 = vmul.f32 %v2890_v46, %v1975_v5  ;;  %v1981_v11 = vmul.f32 %v2890_v46, %v1976_v6  ;;  %v1982_v12 = vmul.f32 %v2890_v46, %v1977_v40 }
 0x196   : > { %vm1983_vm1 = vcmp.ge.f32.partialorder %v1980_v10, 0.0  ;;  %vm1984_vm2 = vcmp.ge.f32.partialorder %v1981_v11, 0.0  ;;  %vm1985_vm3 = vcmp.ge.f32.partialorder %v1982_v12, 0.0  ;;  %v1986_v13 = vmul.f32 0.2, %v1980_v10 }
 0x197   : > { %v1987_v14 = vmul.f32 0.2, %v1981_v11  ;;  %v1988_v34 = vmul.f32 0.2, %v1982_v12 }
 0x198   : > { %v1989_v35 = vsel %vm1983_vm1, %v1980_v10, %v1986_v13 }
 0x199   : > { %v1990_v15 = vsel %vm1984_vm2, %v1981_v11, %v1987_v14  ;;  %v1991_v39 = vsel %vm1985_vm3, %v1982_v12, %v1988_v34 }
 0x19a   : > { %v2478_v42 = vpack.c.bf16 %v1991_v39, %v1991_v39  ;;  %v2482_v16 = vpack.c.bf16 %v1990_v15, %v1989_v35 }
 0x19c   : > { %2483 = vst [vmem:[%s248_s8] sm:$0xff] %v2482_v16   ;;  %2007 = vst [vmem:[%s248_s8 + $0x8] sm:$0xf] %v2478_v42 }
 0x19d PF: > { %s14_s17 = sadd.s32 1, %s2913_s17   ;;  %s3493_s15 = smov %s2909_s16 }
 0x19e   : > { %p11_p5 = scmp.ge.s32.totalorder %s14_s17, 4   ;;  %s3494_s16 = smov %s3496_s18 }
 0x1a0   :  { %13 = sbr.rel (!%p11_p5) target bundleno = 2 (0x2), region = 75 }

// kernel: discriminator_forward.9
= control target key start
LH: loop header
LB: loop body
LE: loop exit
PB: predicated region body
PF: predicated region fallthrough
CT: control target
= control target key end

     0   :  { %s3404_s12 = smov 0   ;;  %s3406_s13 = smov 0   ;;  %s4060_s0 = inlined_call_operand.vmem [shape: bf16[2,48,128], index: 0, kind: input, shape index: {}]   ;;  %s4061_s1 = inlined_call_operand.vmem [shape: bf16[16,128,128], index: 1, kind: input, shape index: {}]   ;;  %s4062_s2 = inlined_call_operand.vmem [shape: f32[1,128], index: 2, kind: input, shape index: {}]   ;;  %s4063_s3 = inlined_call_operand.vmem [shape: f32[2,16,128], index: 3, kind: output, shape index: {}]  }
   0x1   :  { %s3408_s14 = smov 0  }
   0x2 LB: > { %s25_s15 = sadd.s32 1, %s3376_s13  ;;  %p2315_p0 = scmp.ge.s32.totalorder %s3380_s14, 1  ;;  %s3380_s14 = sphi %s3408_s14, %s13_s14   ;;  %s3376_s13 = sphi %s3406_s13, %s4065_s13   ;;  %s3372_s12 = sphi %s3404_s12, %s4064_s12  }
   0x3   : > { %p27_p1 = scmp.ge.s32.totalorder %s25_s15, 2  ;;  %p168_p2 = scmp.lt.s32.totalorder %s3380_s14, 3 }
   0x5   : > { %s4067_s15 = smov (%p27_p1, %s25_s15), 0  ;;  %p169_p3 = pnand %p2315_p0, %p168_p2 }
   0x6   : > { %v3203_v0 = vld [vmem:[%s4061_s1 + $0x40] sm:$0xff] (!%p169_p3)   ;;  %v3382_v1 = vmov (!%p169_p3), 0.0   ;;  %v3205_v3 = vld [vmem:[%s4061_s1 + $0x48] sm:$0xff] (!%p169_p3)   ;;  %vm3383_vm0 = vmmov (!%p169_p3), 0   ;;  %p202_p4 = scmp.lt.s32.totalorder (!%p169_p3), %s3372_s12, 1  ;;  %v3207_v5 = vld [vmem:[%s4061_s1 + $0x50] sm:$0xff] (!%p169_p3)  }
   0x7   : > { %172 = sbr.rel (%p169_p3) target bundleno = 510 (0x1fe), region = 32  ;;  %2856 = vmatprep.subr.bf16.mxu0 (!%p169_p3), %v3382_v1  ;;  %2876 = vmatprep.subr.bf16.mxu1 (!%p169_p3), %v3382_v1  ;;  %v3204_v2 = vld [vmem:[%s4061_s1] sm:$0xff] (!%p169_p3)   ;;  %v3206_v4 = vld [vmem:[%s4061_s1 + $0x8] sm:$0xff] (!%p169_p3)   ;;  %v3208_v6 = vld [vmem:[%s4061_s1 + $0x10] sm:$0xff] (!%p169_p3)   ;;  %vm267_vm1 = vsmask.f32 (!%p169_p3), 7424 }
   0x8   : > { %2857 = vmatpush3.bf16.msra.mxu0 (!%p169_p3), %v3203_v0  ;;  %2872 = vmatprep.mubr.msk.bf16.mxu0 (!%p169_p3), %vm3383_vm0, %v3382_v1  ;;  %v3209_v7 = vld [vmem:[%s4061_s1 + $0x58] sm:$0xff] (!%p169_p3)   ;;  %v3211_v9 = vld [vmem:[%s4061_s1 + $0x60] sm:$0xff] (!%p169_p3)   ;;  %v3213_v13 = vld [vmem:[%s4061_s1 + $0x68] sm:$0xff] (!%p169_p3)   ;;  %vm481_vm2 = vcmask (!%p169_p3), 1046528   ;;  %vm598_vm3 = vsmask.f32 (!%p169_p3), 6400 }
   0x9   : > { %2877 = vmatpush3.bf16.msra.mxu1 (!%p169_p3), %v3204_v2  ;;  %2858 = vmatprep.subr.bf16.mxu0 (!%p169_p3), %v3382_v1  ;;  %v3210_v8 = vld [vmem:[%s4061_s1 + $0x18] sm:$0xff] (!%p169_p3)   ;;  %v3212_v10 = vld [vmem:[%s4061_s1 + $0x20] sm:$0xff] (!%p169_p3)   ;;  %v3214_v16 = vld [vmem:[%s4061_s1 + $0x28] sm:$0xff] (!%p169_p3)  }
   0xa   : > { %2878 = vmatprep.subr.bf16.mxu1 (!%p169_p3), %v3382_v1  ;;  %2892 = vmatprep.mubr.msk.bf16.mxu1 (!%p169_p3), %vm3383_vm0, %v3382_v1  ;;  %v3215_v18 = vld [vmem:[%s4061_s1 + $0x70] sm:$0xff] (!%p169_p3)   ;;  %v3217_v23 = vld [vmem:[%s4061_s1 + $0x78] sm:$0xff] (!%p169_p3)   ;;  %v3221_v28 = vld [vmem:[%s4061_s1 + $0x80] sm:$0xff] (!%p169_p3)  }
   0xb   : > { %v3216_v22 = vld [vmem:[%s4061_s1 + $0x30] sm:$0xff] (!%p169_p3)   ;;  %v3218_v24 = vld [vmem:[%s4061_s1 + $0x38] sm:$0xff] (!%p169_p3)   ;;  %v3222_v29 = vld [vmem:[%s4061_s1 + $0xc0] sm:$0xff] (!%p169_p3)  }
   0xc   : > { %2859 = vmatpush3.bf16.msra.mxu0 (!%p169_p3), %v3205_v3  ;;  %v3223_v30 = vld [vmem:[%s4061_s1 + $0x88] sm:$0xff] (!%p169_p3)   ;;  %v3225_v32 = vld [vmem:[%s4061_s1 + $0x90] sm:$0xff] (!%p169_p3)   ;;  %v3227_v34 = vld [vmem:[%s4061_s1 + $0x98] sm:$0xff] (!%p169_p3)  }
   0xd   : > { %2879 = vmatpush3.bf16.msra.mxu1 (!%p169_p3), %v3206_v4  ;;  %2860 = vmatprep.subr.bf16.mxu0 (!%p169_p3), %v3382_v1  ;;  %v3224_v31 = vld [vmem:[%s4061_s1 + $0xc8] sm:$0xff] (!%p169_p3)   ;;  %v3226_v33 = vld [vmem:[%s4061_s1 + $0xd0] sm:$0xff] (!%p169_p3)   ;;  %v3228_v36 = vld [vmem:[%s4061_s1 + $0xd8] sm:$0xff] (!%p169_p3)  }
   0xe   : > { %s4069_s12 = smov (!%p202_p4, %s3372_s12), 1  ;;  %2880 = vmatprep.subr.bf16.mxu1 %v3382_v1  ;;  %v3229_v39 = vld [vmem:[%s4061_s1 + $0xa0] sm:$0xff]   ;;  %v3231_v41 = vld [vmem:[%s4061_s1 + $0xa8] sm:$0xff]   ;;  %v3233_v47 = vld [vmem:[%s4061_s1 + $0xb0] sm:$0xff]  }
   0xf   : > { %s3176_s28 = smul.u32 24, %s4069_s12  ;;  %v3230_v40 = vld [vmem:[%s4061_s1 + $0xe0] sm:$0xff]   ;;  %v3232_v46 = vld [vmem:[%s4061_s1 + $0xe8] sm:$0xff]   ;;  %v3234_v48 = vld [vmem:[%s4061_s1 + $0xf0] sm:$0xff]   ;;  %s2711_s7 = sshll.u32 %s4069_s12, 4 }
  0x10   : > { %2861 = vmatpush3.bf16.msra.mxu0 %v3207_v5  ;;  %v3235_v53 = vld [vmem:[%s4061_s1 + $0xb8] sm:$0xff]   ;;  %v3239_v60 = vld [vmem:[%s4061_s1 + $0x100] sm:$0xff]   ;;  %v3241_v63 = vld [vmem:[%s4061_s1 + $0x108] sm:$0xff]   ;;  %s221_s11 = scalar_lea.vmem %s4063_s3, %s2711_s7 }
  0x11   : > { %2881 = vmatpush3.bf16.msra.mxu1 %v3208_v6  ;;  %2862 = vmatprep.subr.bf16.mxu0 %v3382_v1  ;;  %s3464_s8 = scalar_lea.vmem %s4060_s0, %s3176_s28  ;;  %v3236_v54 = vld [vmem:[%s4061_s1 + $0xf8] sm:$0xff]   ;;  %v3240_v62 = vld [vmem:[%s4061_s1 + $0x140] sm:$0xff]   ;;  %v3242_v0 = vld [vmem:[%s4061_s1 + $0x148] sm:$0xff]  }
  0x12   : > { %2882 = vmatprep.subr.bf16.mxu1 %v3382_v1  ;;  %v223_v11 = vld [vmem:[%s3464_s8] sm:$0xf]  ;;  %v3476_v12 = vld [vmem:[%s3464_s8 + $0x4] sm:$0xf]  ;;  %v3243_v2 = vld [vmem:[%s4061_s1 + $0x110] sm:$0xff]  }
  0x13   : > { %v2335_v14 = vcombine.low %v223_v11, %v3476_v12  ;;  %v3483_v15 = vld [vmem:[%s3464_s8 + $0x8] ss:$0 sps:$4 sm:$0x11]   ;;  %v460_v35 = vld [vmem:[%s3464_s8] sm:$0xe]  ;;  %v3244_v3 = vld [vmem:[%s4061_s1 + $0x150] sm:$0xff]  }
  0x14   : > { %2863 = vmatpush3.bf16.msra.mxu0 %v3209_v7  ;;  %v276_v21 = vshll.u32 %v3483_v15, 16  ;;  %v3238_v37 = vld [vmem:[%s3464_s8 + $0x8] ss:$0 sps:$4 sm:$0x33]   ;;  %v2369_v38 = vcombine.low %v460_v35, %v3476_v12  ;;  %v483_v56 = vrot.slane %v3483_v15, 1  ;;  %v3245_v4 = vld [vmem:[%s4061_s1 + $0x118] sm:$0xff]  }
  0x15   : > { %2883 = vmatpush3.bf16.msra.mxu1 %v3210_v8  ;;  %2864 = vmatprep.subr.bf16.mxu0 %v3382_v1  ;;  %v271_v17 = vshll.u32 %v2335_v14, 16  ;;  %v269_v19 = vshrl.u32 %v2335_v14, 16  ;;  %v608_v44 = vshrl.u32 %v3238_v37, 16  ;;  %v611_v45 = vshll.u32 %v3238_v37, 16  ;;  %v3246_v5 = vld [vmem:[%s4061_s1 + $0x158] sm:$0xff]   ;;  %v3247_v8 = vld [vmem:[%s4061_s1 + $0x120] sm:$0xff]  }
  0x16   : > { %2884 = vmatprep.subr.bf16.mxu1 %v3382_v1  ;;  %v278_v26 = vrot.slane %v276_v21, 1  ;;  %v600_v42 = vshrl.u32 %v2369_v38, 16  ;;  %v603_v43 = vshll.u32 %v2369_v38, 16  ;;  %v482_v55 = vrot.slane %v2369_v38, 1  ;;  %v821_v6 = vld [vmem:[%s3464_s8 + $0x4] sm:$0xf] }
  0x17   : > { %v273_v20 = vrot.slane %v271_v17, 1  ;;  %v610_v51 = vrot.slane %v608_v44, 1  ;;  %v613_v52 = vrot.slane %v611_v45, 2  ;;  %v3620_v7 = vld [vmem:[%s3464_s8 + $0x8] sm:$0xf]  ;;  %v3252_v17 = vld [vmem:[%s4061_s1 + $0x170] sm:$0xff]  }
  0x18   : > { %2865 = vmatpush3.bf16.msra.mxu0 %v3211_v9  ;;  %v602_v49 = vrot.slane %v600_v42, 1  ;;  %v605_v50 = vrot.slane %v603_v43, 2  ;;  %v484_v59 = vsel %vm481_vm2, %v482_v55, %v483_v56  ;;  %v3248_v9 = vld [vmem:[%s4061_s1 + $0x160] sm:$0xff]   ;;  %v3632_v11 = vld [vmem:[%s3464_s8 + $0xc] ss:$0 sps:$4 sm:$0x11]  }
  0x19   : > { %2885 = vmatpush3.bf16.msra.mxu1 %v3212_v10  ;;  %2866 = vmatprep.subr.bf16.mxu0 %v3382_v1  ;;  %v274_v25 = vor.u32 %v273_v20, %v269_v19  ;;  %v614_v58 = vor.u32 %v613_v52, %v610_v51  ;;  %v2444_v10 = vcombine.low %v821_v6, %v3620_v7  ;;  %v3253_v21 = vld [vmem:[%s4061_s1 + $0x138] sm:$0xff]   ;;  %v953_v35 = vld [vmem:[%s3464_s8 + $0x4] sm:$0xe]  ;;  %v975_v52 = vrot.slane %v3632_v11, 1  ;;  %v3774_v6 = vld [vmem:[%s3464_s8 + $0xc] sm:$0xf] }
  0x1a   : > { %2886 = vmatprep.subr.bf16.mxu1 %v3382_v1  ;;  %v606_v57 = vor.u32 %v605_v50, %v602_v49  ;;  %v2470_v37 = vcombine.low %v953_v35, %v3620_v7  ;;  %v3267_v38 = vld [vmem:[%s4061_s1 + $0x1e0] sm:$0xff]   ;;  %v3273_v55 = vld [vmem:[%s4061_s1 + $0x1f8] sm:$0xff]  }
  0x1b   : > { %v279_v27 = vsel %vm267_vm1, %v274_v25, %v278_v26  ;;  %v852_v15 = vshll.u32 %v2444_v10, 16  ;;  %v850_v19 = vshrl.u32 %v2444_v10, 16  ;;  %v3303_v35 = vld [vmem:[%s4061_s1 + $0x2a0] sm:$0xff]  }
  0x1c   : > { %2867 = vmatpush3.bf16.msra.mxu0 %v3213_v13  ;;  %v615_v61 = vsel %vm598_vm3, %v606_v57, %v614_v58  ;;  %v3249_v13 = vld [vmem:[%s4061_s1 + $0x128] sm:$0xff]   ;;  %v1091_v42 = vshrl.u32 %v2470_v37, 16  ;;  %v1094_v43 = vshll.u32 %v2470_v37, 16 }
  0x1d   : > { %2887 = vmatpush3.bf16.msra.mxu1 %v3214_v16  ;;  %2868 = vmatprep.subr.bf16.mxu0 %v3382_v1  ;;  %v3251_v16 = vld [vmem:[%s4061_s1 + $0x130] sm:$0xff]   ;;  %v854_v20 = vrot.slane %v852_v15, 1 }
  0x1e   : > { %2888 = vmatprep.subr.bf16.mxu1 %v3382_v1  ;;  %v1096_v49 = vrot.slane %v1094_v43, 2 }
  0x1f   : > { %v855_v25 = vor.u32 %v854_v20, %v850_v19 }
  0x20   : > { %2869 = vmatpush3.bf16.msra.mxu0 %v3215_v18  ;;  %v857_v18 = vshll.u32 %v3632_v11, 16  ;;  %v3286_v11 = vld [vmem:[%s4061_s1 + $0x228] sm:$0xff]  }
  0x21   : > { %2889 = vmatpush3.bf16.msra.mxu1 %v3216_v22  ;;  %2870 = vmatprep.subr.bf16.mxu0 %v3382_v1  ;;  %v3254_v22 = vld [vmem:[%s4061_s1 + $0x178] sm:$0xff]  }
  0x22   : > { %2890 = vmatprep.subr.bf16.mxu1 %v3382_v1 }
  0x24   : > { %2871 = vmatpush3.bf16.msra.mxu0 %v3217_v23  ;;  %v708_v23 = vld [vmem:[%s3464_s8 + $0x8] sm:$0xf] }
  0x25   : > { %2891 = vmatpush3.bf16.msra.mxu1 %v3218_v24  ;;  %2896 = vmatprep.subr.bf16.mxu0 %v3382_v1  ;;  %v859_v24 = vrot.slane %v857_v18, 1  ;;  %v2419_v26 = vcombine.low %v3476_v12, %v708_v23  ;;  %v3260_v12 = vld [vmem:[%s4061_s1 + $0x188] sm:$0xff]   ;;  %v3291_v23 = vld [vmem:[%s4061_s1 + $0x278] sm:$0xff]  }
  0x26   : > { %2916 = vmatprep.subr.bf16.mxu1 %v3382_v1 }
  0x27   : > { %2873 = vmatmul.mubr.bf16.vlgmr.msra.gmra.mrb[0].mxu0 %v279_v27  ;;  %v3258_v27 = vld [vmem:[%s4061_s1 + $0x180] sm:$0xff]  }
  0x28   : > { %2893 = vmatmul.mubr.bf16.vlgmr.msra.gmra.mrb[0].mxu1 %v2335_v14  ;;  %2897 = vmatpush3.bf16.msra.mxu0 %v3221_v28  ;;  %v3250_v14 = vld [vmem:[%s4061_s1 + $0x168] sm:$0xff]   ;;  %v3259_v28 = vld [vmem:[%s4061_s1 + $0x1c0] sm:$0xff]  }
  0x29   : > { %2917 = vmatpush3.bf16.msra.mxu1 %v3222_v29  ;;  %2898 = vmatprep.subr.bf16.mxu0 %v3382_v1  ;;  %v860_v29 = vsel %vm267_vm1, %v855_v25, %v859_v24 }
  0x2a   : > { %2918 = vmatprep.subr.bf16.mxu1 %v3382_v1  ;;  %2912 = vmatprep.mubr.msk.bf16.mxu0 %vm3383_vm0, %v3382_v1 }
  0x2b   : > { %2932 = vmatprep.mubr.msk.bf16.mxu1 %vm3383_vm0, %v3382_v1 }
  0x2c   : > { %2899 = vmatpush3.bf16.msra.mxu0 %v3223_v30  ;;  %v3261_v30 = vld [vmem:[%s4061_s1 + $0x1c8] sm:$0xff]  }
  0x2d   : > { %2919 = vmatpush3.bf16.msra.mxu1 %v3224_v31  ;;  %2900 = vmatprep.subr.bf16.mxu0 %v3382_v1  ;;  %v3262_v31 = vld [vmem:[%s4061_s1 + $0x190] sm:$0xff]  }
  0x2e   : > { %2920 = vmatprep.subr.bf16.mxu1 %v3382_v1 }
  0x30   : > { %2901 = vmatpush3.bf16.msra.mxu0 %v3225_v32  ;;  %v3263_v32 = vld [vmem:[%s4061_s1 + $0x1d0] sm:$0xff]  }
  0x31   : > { %2921 = vmatpush3.bf16.msra.mxu1 %v3226_v33  ;;  %2902 = vmatprep.subr.bf16.mxu0 %v3382_v1  ;;  %v3264_v33 = vld [vmem:[%s4061_s1 + $0x198] sm:$0xff]  }
  0x32   : > { %2922 = vmatprep.subr.bf16.mxu1 %v3382_v1 }
  0x34   : > { %2903 = vmatpush3.bf16.msra.mxu0 %v3227_v34  ;;  %v3265_v34 = vld [vmem:[%s4061_s1 + $0x1d8] sm:$0xff]  }
  0x35   : > { %2923 = vmatpush3.bf16.msra.mxu1 %v3228_v36  ;;  %2904 = vmatprep.subr.bf16.mxu0 %v3382_v1  ;;  %v3266_v36 = vld [vmem:[%s4061_s1 + $0x1a0] sm:$0xff]  }
  0x36   : > { %2924 = vmatprep.subr.bf16.mxu1 %v3382_v1 }
  0x38   : > { %2905 = vmatpush3.bf16.msra.mxu0 %v3229_v39  ;;  %v3275_v39 = vld [vmem:[%s3464_s8 + $0xc] ss:$0 sps:$4 sm:$0x33]  }
  0x39   : > { %2925 = vmatpush3.bf16.msra.mxu1 %v3230_v40  ;;  %2906 = vmatprep.subr.bf16.mxu0 %v3382_v1  ;;  %v3268_v40 = vld [vmem:[%s4061_s1 + $0x1a8] sm:$0xff]   ;;  %v1099_v44 = vshrl.u32 %v3275_v39, 16  ;;  %v1102_v45 = vshll.u32 %v3275_v39, 16 }
  0x3a   : > { %2926 = vmatprep.subr.bf16.mxu1 %v3382_v1  ;;  %v3305_v39 = vld [vmem:[%s4061_s1 + $0x2a8] sm:$0xff]  }
  0x3b   : > { %v1101_v50 = vrot.slane %v1099_v44, 1  ;;  %v1104_v51 = vrot.slane %v1102_v45, 2  ;;  %v3307_v45 = vld [vmem:[%s4061_s1 + $0x2b0] sm:$0xff]  }
  0x3c   : > { %2907 = vmatpush3.bf16.msra.mxu0 %v3231_v41  ;;  %v3269_v41 = vld [vmem:[%s4061_s1 + $0x1e8] sm:$0xff]  }
  0x3d   : > { %2927 = vmatpush3.bf16.msra.mxu1 %v3232_v46  ;;  %2908 = vmatprep.subr.bf16.mxu0 %v3382_v1  ;;  %v3270_v46 = vld [vmem:[%s4061_s1 + $0x1b0] sm:$0xff]   ;;  %v1105_v57 = vor.u32 %v1104_v51, %v1101_v50  ;;  %v3309_v51 = vld [vmem:[%s4061_s1 + $0x2b8] sm:$0xff]  }
  0x3e   : > { %2928 = vmatprep.subr.bf16.mxu1 %v3382_v1 }
  0x40   : > { %2909 = vmatpush3.bf16.msra.mxu0 %v3233_v47  ;;  %v3271_v47 = vld [vmem:[%s4061_s1 + $0x1f0] sm:$0xff]  }
  0x41   : > { %2929 = vmatpush3.bf16.msra.mxu1 %v3234_v48  ;;  %2910 = vmatprep.subr.bf16.mxu0 %v3382_v1  ;;  %v1093_v48 = vrot.slane %v1091_v42, 1 }
  0x42   : > { %2930 = vmatprep.subr.bf16.mxu1 %v3382_v1 }
  0x43   : > { %v1097_v56 = vor.u32 %v1096_v49, %v1093_v48 }
  0x44   : > { %2911 = vmatpush3.bf16.msra.mxu0 %v3235_v53  ;;  %v3272_v53 = vld [vmem:[%s4061_s1 + $0x1b8] sm:$0xff]  }
  0x45   : > { %2931 = vmatpush3.bf16.msra.mxu1 %v3236_v54  ;;  %2936 = vmatprep.subr.bf16.mxu0 %v3382_v1  ;;  %v974_v54 = vrot.slane %v2470_v37, 1 }
  0x46   : > { %2956 = vmatprep.subr.bf16.mxu1 %v3382_v1 }
  0x47   : > { %2913 = vmatmul.mubr.bf16.vlgmr.msra.gmra.mrb[4].mxu0 %v484_v59  ;;  %v976_v58 = vsel %vm481_vm2, %v974_v54, %v975_v52  ;;  %v3276_v59 = vld [vmem:[%s4061_s1 + $0x200] sm:$0xff]   ;;  %v3310_v54 = vld [vmem:[%s4061_s1 + $0x2f8] sm:$0xff]  }
  0x48   : > { %2933 = vmatmul.mubr.bf16.vlgmr.msra.gmra.mrb[4].mxu1 %v615_v61  ;;  %2937 = vmatpush3.bf16.msra.mxu0 %v3239_v60  ;;  %v3277_v60 = vld [vmem:[%s4061_s1 + $0x240] sm:$0xff]   ;;  %v1106_v61 = vsel %vm598_vm3, %v1097_v56, %v1105_v57 }
  0x49   : > { %2957 = vmatpush3.bf16.msra.mxu1 %v3240_v62  ;;  %2938 = vmatprep.subr.bf16.mxu0 %v3382_v1  ;;  %v3278_v62 = vld [vmem:[%s4061_s1 + $0x208] sm:$0xff]  }
  0x4a   : > { %2958 = vmatprep.subr.bf16.mxu1 %v3382_v1  ;;  %2952 = vmatprep.mubr.msk.bf16.mxu0 %vm3383_vm0, %v3382_v1 }
  0x4b   : > { %2972 = vmatprep.mubr.msk.bf16.mxu1 %vm3383_vm0, %v3382_v1 }
  0x4c   : > { %2939 = vmatpush3.bf16.msra.mxu0 %v3241_v63  ;;  %v3279_v63 = vld [vmem:[%s4061_s1 + $0x248] sm:$0xff]  }
  0x4d   : > { %2959 = vmatpush3.bf16.msra.mxu1 %v3242_v0  ;;  %2940 = vmatprep.subr.bf16.mxu0 %v3382_v1  ;;  %v3280_v0 = vld [vmem:[%s4061_s1 + $0x210] sm:$0xff]  }
  0x4e   : > { %2960 = vmatprep.subr.bf16.mxu1 %v3382_v1 }
  0x50   : > { %2941 = vmatpush3.bf16.msra.mxu0 %v3243_v2  ;;  %v3281_v2 = vld [vmem:[%s4061_s1 + $0x250] sm:$0xff]  }
  0x51   : > { %2961 = vmatpush3.bf16.msra.mxu1 %v3244_v3  ;;  %2942 = vmatprep.subr.bf16.mxu0 %v3382_v1  ;;  %v3282_v3 = vld [vmem:[%s4061_s1 + $0x218] sm:$0xff]  }
  0x52   : > { %2962 = vmatprep.subr.bf16.mxu1 %v3382_v1 }
  0x54   : > { %2943 = vmatpush3.bf16.msra.mxu0 %v3245_v4  ;;  %v3283_v4 = vld [vmem:[%s4061_s1 + $0x258] sm:$0xff]  }
  0x55   : > { %2963 = vmatpush3.bf16.msra.mxu1 %v3246_v5  ;;  %2944 = vmatprep.subr.bf16.mxu0 %v3382_v1  ;;  %v1312_v5 = vld [vmem:[%s3464_s8 + $0x8] sm:$0xf] }
  0x56   : > { %2964 = vmatprep.subr.bf16.mxu1 %v3382_v1  ;;  %v2545_v10 = vcombine.low %v1312_v5, %v3774_v6  ;;  %v3928_v5 = vld [vmem:[%s3464_s8 + $0x10] sm:$0xf] }
  0x58   : > { %2945 = vmatpush3.bf16.msra.mxu0 %v3247_v8  ;;  %v3284_v8 = vld [vmem:[%s4061_s1 + $0x220] sm:$0xff]   ;;  %v1343_v15 = vshll.u32 %v2545_v10, 16  ;;  %v1341_v18 = vshrl.u32 %v2545_v10, 16 }
  0x59   : > { %2965 = vmatpush3.bf16.msra.mxu1 %v3248_v9  ;;  %2946 = vmatprep.subr.bf16.mxu0 %v3382_v1  ;;  %v3285_v9 = vld [vmem:[%s4061_s1 + $0x260] sm:$0xff]  }
  0x5a   : > { %2966 = vmatprep.subr.bf16.mxu1 %v3382_v1  ;;  %v1345_v19 = vrot.slane %v1343_v15, 1 }
  0x5c   : > { %2947 = vmatpush3.bf16.msra.mxu0 %v3249_v13  ;;  %v3287_v13 = vld [vmem:[%s4061_s1 + $0x268] sm:$0xff]   ;;  %v1346_v24 = vor.u32 %v1345_v19, %v1341_v18 }
  0x5d   : > { %2967 = vmatpush3.bf16.msra.mxu1 %v3250_v14  ;;  %2948 = vmatprep.subr.bf16.mxu0 %v3382_v1  ;;  %v3793_v14 = vld [vmem:[%s3464_s8 + $0x10] ss:$0 sps:$4 sm:$0x11]  }
  0x5e   : > { %2968 = vmatprep.subr.bf16.mxu1 %v3382_v1  ;;  %v1348_v20 = vshll.u32 %v3793_v14, 16 }
  0x60   : > { %2949 = vmatpush3.bf16.msra.mxu0 %v3251_v16  ;;  %v3288_v16 = vld [vmem:[%s4061_s1 + $0x230] sm:$0xff]   ;;  %v1350_v25 = vrot.slane %v1348_v20, 1 }
  0x61   : > { %2969 = vmatpush3.bf16.msra.mxu1 %v3252_v17  ;;  %2950 = vmatprep.subr.bf16.mxu0 %v3382_v1  ;;  %v3289_v17 = vld [vmem:[%s4061_s1 + $0x270] sm:$0xff]  }
  0x62   : > { %2970 = vmatprep.subr.bf16.mxu1 %v3382_v1 }
  0x64   : > { %2951 = vmatpush3.bf16.msra.mxu0 %v3253_v21  ;;  %v3290_v21 = vld [vmem:[%s4061_s1 + $0x238] sm:$0xff]  }
  0x65   : > { %2971 = vmatpush3.bf16.msra.mxu1 %v3254_v22  ;;  %2976 = vmatprep.subr.bf16.mxu0 %v3382_v1  ;;  %v1199_v22 = vld [vmem:[%s3464_s8 + $0xc] sm:$0xf] }
  0x66   : > { %2996 = vmatprep.subr.bf16.mxu1 %v3382_v1 }
  0x67   : > { %2953 = vmatmul.mubr.bf16.vlgmr.msra.gmra.mrb[8].mxu0 %v2419_v26  ;;  %v2520_v26 = vcombine.low %v3620_v7, %v1199_v22  ;;  %v3297_v7 = vld [vmem:[%s4061_s1 + $0x288] sm:$0xff]   ;;  %v1690_v22 = vld [vmem:[%s3464_s8 + $0x10] sm:$0xf] }
  0x68   : > { %2973 = vmatmul.mubr.bf16.vlgmr.msra.gmra.mrb[8].mxu1 %v860_v29  ;;  %2977 = vmatpush3.bf16.msra.mxu0 %v3258_v27  ;;  %v3295_v27 = vld [vmem:[%s4061_s1 + $0x280] sm:$0xff]  }
  0x69   : > { %2997 = vmatpush3.bf16.msra.mxu1 %v3259_v28  ;;  %2978 = vmatprep.subr.bf16.mxu0 %v3382_v1  ;;  %v1351_v28 = vsel %vm267_vm1, %v1346_v24, %v1350_v25  ;;  %v3296_v29 = vld [vmem:[%s4061_s1 + $0x2c0] sm:$0xff]  }
  0x6a   : > { %2998 = vmatprep.subr.bf16.mxu1 %v3382_v1  ;;  %2992 = vmatprep.mubr.msk.bf16.mxu0 %vm3383_vm0, %v3382_v1 }
  0x6b   : > { %3012 = vmatprep.mubr.msk.bf16.mxu1 %vm3383_vm0, %v3382_v1 }
  0x6c   : > { %2979 = vmatpush3.bf16.msra.mxu0 %v3260_v12  ;;  %v3298_v12 = vld [vmem:[%s4061_s1 + $0x2c8] sm:$0xff]  }
  0x6d   : > { %2999 = vmatpush3.bf16.msra.mxu1 %v3261_v30  ;;  %2980 = vmatprep.subr.bf16.mxu0 %v3382_v1  ;;  %v3299_v30 = vld [vmem:[%s4061_s1 + $0x290] sm:$0xff]  }
  0x6e   : > { %3000 = vmatprep.subr.bf16.mxu1 %v3382_v1 }
  0x70   : > { %2981 = vmatpush3.bf16.msra.mxu0 %v3262_v31  ;;  %v3300_v31 = vld [vmem:[%s4061_s1 + $0x2d0] sm:$0xff]  }
  0x71   : > { %3001 = vmatpush3.bf16.msra.mxu1 %v3263_v32  ;;  %2982 = vmatprep.subr.bf16.mxu0 %v3382_v1  ;;  %v3301_v32 = vld [vmem:[%s4061_s1 + $0x298] sm:$0xff]  }
  0x72   : > { %3002 = vmatprep.subr.bf16.mxu1 %v3382_v1 }
  0x74   : > { %2983 = vmatpush3.bf16.msra.mxu0 %v3264_v33  ;;  %v3302_v33 = vld [vmem:[%s4061_s1 + $0x2d8] sm:$0xff]  }
  0x75   : > { %3003 = vmatpush3.bf16.msra.mxu1 %v3265_v34  ;;  %2984 = vmatprep.subr.bf16.mxu0 %v3382_v1  ;;  %v1444_v34 = vld [vmem:[%s3464_s8 + $0x8] sm:$0xe] }
  0x76   : > { %3004 = vmatprep.subr.bf16.mxu1 %v3382_v1  ;;  %v2571_v37 = vcombine.low %v1444_v34, %v3774_v6  ;;  %v3340_v34 = vld [vmem:[%s4061_s1 + $0x3a0] sm:$0xff]  }
  0x78   : > { %2985 = vmatpush3.bf16.msra.mxu0 %v3266_v36  ;;  %v3304_v36 = vld [vmem:[%s4061_s1 + $0x2e0] sm:$0xff]   ;;  %v1585_v42 = vshll.u32 %v2571_v37, 16  ;;  %v1465_v52 = vrot.slane %v2571_v37, 1 }
  0x79   : > { %3005 = vmatpush3.bf16.msra.mxu1 %v3267_v38  ;;  %2986 = vmatprep.subr.bf16.mxu0 %v3382_v1  ;;  %v3312_v38 = vld [vmem:[%s3464_s8 + $0x10] ss:$0 sps:$4 sm:$0x33]  }
  0x7a   : > { %3006 = vmatprep.subr.bf16.mxu1 %v3382_v1  ;;  %v1590_v43 = vshrl.u32 %v3312_v38, 16  ;;  %v1593_v44 = vshll.u32 %v3312_v38, 16  ;;  %v1587_v48 = vrot.slane %v1585_v42, 2  ;;  %v3342_v38 = vld [vmem:[%s4061_s1 + $0x3a8] sm:$0xff]  }
  0x7c   : > { %2987 = vmatpush3.bf16.msra.mxu0 %v3268_v40  ;;  %v3306_v40 = vld [vmem:[%s4061_s1 + $0x2e8] sm:$0xff]   ;;  %v1592_v49 = vrot.slane %v1590_v43, 1  ;;  %v1595_v50 = vrot.slane %v1593_v44, 2 }
  0x7d   : > { %3007 = vmatpush3.bf16.msra.mxu1 %v3269_v41  ;;  %2988 = vmatprep.subr.bf16.mxu0 %v3382_v1  ;;  %v1582_v41 = vshrl.u32 %v2571_v37, 16  ;;  %v3349_v37 = vld [vmem:[%s3464_s8 + $0x14] ss:$0 sps:$4 sm:$0x33]  }
  0x7e   : > { %3008 = vmatprep.subr.bf16.mxu1 %v3382_v1  ;;  %v1596_v56 = vor.u32 %v1595_v50, %v1592_v49  ;;  %v2081_v42 = vshrl.u32 %v3349_v37, 16  ;;  %v2084_v43 = vshll.u32 %v3349_v37, 16  ;;  %v3344_v50 = vld [vmem:[%s4061_s1 + $0x3b0] sm:$0xff]  }
  0x80   : > { %2989 = vmatpush3.bf16.msra.mxu0 %v3270_v46  ;;  %v3308_v46 = vld [vmem:[%s4061_s1 + $0x2f0] sm:$0xff]  }
  0x81   : > { %3009 = vmatpush3.bf16.msra.mxu1 %v3271_v47  ;;  %2990 = vmatprep.subr.bf16.mxu0 %v3382_v1  ;;  %v1584_v47 = vrot.slane %v1582_v41, 1 }
  0x82   : > { %3010 = vmatprep.subr.bf16.mxu1 %v3382_v1 }
  0x84   : > { %2991 = vmatpush3.bf16.msra.mxu0 %v3272_v53  ;;  %v1466_v53 = vrot.slane %v3793_v14, 1  ;;  %v3947_v14 = vld [vmem:[%s3464_s8 + $0x14] ss:$0 sps:$4 sm:$0x11]  }
  0x85   : > { %3011 = vmatpush3.bf16.msra.mxu1 %v3273_v55  ;;  %3016 = vmatprep.subr.bf16.mxu0 %v3382_v1  ;;  %v1588_v55 = vor.u32 %v1587_v48, %v1584_v47  ;;  %v1839_v20 = vshll.u32 %v3947_v14, 16 }
  0x86   : > { %3036 = vmatprep.subr.bf16.mxu1 %v3382_v1  ;;  %v1467_v57 = vsel %vm481_vm2, %v1465_v52, %v1466_v53 }
  0x87   : > { %2993 = vmatmul.mubr.bf16.vlgmr.msra.gmra.mrb[12].mxu0 %v976_v58  ;;  %v3313_v58 = vld [vmem:[%s4061_s1 + $0x300] sm:$0xff]   ;;  %v1841_v25 = vrot.slane %v1839_v20, 1 }
  0x88   : > { %3013 = vmatmul.mubr.bf16.vlgmr.msra.gmra.mrb[12].mxu1 %v1106_v61  ;;  %3017 = vmatpush3.bf16.msra.mxu0 %v3276_v59  ;;  %v1597_v59 = vsel %vm598_vm3, %v1588_v55, %v1596_v56  ;;  %v3315_v61 = vld [vmem:[%s4061_s1 + $0x308] sm:$0xff]   ;;  %v2083_v56 = vrot.slane %v2081_v42, 1 }
  0x89   : > { %3037 = vmatpush3.bf16.msra.mxu1 %v3277_v60  ;;  %3018 = vmatprep.subr.bf16.mxu0 %v3382_v1  ;;  %v3314_v60 = vld [vmem:[%s4061_s1 + $0x340] sm:$0xff]  }
  0x8a   : > { %3038 = vmatprep.subr.bf16.mxu1 %v3382_v1  ;;  %3032 = vmatprep.mubr.msk.bf16.mxu0 %vm3383_vm0, %v3382_v1 }
  0x8b   : > { %3052 = vmatprep.mubr.msk.bf16.mxu1 %vm3383_vm0, %v3382_v1 }
  0x8c   : > { %3019 = vmatpush3.bf16.msra.mxu0 %v3278_v62  ;;  %v3316_v62 = vld [vmem:[%s4061_s1 + $0x348] sm:$0xff]  }
  0x8d   : > { %3039 = vmatpush3.bf16.msra.mxu1 %v3279_v63  ;;  %3020 = vmatprep.subr.bf16.mxu0 %v3382_v1  ;;  %v3317_v63 = vld [vmem:[%s4061_s1 + $0x310] sm:$0xff]  }
  0x8e   : > { %3040 = vmatprep.subr.bf16.mxu1 %v3382_v1 }
  0x90   : > { %3021 = vmatpush3.bf16.msra.mxu0 %v3280_v0  ;;  %v3318_v0 = vld [vmem:[%s4061_s1 + $0x350] sm:$0xff]  }
  0x91   : > { %3041 = vmatpush3.bf16.msra.mxu1 %v3281_v2  ;;  %3022 = vmatprep.subr.bf16.mxu0 %v3382_v1  ;;  %v3319_v2 = vld [vmem:[%s4061_s1 + $0x318] sm:$0xff]  }
  0x92   : > { %3042 = vmatprep.subr.bf16.mxu1 %v3382_v1 }
  0x94   : > { %3023 = vmatpush3.bf16.msra.mxu0 %v3282_v3  ;;  %v3320_v3 = vld [vmem:[%s4061_s1 + $0x358] sm:$0xff]  }
  0x95   : > { %3043 = vmatpush3.bf16.msra.mxu1 %v3283_v4  ;;  %3024 = vmatprep.subr.bf16.mxu0 %v3382_v1  ;;  %v1803_v4 = vld [vmem:[%s3464_s8 + $0xc] sm:$0xf] }
  0x96   : > { %3044 = vmatprep.subr.bf16.mxu1 %v3382_v1  ;;  %v2646_v10 = vcombine.low %v1803_v4, %v3928_v5 }
  0x98   : > { %3025 = vmatpush3.bf16.msra.mxu0 %v3284_v8  ;;  %v3321_v8 = vld [vmem:[%s4061_s1 + $0x320] sm:$0xff]   ;;  %v1834_v15 = vshll.u32 %v2646_v10, 16  ;;  %v1832_v18 = vshrl.u32 %v2646_v10, 16 }
  0x99   : > { %3045 = vmatpush3.bf16.msra.mxu1 %v3285_v9  ;;  %3026 = vmatprep.subr.bf16.mxu0 %v3382_v1  ;;  %v3322_v9 = vld [vmem:[%s4061_s1 + $0x360] sm:$0xff]  }
  0x9a   : > { %3046 = vmatprep.subr.bf16.mxu1 %v3382_v1  ;;  %v1836_v19 = vrot.slane %v1834_v15, 1 }
  0x9c   : > { %3027 = vmatpush3.bf16.msra.mxu0 %v3286_v11  ;;  %v3323_v11 = vld [vmem:[%s4061_s1 + $0x328] sm:$0xff]   ;;  %v1837_v24 = vor.u32 %v1836_v19, %v1832_v18 }
  0x9d   : > { %3047 = vmatpush3.bf16.msra.mxu1 %v3287_v13  ;;  %3028 = vmatprep.subr.bf16.mxu0 %v3382_v1  ;;  %v3324_v13 = vld [vmem:[%s4061_s1 + $0x368] sm:$0xff]  }
  0x9e   : > { %3048 = vmatprep.subr.bf16.mxu1 %v3382_v1 }
  0xa0   : > { %3029 = vmatpush3.bf16.msra.mxu0 %v3288_v16  ;;  %v3325_v16 = vld [vmem:[%s4061_s1 + $0x330] sm:$0xff]  }
  0xa1   : > { %3049 = vmatpush3.bf16.msra.mxu1 %v3289_v17  ;;  %3030 = vmatprep.subr.bf16.mxu0 %v3382_v1  ;;  %v3326_v17 = vld [vmem:[%s4061_s1 + $0x370] sm:$0xff]  }
  0xa2   : > { %3050 = vmatprep.subr.bf16.mxu1 %v3382_v1 }
  0xa4   : > { %3031 = vmatpush3.bf16.msra.mxu0 %v3290_v21  ;;  %v3327_v21 = vld [vmem:[%s4061_s1 + $0x338] sm:$0xff]  }
  0xa5   : > { %3051 = vmatpush3.bf16.msra.mxu1 %v3291_v23  ;;  %3056 = vmatprep.subr.bf16.mxu0 %v3382_v1  ;;  %v3328_v23 = vld [vmem:[%s4061_s1 + $0x378] sm:$0xff]  }
  0xa6   : > { %3076 = vmatprep.subr.bf16.mxu1 %v3382_v1 }
  0xa7   : > { %3033 = vmatmul.mubr.bf16.vlgmr.msra.gmra.mrb[16].mxu0 %v2520_v26  ;;  %v2621_v26 = vcombine.low %v3774_v6, %v1690_v22  ;;  %v3334_v6 = vld [vmem:[%s4061_s1 + $0x388] sm:$0xff]  }
  0xa8   : > { %3053 = vmatmul.mubr.bf16.vlgmr.msra.gmra.mrb[16].mxu1 %v1351_v28  ;;  %3057 = vmatpush3.bf16.msra.mxu0 %v3295_v27  ;;  %v3332_v27 = vld [vmem:[%s4061_s1 + $0x380] sm:$0xff]   ;;  %v1842_v28 = vsel %vm267_vm1, %v1837_v24, %v1841_v25 }
  0xa9   : > { %3077 = vmatpush3.bf16.msra.mxu1 %v3296_v29  ;;  %3058 = vmatprep.subr.bf16.mxu0 %v3382_v1  ;;  %v3333_v29 = vld [vmem:[%s4061_s1 + $0x3c0] sm:$0xff]  }
  0xaa   : > { %3078 = vmatprep.subr.bf16.mxu1 %v3382_v1  ;;  %3072 = vmatprep.mubr.msk.bf16.mxu0 %vm3383_vm0, %v3382_v1 }
  0xab   : > { %3092 = vmatprep.mubr.msk.bf16.mxu1 %vm3383_vm0, %v3382_v1 }
  0xac   : > { %3059 = vmatpush3.bf16.msra.mxu0 %v3297_v7  ;;  %v3335_v7 = vld [vmem:[%s4061_s1 + $0x3c8] sm:$0xff]  }
  0xad   : > { %3079 = vmatpush3.bf16.msra.mxu1 %v3298_v12  ;;  %3060 = vmatprep.subr.bf16.mxu0 %v3382_v1  ;;  %v3336_v12 = vld [vmem:[%s4061_s1 + $0x390] sm:$0xff]  }
  0xae   : > { %3080 = vmatprep.subr.bf16.mxu1 %v3382_v1 }
  0xb0   : > { %3061 = vmatpush3.bf16.msra.mxu0 %v3299_v30  ;;  %v3337_v30 = vld [vmem:[%s4061_s1 + $0x3d0] sm:$0xff]  }
  0xb1   : > { %3081 = vmatpush3.bf16.msra.mxu1 %v3300_v31  ;;  %3062 = vmatprep.subr.bf16.mxu0 %v3382_v1  ;;  %v3338_v31 = vld [vmem:[%s4061_s1 + $0x398] sm:$0xff]  }
  0xb2   : > { %3082 = vmatprep.subr.bf16.mxu1 %v3382_v1 }
  0xb4   : > { %3063 = vmatpush3.bf16.msra.mxu0 %v3301_v32  ;;  %v3339_v32 = vld [vmem:[%s4061_s1 + $0x3d8] sm:$0xff]  }
  0xb5   : > { %3083 = vmatpush3.bf16.msra.mxu1 %v3302_v33  ;;  %3064 = vmatprep.subr.bf16.mxu0 %v3382_v1  ;;  %v1935_v33 = vld [vmem:[%s3464_s8 + $0xc] sm:$0xe] }
  0xb6   : > { %3084 = vmatprep.subr.bf16.mxu1 %v3382_v1 }
  0xb8   : > { %3065 = vmatpush3.bf16.msra.mxu0 %v3303_v35  ;;  %v3341_v35 = vld [vmem:[%s4061_s1 + $0x3e0] sm:$0xff]  }
  0xb9   : > { %3085 = vmatpush3.bf16.msra.mxu1 %v3304_v36  ;;  %3066 = vmatprep.subr.bf16.mxu0 %v3382_v1  ;;  %v2672_v36 = vcombine.low %v1935_v33, %v3928_v5 }
  0xba   : > { %3086 = vmatprep.subr.bf16.mxu1 %v3382_v1 }
  0xbb   : > { %v2076_v41 = vshll.u32 %v2672_v36, 16 }
  0xbc   : > { %3067 = vmatpush3.bf16.msra.mxu0 %v3305_v39  ;;  %v3343_v39 = vld [vmem:[%s4061_s1 + $0x3e8] sm:$0xff]  }
  0xbd   : > { %3087 = vmatpush3.bf16.msra.mxu1 %v3306_v40  ;;  %3068 = vmatprep.subr.bf16.mxu0 %v3382_v1  ;;  %v2073_v40 = vshrl.u32 %v2672_v36, 16  ;;  %v2078_v55 = vrot.slane %v2076_v41, 2 }
  0xbe   : > { %3088 = vmatprep.subr.bf16.mxu1 %v3382_v1 }
  0xc0   : > { %3069 = vmatpush3.bf16.msra.mxu0 %v3307_v45 }
  0xc1   : > { %3089 = vmatpush3.bf16.msra.mxu1 %v3308_v46  ;;  %3070 = vmatprep.subr.bf16.mxu0 %v3382_v1 }
  0xc2   : > { %3090 = vmatprep.subr.bf16.mxu1 %v3382_v1 }
  0xc4   : > { %3071 = vmatpush3.bf16.msra.mxu0 %v3309_v51  ;;  %v3345_v51 = vld [vmem:[%s4061_s1 + $0x3f0] sm:$0xff]  }
  0xc5   : > { %3091 = vmatpush3.bf16.msra.mxu1 %v3310_v54  ;;  %3096 = vmatprep.subr.bf16.mxu0 %v3382_v1  ;;  %v2075_v54 = vrot.slane %v2073_v40, 1 }
  0xc6   : > { %3116 = vmatprep.subr.bf16.mxu1 %v3382_v1 }
  0xc7   : > { %3073 = vmatmul.mubr.bf16.vlgmr.msra.gmra.mrb[20].mxu0 %v1467_v57  ;;  %v2086_v57 = vrot.slane %v2084_v43, 2 }
  0xc8   : > { %3093 = vmatmul.mubr.bf16.vlgmr.msra.gmra.mrb[20].mxu1 %v1597_v59  ;;  %3097 = vmatpush3.bf16.msra.mxu0 %v3313_v58 }
  0xc9   : > { %3117 = vmatpush3.bf16.msra.mxu1 %v3314_v60  ;;  %3098 = vmatprep.subr.bf16.mxu0 %v3382_v1  ;;  %v3346_v60 = vld [vmem:[%s4061_s1 + $0x3b8] sm:$0xff]  }
  0xca   : > { %3118 = vmatprep.subr.bf16.mxu1 %v3382_v1  ;;  %3112 = vmatprep.mubr.msk.bf16.mxu0 %vm3383_vm0, %v3382_v1 }
  0xcb   : > { %3132 = vmatprep.mubr.msk.bf16.mxu1 %vm3383_vm0, %v3382_v1 }
  0xcc   : > { %3099 = vmatpush3.bf16.msra.mxu0 %v3315_v61  ;;  %v1956_v61 = vrot.slane %v2672_v36, 1 }
  0xcd   : > { %3119 = vmatpush3.bf16.msra.mxu1 %v3316_v62  ;;  %3100 = vmatprep.subr.bf16.mxu0 %v3382_v1  ;;  %v1957_v62 = vrot.slane %v3947_v14, 1 }
  0xce   : > { %3120 = vmatprep.subr.bf16.mxu1 %v3382_v1 }
  0xd0   : > { %3101 = vmatpush3.bf16.msra.mxu0 %v3317_v63  ;;  %v3347_v63 = vld [vmem:[%s4061_s1 + $0x3f8] sm:$0xff]  }
  0xd1   : > { %3121 = vmatpush3.bf16.msra.mxu1 %v3318_v0  ;;  %3102 = vmatprep.subr.bf16.mxu0 %v3382_v1  ;;  %v2079_v0 = vor.u32 %v2078_v55, %v2075_v54 }
  0xd2   : > { %3122 = vmatprep.subr.bf16.mxu1 %v3382_v1 }
  0xd4   : > { %3103 = vmatpush3.bf16.msra.mxu0 %v3319_v2  ;;  %v2087_v2 = vor.u32 %v2086_v57, %v2083_v56 }
  0xd5   : > { %3123 = vmatpush3.bf16.msra.mxu1 %v3320_v3  ;;  %3104 = vmatprep.subr.bf16.mxu0 %v3382_v1  ;;  %v1958_v3 = vsel %vm481_vm2, %v1956_v61, %v1957_v62 }
  0xd6   : > { %3124 = vmatprep.subr.bf16.mxu1 %v3382_v1  ;;  %v2088_v4 = vsel %vm598_vm3, %v2079_v0, %v2087_v2 }
  0xd8   : > { %3105 = vmatpush3.bf16.msra.mxu0 %v3321_v8 }
  0xd9   : > { %3125 = vmatpush3.bf16.msra.mxu1 %v3322_v9  ;;  %3106 = vmatprep.subr.bf16.mxu0 %v3382_v1 }
  0xda   : > { %3126 = vmatprep.subr.bf16.mxu1 %v3382_v1 }
  0xdc   : > { %3107 = vmatpush3.bf16.msra.mxu0 %v3323_v11 }
  0xdd   : > { %3127 = vmatpush3.bf16.msra.mxu1 %v3324_v13  ;;  %3108 = vmatprep.subr.bf16.mxu0 %v3382_v1 }
  0xde   : > { %3128 = vmatprep.subr.bf16.mxu1 %v3382_v1 }
  0xe0   : > { %3109 = vmatpush3.bf16.msra.mxu0 %v3325_v16 }
  0xe1   : > { %3129 = vmatpush3.bf16.msra.mxu1 %v3326_v17  ;;  %3110 = vmatprep.subr.bf16.mxu0 %v3382_v1 }
  0xe2   : > { %3130 = vmatprep.subr.bf16.mxu1 %v3382_v1 }
  0xe4   : > { %3111 = vmatpush3.bf16.msra.mxu0 %v3327_v21 }
  0xe5   : > { %3131 = vmatpush3.bf16.msra.mxu1 %v3328_v23  ;;  %3136 = vmatprep.subr.bf16.mxu0 %v3382_v1 }
  0xe6   : > { %3156 = vmatprep.subr.bf16.mxu1 %v3382_v1 }
  0xe7   : > { %3113 = vmatmul.mubr.bf16.vlgmr.msra.gmra.mrb[24].mxu0 %v2621_v26 }
  0xe8   : > { %3133 = vmatmul.mubr.bf16.vlgmr.msra.gmra.mrb[24].mxu1 %v1842_v28  ;;  %3137 = vmatpush3.bf16.msra.mxu0 %v3332_v27 }
  0xe9   : > { %3157 = vmatpush3.bf16.msra.mxu1 %v3333_v29  ;;  %3138 = vmatprep.subr.bf16.mxu0 %v3382_v1 }
  0xea   : > { %3158 = vmatprep.subr.bf16.mxu1 %v3382_v1  ;;  %3152 = vmatprep.mubr.msk.bf16.mxu0 %vm3383_vm0, %v3382_v1 }
  0xeb   : > { %3172 = vmatprep.mubr.msk.bf16.mxu1 %vm3383_vm0, %v3382_v1 }
  0xec   : > { %3139 = vmatpush3.bf16.msra.mxu0 %v3334_v6 }
  0xed   : > { %3159 = vmatpush3.bf16.msra.mxu1 %v3335_v7  ;;  %3140 = vmatprep.subr.bf16.mxu0 %v3382_v1 }
  0xee   : > { %3160 = vmatprep.subr.bf16.mxu1 %v3382_v1 }
  0xf0   : > { %3141 = vmatpush3.bf16.msra.mxu0 %v3336_v12 }
  0xf1   : > { %3161 = vmatpush3.bf16.msra.mxu1 %v3337_v30  ;;  %3142 = vmatprep.subr.bf16.mxu0 %v3382_v1 }
  0xf2   : > { %3162 = vmatprep.subr.bf16.mxu1 %v3382_v1 }
  0xf4   : > { %3143 = vmatpush3.bf16.msra.mxu0 %v3338_v31 }
  0xf5   : > { %3163 = vmatpush3.bf16.msra.mxu1 %v3339_v32  ;;  %3144 = vmatprep.subr.bf16.mxu0 %v3382_v1 }
  0xf6   : > { %3164 = vmatprep.subr.bf16.mxu1 %v3382_v1 }
  0xf8   : > { %3145 = vmatpush3.bf16.msra.mxu0 %v3340_v34 }
  0xf9   : > { %3165 = vmatpush3.bf16.msra.mxu1 %v3341_v35  ;;  %3146 = vmatprep.subr.bf16.mxu0 %v3382_v1 }
  0xfa   : > { %v363_v44 = vpop.f32.mrb[0].mxu0  ;;  %3166 = vmatprep.subr.bf16.mxu1 %v3382_v1 }
  0xfb   : > { %v453_v45 = vpop.f32.mrb[0].mxu1  ;;  %v2874_v46 = vpop.f32.mrb[1].mxu0 }
  0xfc   : > { %v454_v47 = vadd.f32 %v453_v45, %v363_v44  ;;  %v2894_v48 = vpop.f32.mrb[1].mxu1  ;;  %v366_v49 = vpop.f32.mrb[2].mxu0  ;;  %3147 = vmatpush3.bf16.msra.mxu0 %v3342_v38 }
  0xfd   : > { %v456_v52 = vpop.f32.mrb[2].mxu1  ;;  %3167 = vmatpush3.bf16.msra.mxu1 %v3343_v39  ;;  %v2875_v53 = vpop.f32.mrb[3].mxu0  ;;  %3148 = vmatprep.subr.bf16.mxu0 %v3382_v1 }
  0xfe   : > { %v457_v58 = vadd.f32 %v456_v52, %v366_v49  ;;  %v2895_v59 = vpop.f32.mrb[3].mxu1  ;;  %3168 = vmatprep.subr.bf16.mxu1 %v3382_v1 }
 0x100   : > { %3149 = vmatpush3.bf16.msra.mxu0 %v3344_v50 }
 0x101   : > { %3169 = vmatpush3.bf16.msra.mxu1 %v3345_v51  ;;  %3150 = vmatprep.subr.bf16.mxu0 %v3382_v1 }
 0x102   : > { %3170 = vmatprep.subr.bf16.mxu1 %v3382_v1 }
 0x104   : > { %3151 = vmatpush3.bf16.msra.mxu0 %v3346_v60 }
 0x105   : > { %3171 = vmatpush3.bf16.msra.mxu1 %v3347_v63 }
 0x107   : > { %3153 = vmatmul.mubr.bf16.vlgmr.msra.gmra.mrb[28].mxu0 %v1958_v3 }
 0x108   : > { %3173 = vmatmul.mubr.bf16.vlgmr.msra.gmra.mrb[28].mxu1 %v2088_v4 }
 0x11a   : > { %v568_v5 = vpop.f32.mrb[4].mxu0 }
 0x11b   : > { %v575_v8 = vadd.f32 %v568_v5, %v454_v47  ;;  %v699_v9 = vpop.f32.mrb[4].mxu1  ;;  %v2914_v10 = vpop.f32.mrb[5].mxu0 }
 0x11c   : > { %v2934_v11 = vpop.f32.mrb[5].mxu1  ;;  %v571_v13 = vpop.f32.mrb[6].mxu0 }
 0x11d   : > { %v706_v14 = vadd.f32 %v699_v9, %v575_v8  ;;  %v576_v15 = vadd.f32 %v571_v13, %v457_v58  ;;  %v702_v16 = vpop.f32.mrb[6].mxu1  ;;  %v2915_v17 = vpop.f32.mrb[7].mxu0 }
 0x11e   : > { %v2935_v18 = vpop.f32.mrb[7].mxu1 }
 0x11f   : > { %v707_v1 = vadd.f32 %v702_v16, %v576_v15 }
 0x13a   : > { %v812_v19 = vpop.f32.mrb[8].mxu0 }
 0x13b   : > { %v819_v20 = vadd.f32 %v812_v19, %v706_v14  ;;  %v944_v21 = vpop.f32.mrb[8].mxu1  ;;  %v2954_v22 = vpop.f32.mrb[9].mxu0  ;;  %v2706_v19 = vld [vmem:[%s4062_s2] ss:$0 sm:$0xff] }
 0x13c   : > { %v2974_v23 = vpop.f32.mrb[9].mxu1  ;;  %v815_v24 = vpop.f32.mrb[10].mxu0 }
 0x13d   : > { %v951_v25 = vadd.f32 %v944_v21, %v819_v20  ;;  %v820_v26 = vadd.f32 %v815_v24, %v707_v1  ;;  %v947_v27 = vpop.f32.mrb[10].mxu1  ;;  %v2955_v28 = vpop.f32.mrb[11].mxu0 }
 0x13e   : > { %v2975_v29 = vpop.f32.mrb[11].mxu1 }
 0x13f   : > { %v952_v6 = vadd.f32 %v947_v27, %v820_v26 }
 0x15a   : > { %v1060_v7 = vpop.f32.mrb[12].mxu0 }
 0x15b   : > { %v1067_v12 = vadd.f32 %v1060_v7, %v951_v25  ;;  %v1190_v30 = vpop.f32.mrb[12].mxu1  ;;  %v2994_v31 = vpop.f32.mrb[13].mxu0 }
 0x15c   : > { %v3014_v32 = vpop.f32.mrb[13].mxu1  ;;  %v1063_v33 = vpop.f32.mrb[14].mxu0 }
 0x15d   : > { %v1197_v34 = vadd.f32 %v1190_v30, %v1067_v12  ;;  %v1068_v35 = vadd.f32 %v1063_v33, %v952_v6  ;;  %v1193_v36 = vpop.f32.mrb[14].mxu1  ;;  %v2995_v37 = vpop.f32.mrb[15].mxu0 }
 0x15e   : > { %v3015_v38 = vpop.f32.mrb[15].mxu1 }
 0x15f   : > { %v1198_v39 = vadd.f32 %v1193_v36, %v1068_v35 }
 0x17a   : > { %v1303_v40 = vpop.f32.mrb[16].mxu0 }
 0x17b   : > { %v1310_v41 = vadd.f32 %v1303_v40, %v1197_v34  ;;  %v1435_v42 = vpop.f32.mrb[16].mxu1  ;;  %v3034_v43 = vpop.f32.mrb[17].mxu0 }
 0x17c   : > { %v3054_v44 = vpop.f32.mrb[17].mxu1  ;;  %v1306_v45 = vpop.f32.mrb[18].mxu0 }
 0x17d   : > { %v1442_v46 = vadd.f32 %v1435_v42, %v1310_v41  ;;  %v1311_v47 = vadd.f32 %v1306_v45, %v1198_v39  ;;  %v1438_v48 = vpop.f32.mrb[18].mxu1  ;;  %v3035_v49 = vpop.f32.mrb[19].mxu0 }
 0x17e   : > { %v3055_v50 = vpop.f32.mrb[19].mxu1 }
 0x17f   : > { %v1443_v51 = vadd.f32 %v1438_v48, %v1311_v47 }
 0x19a   : > { %v1551_v52 = vpop.f32.mrb[20].mxu0 }
 0x19b   : > { %v1558_v53 = vadd.f32 %v1551_v52, %v1442_v46  ;;  %v1681_v54 = vpop.f32.mrb[20].mxu1  ;;  %v3074_v55 = vpop.f32.mrb[21].mxu0 }
 0x19c   : > { %v3094_v56 = vpop.f32.mrb[21].mxu1  ;;  %v1554_v57 = vpop.f32.mrb[22].mxu0 }
 0x19d   : > { %v1688_v58 = vadd.f32 %v1681_v54, %v1558_v53  ;;  %v1559_v59 = vadd.f32 %v1554_v57, %v1443_v51  ;;  %v1684_v60 = vpop.f32.mrb[22].mxu1  ;;  %v3075_v61 = vpop.f32.mrb[23].mxu0 }
 0x19e   : > { %v3095_v62 = vpop.f32.mrb[23].mxu1 }
 0x19f   : > { %v1689_v63 = vadd.f32 %v1684_v60, %v1559_v59 }
 0x1ba   : > { %v1794_v0 = vpop.f32.mrb[24].mxu0 }
 0x1bb   : > { %v1801_v2 = vadd.f32 %v1794_v0, %v1688_v58  ;;  %v1926_v3 = vpop.f32.mrb[24].mxu1  ;;  %v3114_v4 = vpop.f32.mrb[25].mxu0 }
 0x1bc   : > { %v3134_v5 = vpop.f32.mrb[25].mxu1  ;;  %v1797_v8 = vpop.f32.mrb[26].mxu0 }
 0x1bd   : > { %v1933_v9 = vadd.f32 %v1926_v3, %v1801_v2  ;;  %v1802_v10 = vadd.f32 %v1797_v8, %v1689_v63  ;;  %v1929_v11 = vpop.f32.mrb[26].mxu1  ;;  %v3115_v13 = vpop.f32.mrb[27].mxu0 }
 0x1be   : > { %v3135_v14 = vpop.f32.mrb[27].mxu1 }
 0x1bf   : > { %v1934_v15 = vadd.f32 %v1929_v11, %v1802_v10 }
 0x1da   : > { %v2042_v16 = vpop.f32.mrb[28].mxu0 }
 0x1db   : > { %v2049_v17 = vadd.f32 %v2042_v16, %v1933_v9  ;;  %v2172_v18 = vpop.f32.mrb[28].mxu1  ;;  %v3154_v1 = vpop.f32.mrb[29].mxu0 }
 0x1dc   : > { %v3174_v20 = vpop.f32.mrb[29].mxu1  ;;  %v2045_v21 = vpop.f32.mrb[30].mxu0 }
 0x1dd   : > { %v2179_v22 = vadd.f32 %v2172_v18, %v2049_v17  ;;  %v2050_v23 = vadd.f32 %v2045_v21, %v1934_v15  ;;  %v2175_v24 = vpop.f32.mrb[30].mxu1  ;;  %v3155_v25 = vpop.f32.mrb[31].mxu0 }
 0x1de   : > { %v3175_v26 = vpop.f32.mrb[31].mxu1 }
 0x1df   : > { %v2188_v27 = vadd.f32 %v2706_v19, %v2179_v22  ;;  %v2180_v28 = vadd.f32 %v2175_v24, %v2050_v23 }
 0x1e1   : > { %v2707_v29 = vmul.f32 -1.442695, %v2188_v27  ;;  %v2189_v6 = vadd.f32 %v2706_v19, %v2180_v28 }
 0x1e3   : > { %3350 = vpow2.f32 %v2707_v29  ;;  %v2708_v7 = vmul.f32 -1.442695, %v2189_v6 }
 0x1e5   : > { %3352 = vpow2.f32 %v2708_v7 }
 0x1ed   : > { %v3351_v12 = vpop.eup %3350 }
 0x1ee   : > { %v2196_v30 = vadd.f32 1.0, %v3351_v12 }
 0x1ef   : > { %v3353_v31 = vpop.eup %3352 }
 0x1f0   : > { %3354 = vrcp.f32 %v2196_v30  ;;  %v2197_v32 = vadd.f32 1.0, %v3353_v31 }
 0x1f2   : > { %3356 = vrcp.f32 %v2197_v32 }
 0x1fa   : > { %v3355_v33 = vpop.eup %3354 }
 0x1fb   : > { %2202 = vst [vmem:[%s221_s11] sm:$0xff] %v3355_v33 }
 0x1fc   : > { %v3357_v34 = vpop.eup %3356 }
 0x1fd   : > { %2203 = vst [vmem:[%s221_s11 + $0x8] sm:$0xff] %v3357_v34 }
 0x1fe PF: > { %s13_s14 = sadd.s32 1, %s3380_s14   ;;  %s4064_s12 = smov %s3376_s13 }
 0x1ff   : > { %p10_p5 = scmp.ge.s32.totalorder %s13_s14, 4   ;;  %s4065_s13 = smov %s4067_s15 }
 0x201   :  { %12 = sbr.rel (!%p10_p5) target bundleno = 2 (0x2), region = 83 }

</bundles_post_ra>
